<compile_context>
chip_gen: v6e
topology: v6e:2x2x1
jax: 0.10.0
libtpu: 0.0.40
codegen_flags: <defaults>
</compile_context>

<pallas_src>
import functools
import math

import jax
import jax.numpy as jnp
from jax.experimental import pallas as pl
from jax.experimental.pallas import tpu as pltpu

BN_EPS = 1e-5  # torch.nn.BatchNorm1d default eps


# ---------------------------------------------------------------------------
# Pass 1: NonLocalBlock attention (flash-style over key tiles) + residual.
# Emits s2 = W(y) + x per batch plus per-batch BN sum / sum-of-squares.
# ---------------------------------------------------------------------------
def _nonlocal_pass1_kernel(tk,
                           xq_ref, xk_ref,
                           wtT_ref, bt_ref, wp_ref, bp_ref,
                           wgT_ref, bg_ref, wwT_ref, bw_ref,
                           s2_ref, sum_ref, ssq_ref,
                           xt_s, theta_s, m_s, l_s, acc_s):
    k = pl.program_id(1)
    n_k = pl.num_programs(1)
    bf16 = jnp.bfloat16

    # Per-batch init (first key tile): relayout x once, compute theta, reset
    # the online-softmax carry.
    @pl.when(k == 0)
    def _init():
        xt = xq_ref[0].T                                   # (C,T) -> (T,C), one XLU transpose / batch
        xt_s[...] = xt
        theta = jnp.dot(xt.astype(bf16), wtT_ref[...],
                        preferred_element_type=jnp.float32) + bt_ref[...]
        theta_s[...] = theta.astype(bf16)                  # (T, Ci)
        m_s[...] = jnp.full(m_s.shape, -jnp.inf, jnp.float32)
        l_s[...] = jnp.zeros(l_s.shape, jnp.float32)
        acc_s[...] = jnp.zeros(acc_s.shape, jnp.float32)

    # Current key tile ------------------------------------------------------
    xk_ct = xk_ref[0]                                      # (C, tk), NCT slab streamed from HBM
    # phi produced directly in (Ci, tk) layout -> no transpose before the MXU.
    phi = jnp.dot(wp_ref[...], xk_ct.astype(bf16),
                  preferred_element_type=jnp.float32) + bp_ref[...]       # (Ci, tk)
    off = pl.multiple_of(k * tk, tk)
    g = jnp.dot(xt_s[pl.ds(off, tk), :].astype(bf16), wgT_ref[...],
                preferred_element_type=jnp.float32) + bg_ref[...]         # (tk, Ci)

    # Online softmax update ---------------------------------------------------
    f = jnp.dot(theta_s[...], phi.astype(bf16),
                preferred_element_type=jnp.float32)                        # (T, tk)
    m_new = jnp.maximum(m_s[...], jnp.max(f, axis=-1, keepdims=True))      # (T, 1)
    alpha = jnp.exp(m_s[...] - m_new)
    p = jnp.exp(f - m_new)
    l_s[...] = alpha * l_s[...] + jnp.sum(p, axis=-1, keepdims=True)
    acc_s[...] = alpha * acc_s[...] + jnp.dot(
        p.astype(bf16), g.astype(bf16), preferred_element_type=jnp.float32)
    m_s[...] = m_new

    # Finalize: y -> W(y) + x, plus one-pass BN partial statistics -----------
    @pl.when(k == n_k - 1)
    def _finalize():
        y = acc_s[...] * pl.reciprocal(l_s[...], approx=True)              # (T, Ci)
        wy = jnp.dot(y.astype(bf16), wwT_ref[...],
                     preferred_element_type=jnp.float32) + bw_ref[...]     # (T, C)
        s2 = wy + xt_s[...]
        s2_ref[0] = s2
        sum_ref[0] = jnp.sum(s2, axis=0, keepdims=True)
        ssq_ref[0] = jnp.sum(s2 * s2, axis=0, keepdims=True)


# ---------------------------------------------------------------------------
# Pass 2: BatchNorm normalize (batch statistics) fused with GeM pooling.
# ---------------------------------------------------------------------------
def _bn_gem_pass2_kernel(p_gem, eps_gem, s2_ref, scale_ref, shift_ref, out_ref):
    s2 = s2_ref[0]                                        # (T, C)
    z = s2 * scale_ref[...] + shift_ref[...]              # BN normalize
    zc = jnp.maximum(z, eps_gem)                          # GeM clamp
    pooled = jnp.mean(zc ** p_gem, axis=0, keepdims=True)  # mean over T -> (1, C)
    out_ref[0] = pooled ** (1.0 / p_gem)


# ---------------------------------------------------------------------------
# Parameters
# ---------------------------------------------------------------------------
def init_params(key, channel):
    """Deterministic init matching torch Conv1d(k=1) / BatchNorm1d shapes."""
    ci = channel // 2
    ks = jax.random.split(key, 4)

    def conv_init(k, out_ch, in_ch):
        bound = 1.0 / math.sqrt(in_ch)                    # torch kaiming-uniform, k=1
        kw, kb = jax.random.split(k)
        w = jax.random.uniform(kw, (out_ch, in_ch), jnp.float32, -bound, bound)
        b = jax.random.uniform(kb, (out_ch,), jnp.float32, -bound, bound)
        return w, b

    wg, bg = conv_init(ks[0], ci, channel)                # g     : C  -> Ci
    wt, bt = conv_init(ks[1], ci, channel)                # theta : C  -> Ci
    wp, bp = conv_init(ks[2], ci, channel)                # phi   : C  -> Ci
    ww, bw = conv_init(ks[3], channel, ci)                # W     : Ci -> C
    return dict(wg=wg, bg=bg, wt=wt, bt=bt, wp=wp, bp=bp, ww=ww, bw=bw,
                gamma=jnp.ones((channel,), jnp.float32),
                beta=jnp.zeros((channel,), jnp.float32))


def prepare_kernel_params(prm):
    """Kernel-oriented layouts; MXU operands pre-cast to bf16 (f32 accumulation)."""
    ci, c = prm['wg'].shape
    b16 = jnp.bfloat16
    return dict(
        wtT=prm['wt'].T.astype(b16),        # (C, Ci): theta = x^T @ wt^T
        bt=prm['bt'].reshape(1, ci),
        wp=prm['wp'].astype(b16),           # (Ci, C): phi   = wp @ x  (stays in CT layout)
        bp_col=prm['bp'].reshape(ci, 1),
        wgT=prm['wg'].T.astype(b16),        # (C, Ci): g     = x^T @ wg^T
        bg=prm['bg'].reshape(1, ci),
        wwT=prm['ww'].T.astype(b16),        # (Ci, C): W(y)  = y @ ww^T
        bw=prm['bw'].reshape(1, c),
        gamma=prm['gamma'].reshape(1, c),
        beta=prm['beta'].reshape(1, c))


# ---------------------------------------------------------------------------
# Forward
# ---------------------------------------------------------------------------
def gemp_forward(x_nct, params, *, p=4.6, eps=1e-8, m=4):
    """x_nct: (B, C, T) float32 (torch NCT layout).  Returns (B, C, m)."""
    B, C, T = x_nct.shape
    Ci = C // 2
    x = x_nct.astype(jnp.float32)
    kp = prepare_kernel_params(params)

    tk = 128 if (T % 128 == 0) else T                     # key-tile size
    n_k = T // tk

    # VMEM budgeting (rough working-set estimates, clamped to 32..64 MiB).
    f32, b16 = 4, 2
    est1 = (2 * C * T * f32 + 2 * C * tk * f32            # x query / key blocks (double-buffered)
            + 2 * 4 * C * Ci * b16                        # weights
            + 2 * (T * C + 2 * C) * f32                   # outputs
            + T * C * f32 + T * Ci * (b16 + f32)          # scratch
            + (3 * T * tk + 4 * T * Ci + 2 * Ci * tk + T * C) * f32)
    est2 = 4 * T * C * f32 + 8 * C * f32
    clamp = lambda nbytes: int(min(max(2 * nbytes, 32 * 1024 * 1024),
                                   64 * 1024 * 1024))

    s2, sums, ssq = pl.pallas_call(
        functools.partial(_nonlocal_pass1_kernel, tk),
        out_shape=(jax.ShapeDtypeStruct((B, T, C), jnp.float32),
                   jax.ShapeDtypeStruct((B, 1, C), jnp.float32),
                   jax.ShapeDtypeStruct((B, 1, C), jnp.float32)),
        grid_spec=pltpu.PrefetchScalarGridSpec(
            num_scalar_prefetch=0,
            grid=(B, n_k),
            in_specs=[
                pl.BlockSpec((1, C, T), lambda b, k: (b, 0, 0)),   # x (queries, resident over k)
                pl.BlockSpec((1, C, tk), lambda b, k: (b, 0, k)),  # x (streamed key tile)
                pl.BlockSpec((C, Ci), lambda b, k: (0, 0)),        # theta^T (VMEM-resident)
                pl.BlockSpec((1, Ci), lambda b, k: (0, 0)),
                pl.BlockSpec((Ci, C), lambda b, k: (0, 0)),        # phi weight
                pl.BlockSpec((Ci, 1), lambda b, k: (0, 0)),
                pl.BlockSpec((C, Ci), lambda b, k: (0, 0)),        # g^T
                pl.BlockSpec((1, Ci), lambda b, k: (0, 0)),
                pl.BlockSpec((Ci, C), lambda b, k: (0, 0)),        # W^T
                pl.BlockSpec((1, C), lambda b, k: (0, 0)),
            ],
            out_specs=[
                pl.BlockSpec((1, T, C), lambda b, k: (b, 0, 0)),
                pl.BlockSpec((1, 1, C), lambda b, k: (b, 0, 0)),
                pl.BlockSpec((1, 1, C), lambda b, k: (b, 0, 0)),
            ],
            scratch_shapes=[
                pltpu.VMEM((T, C), jnp.float32),     # x^T (residual / g source)
                pltpu.VMEM((T, Ci), jnp.bfloat16),   # theta
                pltpu.VMEM((T, 1), jnp.float32),     # running max
                pltpu.VMEM((T, 1), jnp.float32),     # running sum
                pltpu.VMEM((T, Ci), jnp.float32),    # y accumulator
            ]),
        compiler_params=pltpu.CompilerParams(
            dimension_semantics=("parallel", "arbitrary"),
            vmem_limit_bytes=clamp(est1)),
    )(x, x, kp['wtT'], kp['bt'], kp['wp'], kp['bp_col'],
      kp['wgT'], kp['bg'], kp['wwT'], kp['bw'])

    # BatchNorm1d (training-mode) batch statistics -> affine scale/shift.
    # TODO(synk): running_mean/running_var buffer updates (training side effect)
    # are not reproduced; they do not affect the forward output.
    n = float(B * T)
    mean = jnp.sum(sums, axis=0) / n                      # (1, C)
    var = jnp.maximum(jnp.sum(ssq, axis=0) / n - mean * mean, 0.0)
    inv_std = jax.lax.rsqrt(var + BN_EPS)
    scale = kp['gamma'] * inv_std
    shift = kp['beta'] - mean * scale

    pooled = pl.pallas_call(
        functools.partial(_bn_gem_pass2_kernel, float(p), float(eps)),
        out_shape=jax.ShapeDtypeStruct((B, 1, C), jnp.float32),
        grid_spec=pltpu.PrefetchScalarGridSpec(
            num_scalar_prefetch=0,
            grid=(B,),
            in_specs=[
                pl.BlockSpec((1, T, C), lambda b: (b, 0, 0)),
                pl.BlockSpec((1, C), lambda b: (0, 0)),
                pl.BlockSpec((1, C), lambda b: (0, 0)),
            ],
            out_specs=pl.BlockSpec((1, 1, C), lambda b: (b, 0, 0))),
        compiler_params=pltpu.CompilerParams(
            dimension_semantics=("parallel",),
            vmem_limit_bytes=clamp(est2)),
    )(s2, scale, shift)

    pooled = pooled.reshape(B, C)
    # All m iterations of gemp.forward are identical -> compute once and
    # replicate along the concat axis (matches torch.cat(pooled_features, -1)).
    return jnp.broadcast_to(pooled[:, :, None], (B, C, m))


# ---------------------------------------------------------------------------
# Pure-JAX f32 reference (for a loose numerical check)
# ---------------------------------------------------------------------------
def gemp_reference(x_nct, prm, *, p=4.6, eps=1e-8, m=4):
    x = x_nct.astype(jnp.float32)                         # (B, C, T)

    def conv1x1(w, b, v):
        return jnp.einsum('oc,bct->bot', w, v) + b[None, :, None]

    g = conv1x1(prm['wg'], prm['bg'], x)                  # (B, Ci, T)
    th = conv1x1(prm['wt'], prm['bt'], x)
    ph = conv1x1(prm['wp'], prm['bp'], x)
    f = jnp.einsum('bct,bcs->bts', th, ph)                # (B, T, T)
    f = jax.nn.softmax(f, axis=-1)
    y = jnp.einsum('bts,bcs->bct', f, g)                  # (B, Ci, T)
    s2 = conv1x1(prm['ww'], prm['bw'], y) + x             # (B, C, T)

    mean = jnp.mean(s2, axis=(0, 2), keepdims=True)
    var = jnp.mean((s2 - mean) ** 2, axis=(0, 2), keepdims=True)
    z = (s2 - mean) * jax.lax.rsqrt(var + BN_EPS)
    z = z * prm['gamma'][None, :, None] + prm['beta'][None, :, None]

    zc = jnp.maximum(z, eps)
    pooled = jnp.mean(zc ** p, axis=2) ** (1.0 / p)       # (B, C)
    return jnp.broadcast_to(pooled[:, :, None], pooled.shape + (m,))


if __name__ == "__main__":
    # Small but lane/sublane-friendly shapes: C and Ci multiples of 128,
    # T a multiple of 128 (exercises the multi-key-tile online-softmax path).
    B, C, T, M = 2, 256, 256, 4
    key = jax.random.PRNGKey(0)
    kx, kparam = jax.random.split(key)
    x = jax.random.normal(kx, (B, C, T), jnp.float32)     # torch NCT layout
    params = init_params(kparam, C)

    out = gemp_forward(x, params, p=4.6, eps=1e-8, m=M)
    out = jax.block_until_ready(out)
    assert out.shape == (B, C, M), out.shape
    assert bool(jnp.all(jnp.isfinite(out)))

    # Loose check vs. the f32 reference (kernel uses bf16 MXU operands).
    ref = gemp_reference(x, params, p=4.6, eps=1e-8, m=M)
    rel = jnp.max(jnp.abs(out - ref) / (jnp.abs(ref) + 1e-6))
    assert float(rel) < 0.1, f"max relative error too large: {float(rel)}"
    print("KERNEL_OK")
</pallas_src>

<mosaic_0001>
module attributes {stable_mosaic.version = 11 : i64} {
  func.func @_nonlocal_pass1_kernel(%arg0: i32, %arg1: i32, %arg2: memref<1x256x256xf32, #tpu.memory_space<vmem>>, %arg3: memref<1x256x128xf32, #tpu.memory_space<vmem>>, %arg4: memref<256x128xbf16, #tpu.memory_space<vmem>>, %arg5: memref<1x128xf32, #tpu.memory_space<vmem>>, %arg6: memref<128x256xbf16, #tpu.memory_space<vmem>>, %arg7: memref<128x1xf32, #tpu.memory_space<vmem>>, %arg8: memref<256x128xbf16, #tpu.memory_space<vmem>>, %arg9: memref<1x128xf32, #tpu.memory_space<vmem>>, %arg10: memref<128x256xbf16, #tpu.memory_space<vmem>>, %arg11: memref<1x256xf32, #tpu.memory_space<vmem>>, %arg12: memref<1x256x256xf32, #tpu.memory_space<vmem>>, %arg13: memref<1x1x256xf32, #tpu.memory_space<vmem>>, %arg14: memref<1x1x256xf32, #tpu.memory_space<vmem>>, %arg15: memref<256x256xf32, #tpu.memory_space<vmem>>, %arg16: memref<256x128xbf16, #tpu.memory_space<vmem>>, %arg17: memref<256x1xf32, #tpu.memory_space<vmem>>, %arg18: memref<256x1xf32, #tpu.memory_space<vmem>>, %arg19: memref<256x128xf32, #tpu.memory_space<vmem>>) attributes {dimension_semantics = [#tpu.dimension_semantics<parallel>, #tpu.dimension_semantics<arbitrary>], iteration_bounds = array<i64: 2, 2>, scalar_prefetch = 0 : i64, scratch_operands = 5 : i64, tpu.core_type = #tpu.core_type<tc>, window_params = [{transform_indices = @transform_0, window_bounds = array<i64: 1, 256, 256>}, {transform_indices = @transform_1, window_bounds = array<i64: 1, 256, 128>}, {pipeline_mode = #tpu.pipeline_mode<synchronous>, transform_indices = @transform_2, window_bounds = array<i64: 256, 128>}, {pipeline_mode = #tpu.pipeline_mode<synchronous>, transform_indices = @transform_3, window_bounds = array<i64: 1, 128>}, {pipeline_mode = #tpu.pipeline_mode<synchronous>, transform_indices = @transform_4, window_bounds = array<i64: 128, 256>}, {pipeline_mode = #tpu.pipeline_mode<synchronous>, transform_indices = @transform_5, window_bounds = array<i64: 128, 1>}, {pipeline_mode = #tpu.pipeline_mode<synchronous>, transform_indices = @transform_6, window_bounds = array<i64: 256, 128>}, {pipeline_mode = #tpu.pipeline_mode<synchronous>, transform_indices = @transform_7, window_bounds = array<i64: 1, 128>}, {pipeline_mode = #tpu.pipeline_mode<synchronous>, transform_indices = @transform_8, window_bounds = array<i64: 128, 256>}, {pipeline_mode = #tpu.pipeline_mode<synchronous>, transform_indices = @transform_9, window_bounds = array<i64: 1, 256>}, {transform_indices = @transform_10, window_bounds = array<i64: 1, 256, 256>}, {transform_indices = @transform_11, window_bounds = array<i64: 1, 1, 256>}, {transform_indices = @transform_12, window_bounds = array<i64: 1, 1, 256>}]} {
    %c0_i32 = arith.constant 0 : i32
    %0 = arith.cmpi eq, %arg1, %c0_i32 : i32
    %1 = arith.extui %0 : i1 to i32
    %c0_i32_0 = arith.constant 0 : i32
    %2 = arith.cmpi ne, %1, %c0_i32_0 : i32
    scf.if %2 {
      %c0_34 = arith.constant 0 : index
      %c0_35 = arith.constant 0 : index
      %c0_36 = arith.constant 0 : index
      %52 = vector.load %arg2[%c0_34, %c0_35, %c0_36] : memref<1x256x256xf32, #tpu.memory_space<vmem>>, vector<1x256x256xf32>
      %53 = vector.shape_cast %52 : vector<1x256x256xf32> to vector<256x256xf32>
      %54 = tpu.transpose %53, [1, 0] : vector<256x256xf32> -> vector<256x256xf32>
      %c0_37 = arith.constant 0 : index
      %c0_38 = arith.constant 0 : index
      %55 = vector.load %arg15[%c0_37, %c0_38] : memref<256x256xf32, #tpu.memory_space<vmem>>, vector<256x256xf32>
      tpu.vector_store %arg15[%c0_37, %c0_38], %54 {strides = array<i32>} : memref<256x256xf32, #tpu.memory_space<vmem>>, vector<256x256xf32>,
      %56 = arith.truncf %54 : vector<256x256xf32> to vector<256x256xbf16>
      %c0_39 = arith.constant 0 : index
      %c0_40 = arith.constant 0 : index
      %57 = vector.load %arg4[%c0_39, %c0_40] : memref<256x128xbf16, #tpu.memory_space<vmem>>, vector<256x128xbf16>
      %cst_41 = arith.constant dense<0.000000e+00> : vector<256x128xf32>
      %58 = tpu.matmul %56, %57, %cst_41 {dimension_numbers = #tpu.dot_dimension_numbers<[1], [0], [0], [1], [0, 0, 1, 1], [], []>} : vector<256x256xbf16>, vector<256x128xbf16>, vector<256x128xf32> -> vector<256x128xf32>
      %c0_42 = arith.constant 0 : index
      %c0_43 = arith.constant 0 : index
      %59 = vector.load %arg5[%c0_42, %c0_43] : memref<1x128xf32, #tpu.memory_space<vmem>>, vector<1x128xf32>
      %60 = vector.broadcast %59 : vector<1x128xf32> to vector<256x128xf32>
      %61 = arith.addf %58, %60 : vector<256x128xf32>
      %62 = arith.truncf %61 : vector<256x128xf32> to vector<256x128xbf16>
      %c0_44 = arith.constant 0 : index
      %c0_45 = arith.constant 0 : index
      %63 = vector.load %arg16[%c0_44, %c0_45] : memref<256x128xbf16, #tpu.memory_space<vmem>>, vector<256x128xbf16>
      tpu.vector_store %arg16[%c0_44, %c0_45], %62 {strides = array<i32>} : memref<256x128xbf16, #tpu.memory_space<vmem>>, vector<256x128xbf16>,
      %cst_46 = arith.constant 0xFF800000 : f32
      %64 = vector.broadcast %cst_46 : f32 to vector<256x1xf32>
      %c0_47 = arith.constant 0 : index
      %c0_48 = arith.constant 0 : index
      %65 = vector.load %arg17[%c0_47, %c0_48] : memref<256x1xf32, #tpu.memory_space<vmem>>, vector<256x1xf32>
      tpu.vector_store %arg17[%c0_47, %c0_48], %64 {strides = array<i32>} : memref<256x1xf32, #tpu.memory_space<vmem>>, vector<256x1xf32>,
      %cst_49 = arith.constant 0.000000e+00 : f32
      %66 = vector.broadcast %cst_49 : f32 to vector<256x1xf32>
      %c0_50 = arith.constant 0 : index
      %c0_51 = arith.constant 0 : index
      %67 = vector.load %arg18[%c0_50, %c0_51] : memref<256x1xf32, #tpu.memory_space<vmem>>, vector<256x1xf32>
      tpu.vector_store %arg18[%c0_50, %c0_51], %66 {strides = array<i32>} : memref<256x1xf32, #tpu.memory_space<vmem>>, vector<256x1xf32>,
      %cst_52 = arith.constant 0.000000e+00 : f32
      %68 = vector.broadcast %cst_52 : f32 to vector<256x128xf32>
      %c0_53 = arith.constant 0 : index
      %c0_54 = arith.constant 0 : index
      %69 = vector.load %arg19[%c0_53, %c0_54] : memref<256x128xf32, #tpu.memory_space<vmem>>, vector<256x128xf32>
      tpu.vector_store %arg19[%c0_53, %c0_54], %68 {strides = array<i32>} : memref<256x128xf32, #tpu.memory_space<vmem>>, vector<256x128xf32>,
    } else {
    }
    %c0 = arith.constant 0 : index
    %c0_1 = arith.constant 0 : index
    %c0_2 = arith.constant 0 : index
    %3 = vector.load %arg3[%c0, %c0_1, %c0_2] : memref<1x256x128xf32, #tpu.memory_space<vmem>>, vector<1x256x128xf32>
    %4 = vector.shape_cast %3 : vector<1x256x128xf32> to vector<256x128xf32>
    %c0_3 = arith.constant 0 : index
    %c0_4 = arith.constant 0 : index
    %5 = vector.load %arg6[%c0_3, %c0_4] : memref<128x256xbf16, #tpu.memory_space<vmem>>, vector<128x256xbf16>
    %6 = arith.truncf %4 : vector<256x128xf32> to vector<256x128xbf16>
    %cst = arith.constant dense<0.000000e+00> : vector<128x128xf32>
    %7 = tpu.matmul %5, %6, %cst {dimension_numbers = #tpu.dot_dimension_numbers<[1], [0], [0], [1], [0, 0, 1, 1], [], []>} : vector<128x256xbf16>, vector<256x128xbf16>, vector<128x128xf32> -> vector<128x128xf32>
    %c0_5 = arith.constant 0 : index
    %c0_6 = arith.constant 0 : index
    %8 = vector.load %arg7[%c0_5, %c0_6] : memref<128x1xf32, #tpu.memory_space<vmem>>, vector<128x1xf32>
    %9 = vector.broadcast %8 : vector<128x1xf32> to vector<128x128xf32>
    %10 = arith.addf %7, %9 : vector<128x128xf32>
    %c128_i32 = arith.constant 128 : i32
    %11 = arith.muli %arg1, %c128_i32 : i32
    %12 = tpu.assume_multiple %11, 128 : i32
    %13 = arith.index_cast %12 : i32 to index
    %c0_7 = arith.constant 0 : index
    %14 = vector.load %arg15[%13, %c0_7] : memref<256x256xf32, #tpu.memory_space<vmem>>, vector<128x256xf32>
    %15 = arith.truncf %14 : vector<128x256xf32> to vector<128x256xbf16>
    %c0_8 = arith.constant 0 : index
    %c0_9 = arith.constant 0 : index
    %16 = vector.load %arg8[%c0_8, %c0_9] : memref<256x128xbf16, #tpu.memory_space<vmem>>, vector<256x128xbf16>
    %cst_10 = arith.constant dense<0.000000e+00> : vector<128x128xf32>
    %17 = tpu.matmul %15, %16, %cst_10 {dimension_numbers = #tpu.dot_dimension_numbers<[1], [0], [0], [1], [0, 0, 1, 1], [], []>} : vector<128x256xbf16>, vector<256x128xbf16>, vector<128x128xf32> -> vector<128x128xf32>
    %c0_11 = arith.constant 0 : index
    %c0_12 = arith.constant 0 : index
    %18 = vector.load %arg9[%c0_11, %c0_12] : memref<1x128xf32, #tpu.memory_space<vmem>>, vector<1x128xf32>
    %19 = vector.broadcast %18 : vector<1x128xf32> to vector<128x128xf32>
    %20 = arith.addf %17, %19 : vector<128x128xf32>
    %c0_13 = arith.constant 0 : index
    %c0_14 = arith.constant 0 : index
    %21 = vector.load %arg16[%c0_13, %c0_14] : memref<256x128xbf16, #tpu.memory_space<vmem>>, vector<256x128xbf16>
    %22 = arith.truncf %10 : vector<128x128xf32> to vector<128x128xbf16>
    %cst_15 = arith.constant dense<0.000000e+00> : vector<256x128xf32>
    %23 = tpu.matmul %21, %22, %cst_15 {dimension_numbers = #tpu.dot_dimension_numbers<[1], [0], [0], [1], [0, 0, 1, 1], [], []>} : vector<256x128xbf16>, vector<128x128xbf16>, vector<256x128xf32> -> vector<256x128xf32>
    %c0_16 = arith.constant 0 : index
    %c0_17 = arith.constant 0 : index
    %24 = vector.load %arg17[%c0_16, %c0_17] : memref<256x1xf32, #tpu.memory_space<vmem>>, vector<256x1xf32>
    %cst_18 = arith.constant dense<0xFF800000> : vector<256xf32>
    %25 = vector.multi_reduction <maximumf>, %23, %cst_18 [1] : vector<256x128xf32> to vector<256xf32>
    %26 = vector.shape_cast %25 : vector<256xf32> to vector<256x1xf32>
    %27 = arith.maximumf %24, %26 : vector<256x1xf32>
    %c0_19 = arith.constant 0 : index
    %c0_20 = arith.constant 0 : index
    %28 = vector.load %arg17[%c0_19, %c0_20] : memref<256x1xf32, #tpu.memory_space<vmem>>, vector<256x1xf32>
    %29 = arith.subf %28, %27 : vector<256x1xf32>
    %30 = math.exp %29 : vector<256x1xf32>
    %31 = vector.broadcast %27 : vector<256x1xf32> to vector<256x128xf32>
    %32 = arith.subf %23, %31 : vector<256x128xf32>
    %33 = math.exp %32 : vector<256x128xf32>
    %c0_21 = arith.constant 0 : index
    %c0_22 = arith.constant 0 : index
    %34 = vector.load %arg18[%c0_21, %c0_22] : memref<256x1xf32, #tpu.memory_space<vmem>>, vector<256x1xf32>
    %35 = arith.mulf %30, %34 : vector<256x1xf32>
    %cst_23 = arith.constant dense<0.000000e+00> : vector<256xf32>
    %36 = vector.multi_reduction <add>, %33, %cst_23 [1] : vector<256x128xf32> to vector<256xf32>
    %37 = vector.shape_cast %36 : vector<256xf32> to vector<256x1xf32>
    %38 = arith.addf %35, %37 : vector<256x1xf32>
    %c0_24 = arith.constant 0 : index
    %c0_25 = arith.constant 0 : index
    %39 = vector.load %arg18[%c0_24, %c0_25] : memref<256x1xf32, #tpu.memory_space<vmem>>, vector<256x1xf32>
    tpu.vector_store %arg18[%c0_24, %c0_25], %38 {strides = array<i32>} : memref<256x1xf32, #tpu.memory_space<vmem>>, vector<256x1xf32>,
    %c0_26 = arith.constant 0 : index
    %c0_27 = arith.constant 0 : index
    %40 = vector.load %arg19[%c0_26, %c0_27] : memref<256x128xf32, #tpu.memory_space<vmem>>, vector<256x128xf32>
    %41 = vector.broadcast %30 : vector<256x1xf32> to vector<256x128xf32>
    %42 = arith.mulf %41, %40 : vector<256x128xf32>
    %43 = arith.truncf %33 : vector<256x128xf32> to vector<256x128xbf16>
    %44 = arith.truncf %20 : vector<128x128xf32> to vector<128x128xbf16>
    %cst_28 = arith.constant dense<0.000000e+00> : vector<256x128xf32>
    %45 = tpu.matmul %43, %44, %cst_28 {dimension_numbers = #tpu.dot_dimension_numbers<[1], [0], [0], [1], [0, 0, 1, 1], [], []>} : vector<256x128xbf16>, vector<128x128xbf16>, vector<256x128xf32> -> vector<256x128xf32>
    %46 = arith.addf %42, %45 : vector<256x128xf32>
    %c0_29 = arith.constant 0 : index
    %c0_30 = arith.constant 0 : index
    %47 = vector.load %arg19[%c0_29, %c0_30] : memref<256x128xf32, #tpu.memory_space<vmem>>, vector<256x128xf32>
    tpu.vector_store %arg19[%c0_29, %c0_30], %46 {strides = array<i32>} : memref<256x128xf32, #tpu.memory_space<vmem>>, vector<256x128xf32>,
    %c0_31 = arith.constant 0 : index
    %c0_32 = arith.constant 0 : index
    %48 = vector.load %arg17[%c0_31, %c0_32] : memref<256x1xf32, #tpu.memory_space<vmem>>, vector<256x1xf32>
    tpu.vector_store %arg17[%c0_31, %c0_32], %27 {strides = array<i32>} : memref<256x1xf32, #tpu.memory_space<vmem>>, vector<256x1xf32>,
    %c1_i32 = arith.constant 1 : i32
    %49 = arith.cmpi eq, %arg1, %c1_i32 : i32
    %50 = arith.extui %49 : i1 to i32
    %c0_i32_33 = arith.constant 0 : i32
    %51 = arith.cmpi ne, %50, %c0_i32_33 : i32
    scf.if %51 {
      %c0_34 = arith.constant 0 : index
      %c0_35 = arith.constant 0 : index
      %52 = vector.load %arg19[%c0_34, %c0_35] : memref<256x128xf32, #tpu.memory_space<vmem>>, vector<256x128xf32>
      %c0_36 = arith.constant 0 : index
      %c0_37 = arith.constant 0 : index
      %53 = vector.load %arg18[%c0_36, %c0_37] : memref<256x1xf32, #tpu.memory_space<vmem>>, vector<256x1xf32>
      %54 = tpu.reciprocal %53 {approx = true} : vector<256x1xf32> -> vector<256x1xf32>
      %55 = vector.broadcast %54 : vector<256x1xf32> to vector<256x128xf32>
      %56 = arith.mulf %52, %55 : vector<256x128xf32>
      %57 = arith.truncf %56 : vector<256x128xf32> to vector<256x128xbf16>
      %c0_38 = arith.constant 0 : index
      %c0_39 = arith.constant 0 : index
      %58 = vector.load %arg10[%c0_38, %c0_39] : memref<128x256xbf16, #tpu.memory_space<vmem>>, vector<128x256xbf16>
      %cst_40 = arith.constant dense<0.000000e+00> : vector<256x256xf32>
      %59 = tpu.matmul %57, %58, %cst_40 {dimension_numbers = #tpu.dot_dimension_numbers<[1], [0], [0], [1], [0, 0, 1, 1], [], []>} : vector<256x128xbf16>, vector<128x256xbf16>, vector<256x256xf32> -> vector<256x256xf32>
      %c0_41 = arith.constant 0 : index
      %c0_42 = arith.constant 0 : index
      %60 = vector.load %arg11[%c0_41, %c0_42] : memref<1x256xf32, #tpu.memory_space<vmem>>, vector<1x256xf32>
      %61 = vector.broadcast %60 : vector<1x256xf32> to vector<256x256xf32>
      %62 = arith.addf %59, %61 : vector<256x256xf32>
      %c0_43 = arith.constant 0 : index
      %c0_44 = arith.constant 0 : index
      %63 = vector.load %arg15[%c0_43, %c0_44] : memref<256x256xf32, #tpu.memory_space<vmem>>, vector<256x256xf32>
      %64 = arith.addf %62, %63 : vector<256x256xf32>
      %c0_45 = arith.constant 0 : index
      %c0_46 = arith.constant 0 : index
      %c0_47 = arith.constant 0 : index
      %65 = vector.load %arg12[%c0_45, %c0_46, %c0_47] : memref<1x256x256xf32, #tpu.memory_space<vmem>>, vector<1x256x256xf32>
      %66 = vector.shape_cast %65 : vector<1x256x256xf32> to vector<256x256xf32>
      %67 = vector.shape_cast %64 : vector<256x256xf32> to vector<1x256x256xf32>
      tpu.vector_store %arg12[%c0_45, %c0_46, %c0_47], %67 {strides = array<i32>} : memref<1x256x256xf32, #tpu.memory_space<vmem>>, vector<1x256x256xf32>,
      %cst_48 = arith.constant dense<0.000000e+00> : vector<256xf32>
      %68 = vector.multi_reduction <add>, %64, %cst_48 [0] : vector<256x256xf32> to vector<256xf32>
      %69 = vector.shape_cast %68 : vector<256xf32> to vector<1x256xf32>
      %c0_49 = arith.constant 0 : index
      %c0_50 = arith.constant 0 : index
      %c0_51 = arith.constant 0 : index
      %70 = vector.load %arg13[%c0_49, %c0_50, %c0_51] : memref<1x1x256xf32, #tpu.memory_space<vmem>>, vector<1x1x256xf32>
      %71 = vector.shape_cast %70 : vector<1x1x256xf32> to vector<1x256xf32>
      %72 = vector.shape_cast %69 : vector<1x256xf32> to vector<1x1x256xf32>
      tpu.vector_store %arg13[%c0_49, %c0_50, %c0_51], %72 {strides = array<i32>} : memref<1x1x256xf32, #tpu.memory_space<vmem>>, vector<1x1x256xf32>,
      %73 = arith.mulf %64, %64 : vector<256x256xf32>
      %cst_52 = arith.constant dense<0.000000e+00> : vector<256xf32>
      %74 = vector.multi_reduction <add>, %73, %cst_52 [0] : vector<256x256xf32> to vector<256xf32>
      %75 = vector.shape_cast %74 : vector<256xf32> to vector<1x256xf32>
      %c0_53 = arith.constant 0 : index
      %c0_54 = arith.constant 0 : index
      %c0_55 = arith.constant 0 : index
      %76 = vector.load %arg14[%c0_53, %c0_54, %c0_55] : memref<1x1x256xf32, #tpu.memory_space<vmem>>, vector<1x1x256xf32>
      %77 = vector.shape_cast %76 : vector<1x1x256xf32> to vector<1x256xf32>
      %78 = vector.shape_cast %75 : vector<1x256xf32> to vector<1x1x256xf32>
      tpu.vector_store %arg14[%c0_53, %c0_54, %c0_55], %78 {strides = array<i32>} : memref<1x1x256xf32, #tpu.memory_space<vmem>>, vector<1x1x256xf32>,
    } else {
    }
    return
  }
  func.func @transform_0(%arg0: i32, %arg1: i32) -> (i32, i32, i32) {
    %c0_i32 = arith.constant 0 : i32
    %c0_i32_0 = arith.constant 0 : i32
    %c0_i32_1 = arith.constant 0 : i32
    return %arg0, %c0_i32, %c0_i32_0 : i32, i32, i32
  }
  func.func @transform_1(%arg0: i32, %arg1: i32) -> (i32, i32, i32) {
    %c0_i32 = arith.constant 0 : i32
    %c0_i32_0 = arith.constant 0 : i32
    return %arg0, %c0_i32, %arg1 : i32, i32, i32
  }
  func.func @transform_2(%arg0: i32, %arg1: i32) -> (i32, i32) {
    %c0_i32 = arith.constant 0 : i32
    %c0_i32_0 = arith.constant 0 : i32
    %c0_i32_1 = arith.constant 0 : i32
    return %c0_i32, %c0_i32_0 : i32, i32
  }
  func.func @transform_3(%arg0: i32, %arg1: i32) -> (i32, i32) {
    %c0_i32 = arith.constant 0 : i32
    %c0_i32_0 = arith.constant 0 : i32
    %c0_i32_1 = arith.constant 0 : i32
    return %c0_i32, %c0_i32_0 : i32, i32
  }
  func.func @transform_4(%arg0: i32, %arg1: i32) -> (i32, i32) {
    %c0_i32 = arith.constant 0 : i32
    %c0_i32_0 = arith.constant 0 : i32
    %c0_i32_1 = arith.constant 0 : i32
    return %c0_i32, %c0_i32_0 : i32, i32
  }
  func.func @transform_5(%arg0: i32, %arg1: i32) -> (i32, i32) {
    %c0_i32 = arith.constant 0 : i32
    %c0_i32_0 = arith.constant 0 : i32
    %c0_i32_1 = arith.constant 0 : i32
    return %c0_i32, %c0_i32_0 : i32, i32
  }
  func.func @transform_6(%arg0: i32, %arg1: i32) -> (i32, i32) {
    %c0_i32 = arith.constant 0 : i32
    %c0_i32_0 = arith.constant 0 : i32
    %c0_i32_1 = arith.constant 0 : i32
    return %c0_i32, %c0_i32_0 : i32, i32
  }
  func.func @transform_7(%arg0: i32, %arg1: i32) -> (i32, i32) {
    %c0_i32 = arith.constant 0 : i32
    %c0_i32_0 = arith.constant 0 : i32
    %c0_i32_1 = arith.constant 0 : i32
    return %c0_i32, %c0_i32_0 : i32, i32
  }
  func.func @transform_8(%arg0: i32, %arg1: i32) -> (i32, i32) {
    %c0_i32 = arith.constant 0 : i32
    %c0_i32_0 = arith.constant 0 : i32
    %c0_i32_1 = arith.constant 0 : i32
    return %c0_i32, %c0_i32_0 : i32, i32
  }
  func.func @transform_9(%arg0: i32, %arg1: i32) -> (i32, i32) {
    %c0_i32 = arith.constant 0 : i32
    %c0_i32_0 = arith.constant 0 : i32
    %c0_i32_1 = arith.constant 0 : i32
    return %c0_i32, %c0_i32_0 : i32, i32
  }
  func.func @transform_10(%arg0: i32, %arg1: i32) -> (i32, i32, i32) {
    %c0_i32 = arith.constant 0 : i32
    %c0_i32_0 = arith.constant 0 : i32
    %c0_i32_1 = arith.constant 0 : i32
    return %arg0, %c0_i32, %c0_i32_0 : i32, i32, i32
  }
  func.func @transform_11(%arg0: i32, %arg1: i32) -> (i32, i32, i32) {
    %c0_i32 = arith.constant 0 : i32
    %c0_i32_0 = arith.constant 0 : i32
    %c0_i32_1 = arith.constant 0 : i32
    return %arg0, %c0_i32, %c0_i32_0 : i32, i32, i32
  }
  func.func @transform_12(%arg0: i32, %arg1: i32) -> (i32, i32, i32) {
    %c0_i32 = arith.constant 0 : i32
    %c0_i32_0 = arith.constant 0 : i32
    %c0_i32_1 = arith.constant 0 : i32
    return %arg0, %c0_i32, %c0_i32_0 : i32, i32, i32
  }
}

</mosaic_0001>

<bundles_post_ra>
// kernel: tpu_custom_call.1
= control target key start
LH: loop header
LB: loop body
LE: loop exit
PB: predicated region body
PF: predicated region fallthrough
CT: control target
= control target key end

     0   :  { %s8487_s0 = inlined_call_operand.hbm [shape: f32[2,256,256], index: 0, kind: input, shape index: {}]   ;;  %s8488_s1 = inlined_call_operand.hbm [shape: f32[2,256,256], index: 1, kind: input, shape index: {}]   ;;  %s8489_s2 = inlined_call_operand.vmem [shape: bf16[256,128], index: 2, kind: input, shape index: {}]   ;;  %s8490_s3 = inlined_call_operand.vmem [shape: f32[1,128], index: 3, kind: input, shape index: {}]   ;;  %s8491_s4 = inlined_call_operand.hbm [shape: bf16[128,256], index: 4, kind: input, shape index: {}]   ;;  %s8492_s5 = inlined_call_operand.vmem [shape: f32[128,1], index: 5, kind: input, shape index: {}]   ;;  %s8493_s6 = inlined_call_operand.hbm [shape: bf16[256,128], index: 6, kind: input, shape index: {}]   ;;  %s8494_s7 = inlined_call_operand.vmem [shape: f32[1,128], index: 7, kind: input, shape index: {}]   ;;  %s8495_s8 = inlined_call_operand.hbm [shape: bf16[128,256], index: 8, kind: input, shape index: {}]   ;;  %s8496_s9 = inlined_call_operand.vmem [shape: f32[1,256], index: 9, kind: input, shape index: {}]   ;;  %s8497_s10 = inlined_call_operand.hbm [shape: f32[2,256,256], index: 10, kind: output, shape index: {0}]   ;;  %s8498_s11 = inlined_call_operand.hbm [shape: f32[2,1,256], index: 11, kind: output, shape index: {1}]   ;;  %s8499_s12 = inlined_call_operand.hbm [shape: f32[2,1,256], index: 12, kind: output, shape index: {2}]  }
   0x1   :  { %8549 = sst [smem:[#allocation64_spill]] %s8487_s0 }
   0x2   :  { %8550 = sst [smem:[#allocation65_spill]] %s8488_s1 }
   0x3   :  { %8551 = sst [smem:[#allocation66_spill]] %s8489_s2 }
   0x4   :  { %8552 = sst [smem:[#allocation67_spill]] %s8490_s3 }
   0x5   :  { %8553 = sst [smem:[#allocation68_spill]] %s8491_s4 }
   0x6   :  { %8554 = sst [smem:[#allocation69_spill]] %s8492_s5 }
   0x7   :  { %8555 = sst [smem:[#allocation70_spill]] %s8493_s6 }
   0x8   :  { %8556 = sst [smem:[#allocation71_spill]] %s8494_s7 }
   0x9   :  { %8557 = sst [smem:[#allocation72_spill]] %s8495_s8 }
   0xa   :  { %8558 = sst [smem:[#allocation73_spill]] %s8496_s9 }
   0xb   :  { %8559 = sst [smem:[#allocation74_spill]] %s8497_s10 }
   0xc   :  { %8560 = sst [smem:[#allocation75_spill]] %s8498_s11 }
   0xd   :  { %8561 = sst [smem:[#allocation76_spill]] %s8499_s12 }
   0xe   :  { %18 = vsyncpa [#allocation8], 0 }
   0xf   :  { %20 = vsyncpa [#allocation8 + $0x1], 0 }
  0x10   :  { %21 = vsyncpa [#allocation11], 0 }
  0x11   :  { %23 = vsyncpa [#allocation11 + $0x1], 0 }
  0x12   :  { %24 = vsyncpa [#allocation14], 0 }
  0x13   :  { %25 = vsyncpa [#allocation9], 0 }
  0x14   :  { %27 = vsyncpa [#allocation9 + $0x1], 0 }
  0x15   :  { %28 = vsyncpa [#allocation18], 0 }
  0x16   :  { %30 = vsyncpa [#allocation18 + $0x1], 0  ;;  %s6362_s21 = smov 0   ;;  %s6364_s22 = smov 0  }
  0x17   :  { %s6366_s23 = smov 0   ;;  %s6368_s24 = smov 0  }
  0x18   :  { %s6370_s25 = smov 0   ;;  %s6372_s26 = smov 0  }
  0x19   :  { %s6374_s27 = smov 0   ;;  %s6376_s28 = smov 0  }
  0x1a   :  { %s6378_s29 = smov 0   ;;  %s6380_s30 = smov 0  }
  0x1b   :  { %s6382_s13 = smov 0  }
  0x1c LB: > { %8562 = sst [smem:[#allocation26_spill]] %s6246_s24  ;;  %s6416_s14 = sadd.s32 4294967295, %s6274_s13   ;;  %s6274_s13 = sphi %s6382_s13, %s36_s13   ;;  %s6270_s30 = sphi %s6380_s30, %s8705_s30   ;;  %s6266_s29 = sphi %s6378_s29, %s8704_s29   ;;  %s6262_s28 = sphi %s6376_s28, %s8703_s28   ;;  %s6258_s27 = sphi %s6374_s27, %s8702_s27   ;;  %s6254_s26 = sphi %s6372_s26, %s8694_s26   ;;  %s6250_s25 = sphi %s6370_s25, %s8701_s25   ;;  %s6246_s24 = sphi %s6368_s24, %s8700_s24   ;;  %s6242_s23 = sphi %s6366_s23, %s8699_s23   ;;  %s6238_s22 = sphi %s6364_s22, %s8698_s22   ;;  %s6234_s21 = sphi %s6362_s21, %s8697_s21  }
  0x1d   : > { %8563 = sst [smem:[#allocation27_spill]] %s6254_s26  ;;  %s8500_s15 = sadd.s32 4294967294, %s6274_s13  }
  0x1e   : > { %8564 = sst [smem:[#allocation28_spill]] %s6258_s27  ;;  %p68_p0 = scmp.ne.s32.totalorder %s6250_s25, %s6246_s24 }
  0x1f   : > { %8565 = sst [smem:[#allocation29_spill]] %s6262_s28  ;;  %p8516_p1 = scmp.eq.s32.totalorder %s6416_s14, 0 }
  0x20   : > { %p96_p4 = scmp.ne.s32.totalorder %s6238_s22, %s6234_s21  ;;  %p294_p6 = scmp.eq.s32.totalorder %s8500_s15, 3 }
  0x21   : > { %p6427_p3 = por %p8516_p1, %p68_p0  ;;  %p4801_p8 = scmp.ge.s32.totalorder %s6274_s13, 1 }
  0x22   : > { %p6437_p7 = por %p96_p4, %p8516_p1  ;;  %p6442_p9 = por %p294_p6, %p68_p0 }
  0x23   : > { %p353_p10 = scmp.lt.s32.totalorder %s6274_s13, 5  ;;  %s6276_s21 = smov [#allocation12]  }
  0x24   : > { %s8567_s18 = scalar_select %p6437_p7, 1, 0 }
  0x25   : > { %s8568_s19 = scalar_select %p6442_p9, 1, 0 }
  0x26   : > { %p6447_p11 = pnand %p4801_p8, %p353_p10  ;;  %s371_s16 = sshll.u32 %s6276_s21, 4  ;;  %s372_s16 = int_to_ptr.vmem [resolvable:$true] %s371_s16 }
  0x27   : > { %8569 = sst [smem:[#allocation30_spill]] %s8568_s19  ;;  %s6277_s24 = smov [#allocation13]  }
  0x28   : > { %p5521_p12 = pneg %p6447_p11  ;;  %s387_s19 = sshll.u32 %s6277_s24, 4  ;;  %s388_s19 = int_to_ptr.vmem [resolvable:$true] %s387_s19 }
  0x29   : > { %s5963_s12 = scalar_lea.vmem %s372_s16, 2048  ;;  %p5971_p10 = scmp.lt.s32.totalorder %s372_s16, %s372_s16 }
  0x2a   : > { %p6455_p13 = pnand %p5521_p12, %p8516_p1  ;;  %p5964_p4 = scmp.ne.s32.totalorder %s372_s16, %s5963_s12 }
  0x2b   : > { %p5972_p2 = scmp.lt.s32.totalorder %s5963_s12, %s5963_s12 }
  0x2c   : > { %p5954_p0 = pneg %p6455_p13 }
  0x2d   : > { %p5973_p5 = por %p5972_p2, %p5971_p10 }
  0x2e   : > { %p5966_p6 = pnand %p5964_p4, %p5954_p0 }
  0x30   : > { %p5967_p8 = pneg %p5966_p6 }
  0x32   : > { %p5974_p12 = pnand %p5973_p5, %p5967_p8 }
  0x34   : > { %5977 = shalt.err (!%p5974_p12)
}
  0x35   : > { %s8508_s21 = smov 128   ;;  %s8509_s10 = smov 8  }
  0x36   : > { %s8572_s4 = sld [smem:[#allocation68_spill]]  ;;  %s5989_s28 = scalar_lea.vmem %s388_s19, 2048 }
  0x37   : > { %p5990_p4 = scmp.ne.s32.totalorder %s388_s19, %s5989_s28  ;;  %p5997_p5 = scmp.lt.s32.totalorder %s388_s19, %s388_s19 }
  0x38   : > { %p5998_p8 = scmp.lt.s32.totalorder %s5989_s28, %s5989_s28 }
  0x39   : > { %p5992_p6 = pnand %p5990_p4, %p5954_p0 }
  0x3a   : > { %p5999_p10 = por %p5998_p8, %p5997_p5 }
  0x3b   : > { %p5993_p2 = pneg %p5992_p6 }
  0x3c   : > { %5524 = dma.hbm_to_vmem [thread:$0]  (!%p6455_p13), %s8572_s4, 2048, %s372_s16, [#allocation11], %s8508_s21, %s8508_s21, %s8509_s10  }
  0x3d   : > { %p6000_p12 = pnand %p5999_p10, %p5993_p2 }
  0x3f   : > { %6003 = shalt.err (!%p6000_p12)
}
  0x40   : > { %s6280_s12 = smov 64   ;;  %s6281_s9 = smov 4  }
  0x41   : > { %s8573_s6 = sld [smem:[#allocation70_spill]]  ;;  %s6282_s11 = smov [#allocation15]  }
  0x42   : > { %s403_s16 = sshll.u32 %s6282_s11, 4  ;;  %s404_s16 = int_to_ptr.vmem [resolvable:$true] %s403_s16 }
  0x43   : > { %s6015_s24 = scalar_lea.vmem %s404_s16, 2048  ;;  %p6023_p2 = scmp.lt.s32.totalorder %s404_s16, %s404_s16 }
  0x44   : > { %p6016_p4 = scmp.ne.s32.totalorder %s404_s16, %s6015_s24  ;;  %p6024_p8 = scmp.lt.s32.totalorder %s6015_s24, %s6015_s24 }
  0x46   : > { %p6018_p6 = pnand %p6016_p4, %p5954_p0  ;;  %p6025_p10 = por %p6024_p8, %p6023_p2 }
  0x47   : > { %5527 = dma.hbm_to_vmem [thread:$0]  (!%p6455_p13), %s8573_s6, 2048, %s388_s19, [#allocation14], %s6280_s12, %s6280_s12, %s6281_s9  }
  0x48   : > { %p6019_p5 = pneg %p6018_p6 }
  0x4a   : > { %p6026_p12 = pnand %p6025_p10, %p6019_p5 }
  0x4c   : > { %6029 = shalt.err (!%p6026_p12)
}
  0x4d   : > { %s8574_s8 = sld [smem:[#allocation72_spill]]  ;;  %s45_s9 = sadd.s32 1, %s6266_s29 }
  0x4e   : > { %p46_p0 = scmp.ge.s32.totalorder %s45_s9, 2  ;;  %s48_s28 = sadd.s32 1, %s6270_s30 }
  0x4f   : > { %s55_s15 = sadd.s32 1, %s6254_s26  ;;  %p62_p4 = scmp.ne.s32.totalorder %s6254_s26, %s6250_s25 }
  0x50   : > { %s8707_s9 = smov (%p46_p0, %s45_s9), 0  ;;  %s8709_s28 = smov (!%p46_p0, %s48_s28), %s6270_s30 }
  0x51   : > { %8575 = sst [smem:[#allocation31_spill]] %s8707_s9  ;;  %p63_p6 = scmp.eq.s32.totalorder %s6274_s13, 0 }
  0x52   : > { %s79_s19 = ssub.s32 %s6266_s29, %s8707_s9  ;;  %p50_p5 = scmp.ge.s32.totalorder %s8709_s28, 2 }
  0x53   : > { %5530 = dma.hbm_to_vmem [thread:$0]  (!%p6455_p13), %s8574_s8, 2048, %s404_s16, [#allocation14], %s8508_s21, %s8508_s21, %s8509_s10  }
  0x54   : > { %p8576_p2 = scmp.eq.s32.totalorder %s6416_s14, 3  ;;  %p6508_p8 = por %p63_p6, %p62_p4 }
  0x55   : > { %p8580_p10 = scmp.ne.s32.totalorder %s6242_s23, %s6238_s22  ;;  %s8711_s28 = smov (%p50_p5, %s8709_s28), 0 }
  0x56   : > { %p6504_p13 = por %p8576_p2, %p62_p4  ;;  %8582 = sst [smem:[#allocation33_spill]] %s8711_s28 }
  0x57   : > { %p6515_p12 = por %p8580_p10, %p63_p6  ;;  %p5551_p0 = scmp.lt.s32.totalorder %s6274_s13, 4 }
  0x58   : > { %s8577_s12 = scalar_select %p6504_p13, 1, 0 }
  0x59   : > { %s420_s24 = sand.u32 1, %s6254_s26   ;;  %s52_s5 = ssub.s32 %s6270_s30, %s8711_s28 }
  0x5a   : > { %8578 = sst [smem:[#allocation32_spill]] %s8577_s12  ;;  %p53_p2 = scmp.eq.s32.totalorder %s52_s5, 0 }
  0x5b   : > { %s80_s7 = sor.u32 %s79_s19, %s52_s5  ;;  %s4806_s21 = sshll.u32 %s420_s24, 9 }
  0x5c   : > { %p81_p4 = scmp.eq.s32.totalorder %s80_s7, 0  ;;  %s8584_s4 = sadd.s32 1, %s6242_s23 }
  0x5d   : > { %s6526_s10 = scalar_select %p53_p2, %s6254_s26, %s55_s15  }
  0x5e   : > { %s6531_s6 = scalar_select %p81_p4, %s6242_s23, %s8584_s4  }
  0x5f   : > { %8583 = sst [smem:[#allocation34_spill]] %s6526_s10  ;;  %s4951_s8 = sshll.u32 %s6270_s30, 13 }
  0x60   : > { %s8585_s0 = sld [smem:[#allocation64_spill]]  ;;  %s424_s2 = scalar_lea.vmem [#allocation7], %s4806_s21 }
  0x61   : > { %s431_s27 = sshll.u32 %s424_s2, 4  ;;  %p6541_p6 = pnand %p5551_p0, %p6508_p8  ;;  %s432_s27 = int_to_ptr.vmem [resolvable:$true] %s431_s27 }
  0x62   : > { %p6549_p5 = pnand %p5551_p0, %p6515_p12  ;;  %s421_s15 = scalar_lea.sflag [#allocation8], %s420_s24 }
  0x63   : > { %p6032_p10 = pneg %p6541_p6  ;;  %s6283_s2 = smov [#allocation7]  }
  0x64   : > { %s6048_s21 = sshll.u32 %s6283_s2, 4  ;;  %s6049_s21 = int_to_ptr.vmem [resolvable:$false] %s6048_s21 }
  0x65   : > { %s6050_s9 = scalar_lea.vmem %s6049_s21, 16384  ;;  %p6051_p8 = scmp.lt.s32.totalorder %s432_s27, %s6049_s21 }
  0x66   : > { %s430_s3 = scalar_lea.hbm %s8585_s0, %s4951_s8  ;;  %s6043_s8 = scalar_lea.vmem %s432_s27, 8192 }
  0x67   : > { %p6044_p2 = scmp.ne.s32.totalorder %s432_s27, %s6043_s8  ;;  %p6052_p9 = scmp.lt.s32.totalorder %s6050_s9, %s6043_s8 }
  0x69   : > { %p6046_p4 = pnand %p6044_p2, %p6032_p10  ;;  %p6053_p13 = por %p6052_p9, %p6051_p8 }
  0x6b   : > { %p6047_p1 = pneg %p6046_p4 }
  0x6d   : > { %p6054_p7 = pnand %p6053_p13, %p6047_p1 }
  0x6f   : > { %6057 = shalt.err (!%p6054_p7)
}
  0x70   : > { %s6284_s19 = smov 256   ;;  %s6285_s12 = smov 16  }
  0x71   : > { %5534 = dma.hbm_to_vmem [thread:$0]  (!%p6541_p6), %s430_s3, 8192, %s432_s27, %s421_s15, %s6284_s19, %s6284_s19, %s6285_s12  }
  0x72   : > { %s441_s11 = sand.u32 1, %s6274_s13   ;;  %s443_s16 = sand.u32 1, %s6242_s23  }
  0x73   : > { %s4809_s24 = sshll.u32 %s443_s16, 8  ;;  %s4810_s5 = sshll.u32 %s6270_s30, 6 }
  0x74   : > { %s450_s7 = sadd.s32 %s6266_s29, %s4810_s5  ;;  %s445_s2 = scalar_lea.vmem [#allocation10], %s4809_s24 }
  0x75   : > { %s4811_s8 = sshll.u32 %s450_s7, 7  ;;  %s453_s21 = sshll.u32 %s445_s2, 4  ;;  %s454_s21 = int_to_ptr.vmem [resolvable:$true] %s453_s21 }
  0x76   : > { %s8588_s1 = sld [smem:[#allocation65_spill]]  ;;  %s442_s26 = scalar_lea.sflag [#allocation11], %s441_s11 }
  0x77   : > { %p6060_p1 = pneg %p6549_p5  ;;  %s6071_s28 = scalar_lea.vmem %s454_s21, 4096 }
  0x78   : > { %p6072_p7 = scmp.ne.s32.totalorder %s454_s21, %s6071_s28  ;;  %s6286_s3 = smov [#allocation10]  }
  0x79   : > { %s6076_s27 = sshll.u32 %s6286_s3, 4  ;;  %s6077_s27 = int_to_ptr.vmem [resolvable:$false] %s6076_s27 }
  0x7a   : > { %p6074_p9 = pnand %p6072_p7, %p6060_p1  ;;  %s6078_s15 = scalar_lea.vmem %s6077_s27, 8192 }
  0x7b   : > { %p6079_p12 = scmp.lt.s32.totalorder %s454_s21, %s6077_s27  ;;  %p6080_p0 = scmp.lt.s32.totalorder %s6078_s15, %s6071_s28 }
  0x7c   : > { %s452_s10 = scalar_lea.hbm %s8588_s1, %s4811_s8  ;;  %p6075_p13 = pneg %p6074_p9 }
  0x7d   : > { %p6081_p6 = por %p6080_p0, %p6079_p12 }
  0x7f   : > { %p6082_p10 = pnand %p6081_p6, %p6075_p13 }
  0x81   : > { %6085 = shalt.err (!%p6082_p10)
}
  0x82   : > { %s8589_s0 = smov 8   ;;  %s8590_s12 = smov 128  }
  0x83   : > { %5537 = dma.hbm_to_vmem [thread:$0]  (!%p6549_p5), %s452_s10, 4096, %s454_s21, %s442_s26, %s6284_s19, %s8590_s12, %s8589_s0  }
  0x84   : > { %465 = sbr.rel (%p6447_p11) target bundleno = 2239 (0x8bf), region = 60 }
  0x89   : > { %s6576_s11 = sand.u32 1, %s6250_s25  }
  0x8a   : > { %s4813_s16 = sshll.u32 %s6576_s11, 9  ;;  %s468_s24 = scalar_lea.sflag [#allocation8], %s6576_s11 }
  0x8b   : > { %s6580_s5 = scalar_lea.vmem [#allocation7], %s4813_s16 }
  0x8c   : > { %6209 = dma.done.wait (%p6427_p3), %s468_s24, 8192  }
  0x8d   : > { %6211 = vsyncadd (%p6427_p3), %s468_s24, 4294959104  ;;  %s476_s10 = sand.u32 1, %s6416_s14   ;;  %s478_s26 = sand.u32 1, %s6238_s22  }
  0x8e   : > { %s4814_s20 = sshll.u32 %s478_s26, 8  ;;  %s477_s4 = scalar_lea.sflag [#allocation11], %s476_s10 }
  0x8f   : > { %s6590_s19 = scalar_lea.vmem [#allocation10], %s4814_s20  ;;  %p8591_p11 = scmp.ne.s32.totalorder %s8567_s18, 0 }
  0x91   : > { %6213 = dma.done.wait (%p8591_p11), %s477_s4, 4096  }
  0x92   : > { %6215 = vsyncadd (%p8591_p11), %s477_s4, 4294963200  ;;  %p8592_p5 = scmp.eq.s32.totalorder %s6416_s14, 0 }
  0x94   : > { %6217 = dma.done.wait (%p8592_p5), [#allocation11], 2048   ;;  %p8593_p3 = pmov %p8592_p5 }
  0x96   : > { %6219 = vsyncadd (%p8593_p3), [#allocation11], 4294965248  ;;  %p8594_p2 = pmov %p8593_p3 }
  0x98   : > { %6221 = dma.done.wait (%p8594_p2), [#allocation14], 4096   ;;  %p8595_p4 = pmov %p8594_p2 }
  0x99   : > { %s4819_s17 = sshll.u32 %s6576_s11, 1  ;;  %s6605_s7 = scalar_lea.vmem [#allocation16], %s4813_s16 }
  0x9a   : > { %6223 = vsyncadd (%p8595_p4), [#allocation14], 4294963200  ;;  %s6607_s8 = scalar_lea.vmem [#allocation17], %s4819_s17  ;;  %s6609_s18 = scalar_lea.vmem [#allocation19], %s4819_s17 }
  0x9b   : > { %s8596_s2 = sld [smem:[#allocation28_spill]] }
  0xa1   : > { %p4821_p8 = scmp.ne.s32.totalorder %s8596_s2, 0 }
  0xa2   : > { %s8597_s28 = sld [smem:[#allocation66_spill]] (!%p4821_p8) }
  0xa3   : > { %552 = sbr.rel (%p4821_p8) target bundleno = 626 (0x272), region = 84  ;;  %s8599_s12 = sld [smem:[#allocation67_spill]] (!%p4821_p8) }
  0xa8   : > { %v586_v0 = vld [vmem:[%s6580_s5 + $0x108] sm:$0xff]  ;;  %v585_v1 = vld [vmem:[%s6580_s5 + $0x100] sm:$0xff]  ;;  %v588_v2 = vld [vmem:[%s6580_s5 + $0x118] sm:$0xff]  ;;  %s8598_s3 = smov %s8597_s28  ;;  %vm1297_vm0 = vcmask 7168  }
  0xa9   : > { %713 = vxpose.xlu1.b32.start [1/16] %v586_v0, 128  ;;  %681 = vxpose.xlu0.b32.start [1/16] %v585_v1, 128  ;;  %v587_v3 = vld [vmem:[%s6580_s5 + $0x110] sm:$0xff]  ;;  %v590_v4 = vld [vmem:[%s6580_s5 + $0x128] sm:$0xff]  ;;  %v589_v5 = vld [vmem:[%s6580_s5 + $0x120] sm:$0xff] }
  0xaa   : > { %v592_v6 = vld [vmem:[%s6580_s5 + $0x138] sm:$0xff]  ;;  %v591_v7 = vld [vmem:[%s6580_s5 + $0x130] sm:$0xff]  ;;  %v594_v8 = vld [vmem:[%s6580_s5 + $0x148] sm:$0xff] }
  0xab   : > { %v593_v9 = vld [vmem:[%s6580_s5 + $0x140] sm:$0xff]  ;;  %v596_v10 = vld [vmem:[%s6580_s5 + $0x158] sm:$0xff]  ;;  %v595_v11 = vld [vmem:[%s6580_s5 + $0x150] sm:$0xff] }
  0xac   : > { %v598_v12 = vld [vmem:[%s6580_s5 + $0x168] sm:$0xff]  ;;  %v597_v13 = vld [vmem:[%s6580_s5 + $0x160] sm:$0xff]  ;;  %v600_v14 = vld [vmem:[%s6580_s5 + $0x178] sm:$0xff] }
  0xad   : > { %714 = vxpose.xlu1.b32.cont [2/16] %v588_v2, 128  ;;  %682 = vxpose.xlu0.b32.cont [2/16] %v587_v3, 128  ;;  %v599_v15 = vld [vmem:[%s6580_s5 + $0x170] sm:$0xff]  ;;  %v602_v16 = vld [vmem:[%s6580_s5 + $0x188] sm:$0xff]  ;;  %v601_v17 = vld [vmem:[%s6580_s5 + $0x180] sm:$0xff] }
  0xae   : > { %v604_v18 = vld [vmem:[%s6580_s5 + $0x198] sm:$0xff]  ;;  %v603_v19 = vld [vmem:[%s6580_s5 + $0x190] sm:$0xff]  ;;  %v606_v22 = vld [vmem:[%s6580_s5 + $0x1a8] sm:$0xff] }
  0xaf   : > { %v5660_v20 = vld [vmem:[%s8597_s28 + $0x78] sm:$0xff]   ;;  %v605_v23 = vld [vmem:[%s6580_s5 + $0x1a0] sm:$0xff]  ;;  %v5662_v24 = vld [vmem:[%s8598_s3 + $0x70] sm:$0xff]  }
  0xb0   : > { %v5661_v21 = vld [vmem:[%s8598_s3 + $0x38] sm:$0xff]   ;;  %5083 = vmatprep.subr.bf16.mxu0 %v5660_v20  ;;  %5467 = vmatprep.subr.bf16.mxu1 %v5660_v20  ;;  %v5663_v25 = vld [vmem:[%s8598_s3 + $0x30] sm:$0xff]   ;;  %v5664_v28 = vld [vmem:[%s8598_s3 + $0x68] sm:$0xff]  }
  0xb1   : > { %715 = vxpose.xlu1.b32.cont [3/16] %v590_v4, 128  ;;  %683 = vxpose.xlu0.b32.cont [3/16] %v589_v5, 128  ;;  %v608_v26 = vld [vmem:[%s6580_s5 + $0x1b8] sm:$0xff]  ;;  %v607_v27 = vld [vmem:[%s6580_s5 + $0x1b0] sm:$0xff]  ;;  %v5665_v29 = vld [vmem:[%s8598_s3 + $0x28] sm:$0xff]  }
  0xb2   : > { %5084 = vmatpush3.bf16.msra.mxu0 %v5661_v21  ;;  %5475 = vmatpush3.bf16.msra.mxu1 %v5661_v21  ;;  %v610_v30 = vld [vmem:[%s6580_s5 + $0x1c8] sm:$0xff]  ;;  %v609_v31 = vld [vmem:[%s6580_s5 + $0x1c0] sm:$0xff]  ;;  %v612_v34 = vld [vmem:[%s6580_s5 + $0x1d8] sm:$0xff] }
  0xb3   : > { %5085 = vmatprep.subr.bf16.mxu0 %v5662_v24  ;;  %5468 = vmatprep.subr.bf16.mxu1 %v5662_v24  ;;  %v5666_v32 = vld [vmem:[%s8598_s3 + $0x60] sm:$0xff]   ;;  %v611_v35 = vld [vmem:[%s6580_s5 + $0x1d0] sm:$0xff]  ;;  %v5668_v36 = vld [vmem:[%s8598_s3 + $0x58] sm:$0xff]  }
  0xb4   : > { %v5667_v33 = vld [vmem:[%s8598_s3 + $0x20] sm:$0xff]   ;;  %v5669_v37 = vld [vmem:[%s8598_s3 + $0x18] sm:$0xff]   ;;  %v614_v38 = vld [vmem:[%s6580_s5 + $0x1e8] sm:$0xff] }
  0xb5   : > { %716 = vxpose.xlu1.b32.cont [4/16] %v592_v6, 128  ;;  %684 = vxpose.xlu0.b32.cont [4/16] %v591_v7, 128  ;;  %v613_v39 = vld [vmem:[%s6580_s5 + $0x1e0] sm:$0xff]  ;;  %v5670_v40 = vld [vmem:[%s8598_s3 + $0x50] sm:$0xff]   ;;  %v616_v42 = vld [vmem:[%s6580_s5 + $0x1f8] sm:$0xff] }
  0xb6   : > { %5086 = vmatpush3.bf16.msra.mxu0 %v5663_v25  ;;  %5476 = vmatpush3.bf16.msra.mxu1 %v5663_v25  ;;  %v5671_v41 = vld [vmem:[%s8598_s3 + $0x10] sm:$0xff]   ;;  %v5672_v44 = vld [vmem:[%s8598_s3 + $0x48] sm:$0xff]   ;;  %v553_v47 = vld [vmem:[%s6580_s5] sm:$0xff] }
  0xb7   : > { %5087 = vmatprep.subr.bf16.mxu0 %v5664_v28  ;;  %5469 = vmatprep.subr.bf16.mxu1 %v5664_v28  ;;  %v615_v43 = vld [vmem:[%s6580_s5 + $0x1f0] sm:$0xff]  ;;  %v5673_v45 = vld [vmem:[%s8598_s3 + $0x8] sm:$0xff]   ;;  %v5674_v48 = vld [vmem:[%s8598_s3 + $0x40] sm:$0xff]  }
  0xb8   : > { %v554_v46 = vld [vmem:[%s6580_s5 + $0x8] sm:$0xff]  ;;  %v5675_v49 = vld [vmem:[%s8598_s3] sm:$0xff]   ;;  %v556_v50 = vld [vmem:[%s6580_s5 + $0x18] sm:$0xff] }
  0xb9   : > { %717 = vxpose.xlu1.b32.cont [5/16] %v594_v8, 128  ;;  %685 = vxpose.xlu0.b32.cont [5/16] %v593_v9, 128  ;;  %v555_v51 = vld [vmem:[%s6580_s5 + $0x10] sm:$0xff]  ;;  %v558_v52 = vld [vmem:[%s6580_s5 + $0x28] sm:$0xff]  ;;  %v557_v53 = vld [vmem:[%s6580_s5 + $0x20] sm:$0xff] }
  0xba   : > { %5088 = vmatpush3.bf16.msra.mxu0 %v5665_v29  ;;  %5477 = vmatpush3.bf16.msra.mxu1 %v5665_v29  ;;  %v560_v54 = vld [vmem:[%s6580_s5 + $0x38] sm:$0xff]  ;;  %v559_v55 = vld [vmem:[%s6580_s5 + $0x30] sm:$0xff]  ;;  %v562_v56 = vld [vmem:[%s6580_s5 + $0x48] sm:$0xff] }
  0xbb   : > { %5089 = vmatprep.subr.bf16.mxu0 %v5666_v32  ;;  %5470 = vmatprep.subr.bf16.mxu1 %v5666_v32  ;;  %v561_v57 = vld [vmem:[%s6580_s5 + $0x40] sm:$0xff]  ;;  %v564_v58 = vld [vmem:[%s6580_s5 + $0x58] sm:$0xff]  ;;  %v563_v59 = vld [vmem:[%s6580_s5 + $0x50] sm:$0xff] }
  0xbc   : > { %v566_v60 = vld [vmem:[%s6580_s5 + $0x68] sm:$0xff]  ;;  %v565_v61 = vld [vmem:[%s6580_s5 + $0x60] sm:$0xff]  ;;  %v568_v62 = vld [vmem:[%s6580_s5 + $0x78] sm:$0xff] }
  0xbd   : > { %718 = vxpose.xlu1.b32.cont [6/16] %v596_v10, 128  ;;  %686 = vxpose.xlu0.b32.cont [6/16] %v595_v11, 128  ;;  %v567_v63 = vld [vmem:[%s6580_s5 + $0x70] sm:$0xff]  ;;  %v570_v0 = vld [vmem:[%s6580_s5 + $0x88] sm:$0xff]  ;;  %v569_v1 = vld [vmem:[%s6580_s5 + $0x80] sm:$0xff] }
  0xbe   : > { %5090 = vmatpush3.bf16.msra.mxu0 %v5667_v33  ;;  %5478 = vmatpush3.bf16.msra.mxu1 %v5667_v33  ;;  %v572_v2 = vld [vmem:[%s6580_s5 + $0x98] sm:$0xff]  ;;  %v571_v3 = vld [vmem:[%s6580_s5 + $0x90] sm:$0xff]  ;;  %v574_v4 = vld [vmem:[%s6580_s5 + $0xa8] sm:$0xff] }
  0xbf   : > { %5091 = vmatprep.subr.bf16.mxu0 %v5668_v36  ;;  %5471 = vmatprep.subr.bf16.mxu1 %v5668_v36  ;;  %v573_v5 = vld [vmem:[%s6580_s5 + $0xa0] sm:$0xff]  ;;  %v576_v6 = vld [vmem:[%s6580_s5 + $0xb8] sm:$0xff]  ;;  %v575_v7 = vld [vmem:[%s6580_s5 + $0xb0] sm:$0xff] }
  0xc0   : > { %v578_v8 = vld [vmem:[%s6580_s5 + $0xc8] sm:$0xff]  ;;  %v577_v9 = vld [vmem:[%s6580_s5 + $0xc0] sm:$0xff]  ;;  %v580_v10 = vld [vmem:[%s6580_s5 + $0xd8] sm:$0xff] }
  0xc1   : > { %719 = vxpose.xlu1.b32.cont [7/16] %v598_v12, 128  ;;  %687 = vxpose.xlu0.b32.cont [7/16] %v597_v13, 128  ;;  %v579_v11 = vld [vmem:[%s6580_s5 + $0xd0] sm:$0xff]  ;;  %v582_v12 = vld [vmem:[%s6580_s5 + $0xe8] sm:$0xff]  ;;  %v581_v13 = vld [vmem:[%s6580_s5 + $0xe0] sm:$0xff] }
  0xc2   : > { %5092 = vmatpush3.bf16.msra.mxu0 %v5669_v37  ;;  %5479 = vmatpush3.bf16.msra.mxu1 %v5669_v37 }
  0xc3   : > { %5093 = vmatprep.subr.bf16.mxu0 %v5670_v40  ;;  %5472 = vmatprep.subr.bf16.mxu1 %v5670_v40 }
  0xc5   : > { %720 = vxpose.xlu1.b32.cont [8/16] %v600_v14, 128  ;;  %688 = vxpose.xlu0.b32.cont [8/16] %v599_v15, 128  ;;  %v584_v14 = vld [vmem:[%s6580_s5 + $0xf8] sm:$0xff]  ;;  %v583_v15 = vld [vmem:[%s6580_s5 + $0xf0] sm:$0xff] }
  0xc6   : > { %5094 = vmatpush3.bf16.msra.mxu0 %v5671_v41  ;;  %5480 = vmatpush3.bf16.msra.mxu1 %v5671_v41 }
  0xc7   : > { %5095 = vmatprep.subr.bf16.mxu0 %v5672_v44  ;;  %5473 = vmatprep.subr.bf16.mxu1 %v5672_v44 }
  0xc9   : > { %721 = vxpose.xlu1.b32.cont [9/16] %v602_v16, 128  ;;  %689 = vxpose.xlu0.b32.cont [9/16] %v601_v17, 128 }
  0xca   : > { %5096 = vmatpush3.bf16.msra.mxu0 %v5673_v45  ;;  %5481 = vmatpush3.bf16.msra.mxu1 %v5673_v45 }
  0xcb   : > { %5097 = vmatprep.subr.bf16.mxu0 %v5674_v48  ;;  %5474 = vmatprep.subr.bf16.mxu1 %v5674_v48 }
  0xcd   : > { %722 = vxpose.xlu1.b32.cont [10/16] %v604_v18, 128  ;;  %690 = vxpose.xlu0.b32.cont [10/16] %v603_v19, 128 }
  0xce   : > { %5098 = vmatpush3.bf16.msra.mxu0 %v5675_v49  ;;  %5482 = vmatpush3.bf16.msra.mxu1 %v5675_v49 }
  0xd1   : > { %723 = vxpose.xlu1.b32.cont [11/16] %v606_v22, 128  ;;  %691 = vxpose.xlu0.b32.cont [11/16] %v605_v23, 128 }
  0xd5   : > { %724 = vxpose.xlu1.b32.cont [12/16] %v608_v26, 128  ;;  %692 = vxpose.xlu0.b32.cont [12/16] %v607_v27, 128 }
  0xd9   : > { %725 = vxpose.xlu1.b32.cont [13/16] %v610_v30, 128  ;;  %693 = vxpose.xlu0.b32.cont [13/16] %v609_v31, 128 }
  0xdd   : > { %726 = vxpose.xlu1.b32.cont [14/16] %v612_v34, 128  ;;  %694 = vxpose.xlu0.b32.cont [14/16] %v611_v35, 128 }
  0xe1   : > { %727 = vxpose.xlu1.b32.cont [15/16] %v614_v38, 128  ;;  %695 = vxpose.xlu0.b32.cont [15/16] %v613_v39, 128 }
  0xe5   : > { %728 = vxpose.xlu1.b32.end [16/16] %v616_v42, 128  ;;  %696 = vxpose.xlu0.b32.end [16/16] %v615_v43, 128 }
  0xe9   : > { %649 = vxpose.xlu1.b32.start [1/16] %v554_v46, 128  ;;  %617 = vxpose.xlu0.b32.start [1/16] %v553_v47, 128 }
  0xed   : > { %650 = vxpose.xlu1.b32.cont [2/16] %v556_v50, 128  ;;  %618 = vxpose.xlu0.b32.cont [2/16] %v555_v51, 128 }
  0xf1   : > { %651 = vxpose.xlu1.b32.cont [3/16] %v558_v52, 128  ;;  %619 = vxpose.xlu0.b32.cont [3/16] %v557_v53, 128 }
  0xf5   : > { %652 = vxpose.xlu1.b32.cont [4/16] %v560_v54, 128  ;;  %620 = vxpose.xlu0.b32.cont [4/16] %v559_v55, 128 }
  0xf9   : > { %653 = vxpose.xlu1.b32.cont [5/16] %v562_v56, 128  ;;  %621 = vxpose.xlu0.b32.cont [5/16] %v561_v57, 128 }
  0xfd   : > { %654 = vxpose.xlu1.b32.cont [6/16] %v564_v58, 128  ;;  %622 = vxpose.xlu0.b32.cont [6/16] %v563_v59, 128 }
 0x101   : > { %655 = vxpose.xlu1.b32.cont [7/16] %v566_v60, 128  ;;  %623 = vxpose.xlu0.b32.cont [7/16] %v565_v61, 128 }
 0x105   : > { %656 = vxpose.xlu1.b32.cont [8/16] %v568_v62, 128  ;;  %624 = vxpose.xlu0.b32.cont [8/16] %v567_v63, 128 }
 0x109   : > { %657 = vxpose.xlu1.b32.cont [9/16] %v570_v0, 128  ;;  %625 = vxpose.xlu0.b32.cont [9/16] %v569_v1, 128 }
 0x10d   : > { %658 = vxpose.xlu1.b32.cont [10/16] %v572_v2, 128  ;;  %626 = vxpose.xlu0.b32.cont [10/16] %v571_v3, 128 }
 0x111   : > { %659 = vxpose.xlu1.b32.cont [11/16] %v574_v4, 128  ;;  %627 = vxpose.xlu0.b32.cont [11/16] %v573_v5, 128 }
 0x115   : > { %660 = vxpose.xlu1.b32.cont [12/16] %v576_v6, 128  ;;  %628 = vxpose.xlu0.b32.cont [12/16] %v575_v7, 128 }
 0x119   : > { %661 = vxpose.xlu1.b32.cont [13/16] %v578_v8, 128  ;;  %629 = vxpose.xlu0.b32.cont [13/16] %v577_v9, 128 }
 0x11d   : > { %662 = vxpose.xlu1.b32.cont [14/16] %v580_v10, 128  ;;  %630 = vxpose.xlu0.b32.cont [14/16] %v579_v11, 128 }
 0x121   : > { %663 = vxpose.xlu1.b32.cont [15/16] %v582_v12, 128  ;;  %631 = vxpose.xlu0.b32.cont [15/16] %v581_v13, 128 }
 0x125   : > { %v729_v16 = vpop.trf.xlu1  ;;  %v697_v17 = vpop.trf.xlu0  ;;  %664 = vxpose.xlu1.b32.end [16/16] %v584_v14, 128  ;;  %632 = vxpose.xlu0.b32.end [16/16] %v583_v15, 128 }
 0x126   : > { %778 = vst [vmem:[#allocation2 + $0x108] sm:$0xff] %v729_v16  ;;  %746 = vst [vmem:[#allocation2 + $0x8] sm:$0xff] %v697_v17 }
 0x129   : > { %v730_v18 = vpop.trf.xlu1  ;;  %v698_v19 = vpop.trf.xlu0 }
 0x12a   : > { %780 = vst [vmem:[#allocation2 + $0x118] sm:$0xff] %v730_v18  ;;  %748 = vst [vmem:[#allocation2 + $0x18] sm:$0xff] %v698_v19  ;;  %v810_v20 = vpack.c.bf16 %v698_v19, %v697_v17  ;;  %v826_v21 = vpack.c.bf16 %v730_v18, %v729_v16 }
 0x12c   : > { %1008 = vmatprep.mubr.bf16.mxu0 %v810_v20  ;;  %1072 = vmatprep.mubr.bf16.mxu1 %v826_v21 }
 0x12d   : > { %v6724_v22 = vpop.trf.xlu1  ;;  %v6726_v23 = vpop.trf.xlu0 }
 0x12e   : > { %782 = vst [vmem:[#allocation2 + $0x128] sm:$0xff] %v6724_v22  ;;  %750 = vst [vmem:[#allocation2 + $0x28] sm:$0xff] %v6726_v23 }
 0x131   : > { %v6730_v24 = vpop.trf.xlu1  ;;  %v6732_v25 = vpop.trf.xlu0 }
 0x132   : > { %784 = vst [vmem:[#allocation2 + $0x138] sm:$0xff] %v6730_v24  ;;  %752 = vst [vmem:[#allocation2 + $0x38] sm:$0xff] %v6732_v25  ;;  %v828_v56 = vpack.c.bf16 %v6730_v24, %v6724_v22  ;;  %v812_v57 = vpack.c.bf16 %v6732_v25, %v6726_v23 }
 0x135   : > { %v6736_v26 = vpop.trf.xlu1  ;;  %v6738_v27 = vpop.trf.xlu0 }
 0x136   : > { %786 = vst [vmem:[#allocation2 + $0x148] sm:$0xff] %v6736_v26  ;;  %754 = vst [vmem:[#allocation2 + $0x48] sm:$0xff] %v6738_v27 }
 0x139   : > { %v6742_v28 = vpop.trf.xlu1  ;;  %v6744_v29 = vpop.trf.xlu0 }
 0x13a   : > { %788 = vst [vmem:[#allocation2 + $0x158] sm:$0xff] %v6742_v28  ;;  %756 = vst [vmem:[#allocation2 + $0x58] sm:$0xff] %v6744_v29  ;;  %v830_v0 = vpack.c.bf16 %v6742_v28, %v6736_v26  ;;  %v814_v1 = vpack.c.bf16 %v6744_v29, %v6738_v27 }
 0x13d   : > { %v6748_v30 = vpop.trf.xlu1  ;;  %v6750_v31 = vpop.trf.xlu0 }
 0x13e   : > { %790 = vst [vmem:[#allocation2 + $0x168] sm:$0xff] %v6748_v30  ;;  %758 = vst [vmem:[#allocation2 + $0x68] sm:$0xff] %v6750_v31 }
 0x141   : > { %v6754_v32 = vpop.trf.xlu1  ;;  %v6756_v33 = vpop.trf.xlu0 }
 0x142   : > { %792 = vst [vmem:[#allocation2 + $0x178] sm:$0xff] %v6754_v32  ;;  %760 = vst [vmem:[#allocation2 + $0x78] sm:$0xff] %v6756_v33  ;;  %v832_v8 = vpack.c.bf16 %v6754_v32, %v6748_v30  ;;  %v816_v9 = vpack.c.bf16 %v6756_v33, %v6750_v31 }
 0x145   : > { %v6760_v34 = vpop.trf.xlu1  ;;  %v6762_v35 = vpop.trf.xlu0 }
 0x146   : > { %794 = vst [vmem:[#allocation2 + $0x188] sm:$0xff] %v6760_v34  ;;  %762 = vst [vmem:[#allocation2 + $0x88] sm:$0xff] %v6762_v35 }
 0x149   : > { %v6766_v36 = vpop.trf.xlu1  ;;  %v6768_v37 = vpop.trf.xlu0 }
 0x14a   : > { %796 = vst [vmem:[#allocation2 + $0x198] sm:$0xff] %v6766_v36  ;;  %764 = vst [vmem:[#allocation2 + $0x98] sm:$0xff] %v6768_v37  ;;  %v834_v16 = vpack.c.bf16 %v6766_v36, %v6760_v34  ;;  %v818_v17 = vpack.c.bf16 %v6768_v37, %v6762_v35 }
 0x14d   : > { %v6772_v38 = vpop.trf.xlu1  ;;  %v6774_v39 = vpop.trf.xlu0 }
 0x14e   : > { %798 = vst [vmem:[#allocation2 + $0x1a8] sm:$0xff] %v6772_v38  ;;  %766 = vst [vmem:[#allocation2 + $0xa8] sm:$0xff] %v6774_v39 }
 0x151   : > { %v6778_v40 = vpop.trf.xlu1  ;;  %v6780_v41 = vpop.trf.xlu0 }
 0x152   : > { %800 = vst [vmem:[#allocation2 + $0x1b8] sm:$0xff] %v6778_v40  ;;  %768 = vst [vmem:[#allocation2 + $0xb8] sm:$0xff] %v6780_v41  ;;  %v836_v24 = vpack.c.bf16 %v6778_v40, %v6772_v38  ;;  %v820_v25 = vpack.c.bf16 %v6780_v41, %v6774_v39 }
 0x155   : > { %v6784_v42 = vpop.trf.xlu1  ;;  %v6786_v43 = vpop.trf.xlu0 }
 0x156   : > { %802 = vst [vmem:[#allocation2 + $0x1c8] sm:$0xff] %v6784_v42  ;;  %770 = vst [vmem:[#allocation2 + $0xc8] sm:$0xff] %v6786_v43 }
 0x159   : > { %v6790_v44 = vpop.trf.xlu1  ;;  %v6792_v45 = vpop.trf.xlu0 }
 0x15a   : > { %804 = vst [vmem:[#allocation2 + $0x1d8] sm:$0xff] %v6790_v44  ;;  %772 = vst [vmem:[#allocation2 + $0xd8] sm:$0xff] %v6792_v45  ;;  %v838_v32 = vpack.c.bf16 %v6790_v44, %v6784_v42  ;;  %v822_v33 = vpack.c.bf16 %v6792_v45, %v6786_v43 }
 0x15d   : > { %v6796_v46 = vpop.trf.xlu1  ;;  %v6798_v47 = vpop.trf.xlu0 }
 0x15e   : > { %806 = vst [vmem:[#allocation2 + $0x1e8] sm:$0xff] %v6796_v46  ;;  %774 = vst [vmem:[#allocation2 + $0xe8] sm:$0xff] %v6798_v47 }
 0x161   : > { %v6802_v48 = vpop.trf.xlu1  ;;  %v6804_v49 = vpop.trf.xlu0 }
 0x162   : > { %808 = vst [vmem:[#allocation2 + $0x1f8] sm:$0xff] %v6802_v48  ;;  %776 = vst [vmem:[#allocation2 + $0xf8] sm:$0xff] %v6804_v49  ;;  %v840_v40 = vpack.c.bf16 %v6802_v48, %v6796_v46  ;;  %v824_v41 = vpack.c.bf16 %v6804_v49, %v6798_v47  ;;  %v6287_v46 = vmov -inf   ;;  %v6288_v47 = vmov 0.0  }
 0x163   : > { %1298 = vst.msk [vmem:[#allocation4] sm:$0xff] %vm1297_vm0, %v6287_v46  ;;  %1299 = vst.msk [vmem:[#allocation4 + $0x8] sm:$0xff] %vm1297_vm0, %v6287_v46 }
 0x164   : > { %1300 = vst.msk [vmem:[#allocation4 + $0x10] sm:$0xff] %vm1297_vm0, %v6287_v46  ;;  %1301 = vst.msk [vmem:[#allocation4 + $0x18] sm:$0xff] %vm1297_vm0, %v6287_v46 }
 0x165   : > { %v665_v50 = vpop.trf.xlu1  ;;  %v633_v51 = vpop.trf.xlu0  ;;  %1302 = vst.msk [vmem:[#allocation4 + $0x20] sm:$0xff] %vm1297_vm0, %v6287_v46  ;;  %1303 = vst.msk [vmem:[#allocation4 + $0x28] sm:$0xff] %vm1297_vm0, %v6287_v46 }
 0x166   : > { %777 = vst [vmem:[#allocation2 + $0x100] sm:$0xff] %v665_v50  ;;  %745 = vst [vmem:[#allocation2] sm:$0xff] %v633_v51 }
 0x167   : > { %1304 = vst.msk [vmem:[#allocation4 + $0x30] sm:$0xff] %vm1297_vm0, %v6287_v46  ;;  %1305 = vst.msk [vmem:[#allocation4 + $0x38] sm:$0xff] %vm1297_vm0, %v6287_v46 }
 0x168   : > { %1306 = vst.msk [vmem:[#allocation4 + $0x40] sm:$0xff] %vm1297_vm0, %v6287_v46  ;;  %1307 = vst.msk [vmem:[#allocation4 + $0x48] sm:$0xff] %vm1297_vm0, %v6287_v46 }
 0x169   : > { %v666_v52 = vpop.trf.xlu1  ;;  %v634_v53 = vpop.trf.xlu0  ;;  %1308 = vst.msk [vmem:[#allocation4 + $0x50] sm:$0xff] %vm1297_vm0, %v6287_v46  ;;  %1309 = vst.msk [vmem:[#allocation4 + $0x58] sm:$0xff] %vm1297_vm0, %v6287_v46 }
 0x16a   : > { %779 = vst [vmem:[#allocation2 + $0x110] sm:$0xff] %v666_v52  ;;  %v825_v54 = vpack.c.bf16 %v666_v52, %v665_v50  ;;  %747 = vst [vmem:[#allocation2 + $0x10] sm:$0xff] %v634_v53  ;;  %v809_v55 = vpack.c.bf16 %v634_v53, %v633_v51 }
 0x16b   : > { %1310 = vst.msk [vmem:[#allocation4 + $0x60] sm:$0xff] %vm1297_vm0, %v6287_v46  ;;  %1311 = vst.msk [vmem:[#allocation4 + $0x68] sm:$0xff] %vm1297_vm0, %v6287_v46 }
 0x16c   : > { %1009 = vmatmul.mubr.bf16.vlgmr.msra.gmra.mxu0 %v809_v55  ;;  %1073 = vmatmul.mubr.bf16.vlgmr.msra.gmra.mxu1 %v825_v54  ;;  %1312 = vst.msk [vmem:[#allocation4 + $0x70] sm:$0xff] %vm1297_vm0, %v6287_v46  ;;  %1313 = vst.msk [vmem:[#allocation4 + $0x78] sm:$0xff] %vm1297_vm0, %v6287_v46 }
 0x16d   : > { %1080 = vmatprep.mubr.bf16.mxu1 %v828_v56  ;;  %v667_v58 = vpop.trf.xlu1  ;;  %1016 = vmatprep.mubr.bf16.mxu0 %v812_v57  ;;  %v635_v59 = vpop.trf.xlu0  ;;  %1314 = vst.msk [vmem:[#allocation4 + $0x80] sm:$0xff] %vm1297_vm0, %v6287_v46  ;;  %1315 = vst.msk [vmem:[#allocation4 + $0x88] sm:$0xff] %vm1297_vm0, %v6287_v46 }
 0x16e   : > { %781 = vst [vmem:[#allocation2 + $0x120] sm:$0xff] %v667_v58  ;;  %749 = vst [vmem:[#allocation2 + $0x20] sm:$0xff] %v635_v59 }
 0x16f   : > { %1316 = vst.msk [vmem:[#allocation4 + $0x90] sm:$0xff] %vm1297_vm0, %v6287_v46  ;;  %1317 = vst.msk [vmem:[#allocation4 + $0x98] sm:$0xff] %vm1297_vm0, %v6287_v46 }
 0x170   : > { %1318 = vst.msk [vmem:[#allocation4 + $0xa0] sm:$0xff] %vm1297_vm0, %v6287_v46  ;;  %1319 = vst.msk [vmem:[#allocation4 + $0xa8] sm:$0xff] %vm1297_vm0, %v6287_v46 }
 0x171   : > { %v668_v60 = vpop.trf.xlu1  ;;  %v636_v61 = vpop.trf.xlu0  ;;  %1320 = vst.msk [vmem:[#allocation4 + $0xb0] sm:$0xff] %vm1297_vm0, %v6287_v46  ;;  %1321 = vst.msk [vmem:[#allocation4 + $0xb8] sm:$0xff] %vm1297_vm0, %v6287_v46 }
 0x172   : > { %783 = vst [vmem:[#allocation2 + $0x130] sm:$0xff] %v668_v60  ;;  %v827_v62 = vpack.c.bf16 %v668_v60, %v667_v58  ;;  %751 = vst [vmem:[#allocation2 + $0x30] sm:$0xff] %v636_v61  ;;  %v811_v63 = vpack.c.bf16 %v636_v61, %v635_v59  ;;  %v6967_v58 = vld [vmem:[%s8599_s12] ss:$0 sm:$0xff] }
 0x173   : > { %1322 = vst.msk [vmem:[#allocation4 + $0xc0] sm:$0xff] %vm1297_vm0, %v6287_v46  ;;  %1323 = vst.msk [vmem:[#allocation4 + $0xc8] sm:$0xff] %vm1297_vm0, %v6287_v46 }
 0x174   : > { %1017 = vmatmul.mubr.bf16.gmra.mxu0 %v811_v63  ;;  %1081 = vmatmul.mubr.bf16.gmra.mxu1 %v827_v62  ;;  %1324 = vst.msk [vmem:[#allocation4 + $0xd0] sm:$0xff] %vm1297_vm0, %v6287_v46  ;;  %1325 = vst.msk [vmem:[#allocation4 + $0xd8] sm:$0xff] %vm1297_vm0, %v6287_v46 }
 0x175   : > { %1088 = vmatprep.mubr.bf16.mxu1 %v830_v0  ;;  %v669_v2 = vpop.trf.xlu1  ;;  %1024 = vmatprep.mubr.bf16.mxu0 %v814_v1  ;;  %v637_v3 = vpop.trf.xlu0  ;;  %1326 = vst.msk [vmem:[#allocation4 + $0xe0] sm:$0xff] %vm1297_vm0, %v6287_v46  ;;  %1327 = vst.msk [vmem:[#allocation4 + $0xe8] sm:$0xff] %vm1297_vm0, %v6287_v46 }
 0x176   : > { %785 = vst [vmem:[#allocation2 + $0x140] sm:$0xff] %v669_v2  ;;  %753 = vst [vmem:[#allocation2 + $0x40] sm:$0xff] %v637_v3 }
 0x177   : > { %1328 = vst.msk [vmem:[#allocation4 + $0xf0] sm:$0xff] %vm1297_vm0, %v6287_v46  ;;  %1329 = vst.msk [vmem:[#allocation4 + $0xf8] sm:$0xff] %vm1297_vm0, %v6287_v46 }
 0x178   : > { %1330 = vst.msk [vmem:[#allocation5] sm:$0xff] %vm1297_vm0, %v6288_v47  ;;  %1331 = vst.msk [vmem:[#allocation5 + $0x8] sm:$0xff] %vm1297_vm0, %v6288_v47 }
 0x179   : > { %v670_v4 = vpop.trf.xlu1  ;;  %v638_v5 = vpop.trf.xlu0  ;;  %1332 = vst.msk [vmem:[#allocation5 + $0x10] sm:$0xff] %vm1297_vm0, %v6288_v47  ;;  %1333 = vst.msk [vmem:[#allocation5 + $0x18] sm:$0xff] %vm1297_vm0, %v6288_v47 }
 0x17a   : > { %787 = vst [vmem:[#allocation2 + $0x150] sm:$0xff] %v670_v4  ;;  %v829_v6 = vpack.c.bf16 %v670_v4, %v669_v2  ;;  %755 = vst [vmem:[#allocation2 + $0x50] sm:$0xff] %v638_v5  ;;  %v813_v7 = vpack.c.bf16 %v638_v5, %v637_v3 }
 0x17b   : > { %1334 = vst.msk [vmem:[#allocation5 + $0x20] sm:$0xff] %vm1297_vm0, %v6288_v47  ;;  %1335 = vst.msk [vmem:[#allocation5 + $0x28] sm:$0xff] %vm1297_vm0, %v6288_v47 }
 0x17c   : > { %1025 = vmatmul.mubr.bf16.gmra.mxu0 %v813_v7  ;;  %1089 = vmatmul.mubr.bf16.gmra.mxu1 %v829_v6  ;;  %1336 = vst.msk [vmem:[#allocation5 + $0x30] sm:$0xff] %vm1297_vm0, %v6288_v47  ;;  %1337 = vst.msk [vmem:[#allocation5 + $0x38] sm:$0xff] %vm1297_vm0, %v6288_v47 }
 0x17d   : > { %1096 = vmatprep.mubr.bf16.mxu1 %v832_v8  ;;  %v671_v10 = vpop.trf.xlu1  ;;  %1032 = vmatprep.mubr.bf16.mxu0 %v816_v9  ;;  %v639_v11 = vpop.trf.xlu0  ;;  %1338 = vst.msk [vmem:[#allocation5 + $0x40] sm:$0xff] %vm1297_vm0, %v6288_v47  ;;  %1339 = vst.msk [vmem:[#allocation5 + $0x48] sm:$0xff] %vm1297_vm0, %v6288_v47 }
 0x17e   : > { %789 = vst [vmem:[#allocation2 + $0x160] sm:$0xff] %v671_v10  ;;  %757 = vst [vmem:[#allocation2 + $0x60] sm:$0xff] %v639_v11 }
 0x17f   : > { %1340 = vst.msk [vmem:[#allocation5 + $0x50] sm:$0xff] %vm1297_vm0, %v6288_v47  ;;  %1341 = vst.msk [vmem:[#allocation5 + $0x58] sm:$0xff] %vm1297_vm0, %v6288_v47 }
 0x180   : > { %1342 = vst.msk [vmem:[#allocation5 + $0x60] sm:$0xff] %vm1297_vm0, %v6288_v47  ;;  %1343 = vst.msk [vmem:[#allocation5 + $0x68] sm:$0xff] %vm1297_vm0, %v6288_v47 }
 0x181   : > { %v672_v12 = vpop.trf.xlu1  ;;  %v640_v13 = vpop.trf.xlu0  ;;  %1344 = vst.msk [vmem:[#allocation5 + $0x70] sm:$0xff] %vm1297_vm0, %v6288_v47  ;;  %1345 = vst.msk [vmem:[#allocation5 + $0x78] sm:$0xff] %vm1297_vm0, %v6288_v47 }
 0x182   : > { %791 = vst [vmem:[#allocation2 + $0x170] sm:$0xff] %v672_v12  ;;  %v831_v14 = vpack.c.bf16 %v672_v12, %v671_v10  ;;  %759 = vst [vmem:[#allocation2 + $0x70] sm:$0xff] %v640_v13  ;;  %v815_v15 = vpack.c.bf16 %v640_v13, %v639_v11 }
 0x183   : > { %1346 = vst.msk [vmem:[#allocation5 + $0x80] sm:$0xff] %vm1297_vm0, %v6288_v47  ;;  %1347 = vst.msk [vmem:[#allocation5 + $0x88] sm:$0xff] %vm1297_vm0, %v6288_v47 }
 0x184   : > { %1033 = vmatmul.mubr.bf16.gmra.mxu0 %v815_v15  ;;  %1097 = vmatmul.mubr.bf16.gmra.mxu1 %v831_v14  ;;  %1348 = vst.msk [vmem:[#allocation5 + $0x90] sm:$0xff] %vm1297_vm0, %v6288_v47  ;;  %1349 = vst.msk [vmem:[#allocation5 + $0x98] sm:$0xff] %vm1297_vm0, %v6288_v47 }
 0x185   : > { %1104 = vmatprep.mubr.bf16.mxu1 %v834_v16  ;;  %v673_v18 = vpop.trf.xlu1  ;;  %1040 = vmatprep.mubr.bf16.mxu0 %v818_v17  ;;  %v641_v19 = vpop.trf.xlu0  ;;  %1350 = vst.msk [vmem:[#allocation5 + $0xa0] sm:$0xff] %vm1297_vm0, %v6288_v47  ;;  %1351 = vst.msk [vmem:[#allocation5 + $0xa8] sm:$0xff] %vm1297_vm0, %v6288_v47 }
 0x186   : > { %793 = vst [vmem:[#allocation2 + $0x180] sm:$0xff] %v673_v18  ;;  %761 = vst [vmem:[#allocation2 + $0x80] sm:$0xff] %v641_v19 }
 0x187   : > { %1352 = vst.msk [vmem:[#allocation5 + $0xb0] sm:$0xff] %vm1297_vm0, %v6288_v47  ;;  %1353 = vst.msk [vmem:[#allocation5 + $0xb8] sm:$0xff] %vm1297_vm0, %v6288_v47 }
 0x188   : > { %1354 = vst.msk [vmem:[#allocation5 + $0xc0] sm:$0xff] %vm1297_vm0, %v6288_v47  ;;  %1355 = vst.msk [vmem:[#allocation5 + $0xc8] sm:$0xff] %vm1297_vm0, %v6288_v47 }
 0x189   : > { %v674_v20 = vpop.trf.xlu1  ;;  %v642_v21 = vpop.trf.xlu0  ;;  %1356 = vst.msk [vmem:[#allocation5 + $0xd0] sm:$0xff] %vm1297_vm0, %v6288_v47  ;;  %1357 = vst.msk [vmem:[#allocation5 + $0xd8] sm:$0xff] %vm1297_vm0, %v6288_v47 }
 0x18a   : > { %795 = vst [vmem:[#allocation2 + $0x190] sm:$0xff] %v674_v20  ;;  %v833_v22 = vpack.c.bf16 %v674_v20, %v673_v18  ;;  %763 = vst [vmem:[#allocation2 + $0x90] sm:$0xff] %v642_v21  ;;  %v817_v23 = vpack.c.bf16 %v642_v21, %v641_v19 }
 0x18b   : > { %1358 = vst.msk [vmem:[#allocation5 + $0xe0] sm:$0xff] %vm1297_vm0, %v6288_v47  ;;  %1359 = vst.msk [vmem:[#allocation5 + $0xe8] sm:$0xff] %vm1297_vm0, %v6288_v47 }
 0x18c   : > { %1041 = vmatmul.mubr.bf16.gmra.mxu0 %v817_v23  ;;  %1105 = vmatmul.mubr.bf16.gmra.mxu1 %v833_v22  ;;  %1360 = vst.msk [vmem:[#allocation5 + $0xf0] sm:$0xff] %vm1297_vm0, %v6288_v47  ;;  %1361 = vst.msk [vmem:[#allocation5 + $0xf8] sm:$0xff] %vm1297_vm0, %v6288_v47 }
 0x18d   : > { %1112 = vmatprep.mubr.bf16.mxu1 %v836_v24  ;;  %v675_v26 = vpop.trf.xlu1  ;;  %1048 = vmatprep.mubr.bf16.mxu0 %v820_v25  ;;  %v643_v27 = vpop.trf.xlu0  ;;  %1362 = vst [vmem:[#allocation6 + $0xb0] sm:$0xff] %v6288_v47  ;;  %1363 = vst [vmem:[#allocation6] sm:$0xff] %v6288_v47 }
 0x18e   : > { %797 = vst [vmem:[#allocation2 + $0x1a0] sm:$0xff] %v675_v26  ;;  %765 = vst [vmem:[#allocation2 + $0xa0] sm:$0xff] %v643_v27 }
 0x18f   : > { %1364 = vst [vmem:[#allocation6 + $0xd8] sm:$0xff] %v6288_v47  ;;  %1365 = vst [vmem:[#allocation6 + $0x18] sm:$0xff] %v6288_v47 }
 0x190   : > { %1366 = vst [vmem:[#allocation6 + $0x50] sm:$0xff] %v6288_v47  ;;  %1367 = vst [vmem:[#allocation6 + $0x68] sm:$0xff] %v6288_v47 }
 0x191   : > { %v676_v28 = vpop.trf.xlu1  ;;  %v644_v29 = vpop.trf.xlu0  ;;  %1368 = vst [vmem:[#allocation6 + $0x30] sm:$0xff] %v6288_v47  ;;  %1369 = vst [vmem:[#allocation6 + $0x48] sm:$0xff] %v6288_v47 }
 0x192   : > { %799 = vst [vmem:[#allocation2 + $0x1b0] sm:$0xff] %v676_v28  ;;  %v835_v30 = vpack.c.bf16 %v676_v28, %v675_v26  ;;  %767 = vst [vmem:[#allocation2 + $0xb0] sm:$0xff] %v644_v29  ;;  %v819_v31 = vpack.c.bf16 %v644_v29, %v643_v27 }
 0x193   : > { %1370 = vst [vmem:[#allocation6 + $0x80] sm:$0xff] %v6288_v47  ;;  %1371 = vst [vmem:[#allocation6 + $0x88] sm:$0xff] %v6288_v47 }
 0x194   : > { %1049 = vmatmul.mubr.bf16.gmra.mxu0 %v819_v31  ;;  %1113 = vmatmul.mubr.bf16.gmra.mxu1 %v835_v30  ;;  %1372 = vst [vmem:[#allocation6 + $0xe8] sm:$0xff] %v6288_v47  ;;  %1373 = vst [vmem:[#allocation6 + $0xb8] sm:$0xff] %v6288_v47 }
 0x195   : > { %1120 = vmatprep.mubr.bf16.mxu1 %v838_v32  ;;  %v677_v34 = vpop.trf.xlu1  ;;  %1056 = vmatprep.mubr.bf16.mxu0 %v822_v33  ;;  %v645_v35 = vpop.trf.xlu0  ;;  %1374 = vst [vmem:[#allocation6 + $0x60] sm:$0xff] %v6288_v47  ;;  %1375 = vst [vmem:[#allocation6 + $0xf0] sm:$0xff] %v6288_v47 }
 0x196   : > { %801 = vst [vmem:[#allocation2 + $0x1c0] sm:$0xff] %v677_v34  ;;  %769 = vst [vmem:[#allocation2 + $0xc0] sm:$0xff] %v645_v35 }
 0x197   : > { %1376 = vst [vmem:[#allocation6 + $0x8] sm:$0xff] %v6288_v47  ;;  %1377 = vst [vmem:[#allocation6 + $0x78] sm:$0xff] %v6288_v47 }
 0x198   : > { %1378 = vst [vmem:[#allocation6 + $0x38] sm:$0xff] %v6288_v47  ;;  %1379 = vst [vmem:[#allocation6 + $0x58] sm:$0xff] %v6288_v47 }
 0x199   : > { %v678_v36 = vpop.trf.xlu1  ;;  %v646_v37 = vpop.trf.xlu0  ;;  %1380 = vst [vmem:[#allocation6 + $0x40] sm:$0xff] %v6288_v47  ;;  %1381 = vst [vmem:[#allocation6 + $0xc8] sm:$0xff] %v6288_v47 }
 0x19a   : > { %803 = vst [vmem:[#allocation2 + $0x1d0] sm:$0xff] %v678_v36  ;;  %v837_v38 = vpack.c.bf16 %v678_v36, %v677_v34  ;;  %771 = vst [vmem:[#allocation2 + $0xd0] sm:$0xff] %v646_v37  ;;  %v821_v39 = vpack.c.bf16 %v646_v37, %v645_v35 }
 0x19b   : > { %1382 = vst [vmem:[#allocation6 + $0xe0] sm:$0xff] %v6288_v47  ;;  %1383 = vst [vmem:[#allocation6 + $0x90] sm:$0xff] %v6288_v47 }
 0x19c   : > { %1057 = vmatmul.mubr.bf16.gmra.mxu0 %v821_v39  ;;  %1121 = vmatmul.mubr.bf16.gmra.mxu1 %v837_v38  ;;  %1384 = vst [vmem:[#allocation6 + $0x70] sm:$0xff] %v6288_v47  ;;  %1385 = vst [vmem:[#allocation6 + $0xc0] sm:$0xff] %v6288_v47 }
 0x19d   : > { %1128 = vmatprep.mubr.bf16.mxu1 %v840_v40  ;;  %v679_v42 = vpop.trf.xlu1  ;;  %1064 = vmatprep.mubr.bf16.mxu0 %v824_v41  ;;  %v647_v43 = vpop.trf.xlu0  ;;  %1386 = vst [vmem:[#allocation6 + $0xa8] sm:$0xff] %v6288_v47  ;;  %1387 = vst [vmem:[#allocation6 + $0xd0] sm:$0xff] %v6288_v47 }
 0x19e   : > { %805 = vst [vmem:[#allocation2 + $0x1e0] sm:$0xff] %v679_v42  ;;  %773 = vst [vmem:[#allocation2 + $0xe0] sm:$0xff] %v647_v43 }
 0x19f   : > { %1388 = vst [vmem:[#allocation6 + $0x10] sm:$0xff] %v6288_v47  ;;  %1389 = vst [vmem:[#allocation6 + $0x28] sm:$0xff] %v6288_v47 }
 0x1a0   : > { %1390 = vst [vmem:[#allocation6 + $0xa0] sm:$0xff] %v6288_v47  ;;  %1391 = vst [vmem:[#allocation6 + $0xf8] sm:$0xff] %v6288_v47 }
 0x1a1   : > { %v680_v44 = vpop.trf.xlu1  ;;  %v648_v45 = vpop.trf.xlu0  ;;  %1392 = vst [vmem:[#allocation6 + $0x20] sm:$0xff] %v6288_v47  ;;  %1393 = vst [vmem:[#allocation6 + $0x98] sm:$0xff] %v6288_v47 }
 0x1a2   : > { %807 = vst [vmem:[#allocation2 + $0x1f0] sm:$0xff] %v680_v44  ;;  %v839_v50 = vpack.c.bf16 %v680_v44, %v679_v42  ;;  %775 = vst [vmem:[#allocation2 + $0xf0] sm:$0xff] %v648_v45  ;;  %v823_v51 = vpack.c.bf16 %v648_v45, %v647_v43 }
 0x1a4   : > { %1065 = vmatmul.mubr.bf16.gmra.mxu0 %v823_v51  ;;  %1129 = vmatmul.mubr.bf16.gmra.mxu1 %v839_v50 }
 0x22c   : > { %v5099_v48 = vpop.f32.mrf.mxu0  ;;  %v5147_v49 = vpop.f32.mrf.mxu1 }
 0x22e   : > { %v5100_v52 = vpop.f32.mrf.mxu0  ;;  %v5148_v53 = vpop.f32.mrf.mxu1 }
 0x22f   : > { %v5101_v56 = vadd.f32 %v5100_v52, %v5099_v48  ;;  %v5149_v57 = vadd.f32 %v5148_v53, %v5147_v49 }
 0x230   : > { %v5102_v54 = vpop.f32.mrf.mxu0  ;;  %v5150_v55 = vpop.f32.mrf.mxu1 }
 0x231   : > { %v1011_v1 = vadd.f32 %v5101_v56, %v6967_v58  ;;  %v1075_v2 = vadd.f32 %v5149_v57, %v6967_v58 }
 0x232   : > { %v5103_v59 = vpop.f32.mrf.mxu0  ;;  %v5151_v60 = vpop.f32.mrf.mxu1 }
 0x233   : > { %v5104_v61 = vadd.f32 %v5103_v59, %v5102_v54  ;;  %v5152_v62 = vadd.f32 %v5151_v60, %v5150_v55 }
 0x234   : > { %v5105_v63 = vpop.f32.mrf.mxu0  ;;  %v5153_v0 = vpop.f32.mrf.mxu1 }
 0x235   : > { %v1014_v3 = vadd.f32 %v5104_v61, %v6967_v58  ;;  %v1078_v4 = vadd.f32 %v5152_v62, %v6967_v58 }
 0x236   : > { %v5106_v5 = vpop.f32.mrf.mxu0  ;;  %v5154_v6 = vpop.f32.mrf.mxu1 }
 0x237   : > { %v4991_v7 = vpack.c.bf16 %v1014_v3, %v1011_v1  ;;  %v5031_v8 = vpack.c.bf16 %v1078_v4, %v1075_v2  ;;  %v5107_v11 = vadd.f32 %v5106_v5, %v5105_v63  ;;  %v5155_v12 = vadd.f32 %v5154_v6, %v5153_v0 }
 0x238   : > { %v5108_v9 = vpop.f32.mrf.mxu0  ;;  %v5156_v10 = vpop.f32.mrf.mxu1 }
 0x239   : > { %4992 = vst [vmem:[#allocation3] sm:$0xff] %v4991_v7   ;;  %5075 = vst [vmem:[#allocation3 + $0x40] sm:$0xff] %v5031_v8   ;;  %v1019_v19 = vadd.f32 %v5107_v11, %v6967_v58  ;;  %v1083_v20 = vadd.f32 %v5155_v12, %v6967_v58 }
 0x23a   : > { %v5109_v13 = vpop.f32.mrf.mxu0  ;;  %v5157_v14 = vpop.f32.mrf.mxu1 }
 0x23b   : > { %v5110_v15 = vadd.f32 %v5109_v13, %v5108_v9  ;;  %v5158_v16 = vadd.f32 %v5157_v14, %v5156_v10 }
 0x23c   : > { %v5111_v17 = vpop.f32.mrf.mxu0  ;;  %v5159_v18 = vpop.f32.mrf.mxu1 }
 0x23d   : > { %v1022_v21 = vadd.f32 %v5110_v15, %v6967_v58  ;;  %v1086_v22 = vadd.f32 %v5158_v16, %v6967_v58 }
 0x23e   : > { %v5112_v23 = vpop.f32.mrf.mxu0  ;;  %v5160_v24 = vpop.f32.mrf.mxu1 }
 0x23f   : > { %v4996_v25 = vpack.c.bf16 %v1022_v21, %v1019_v19  ;;  %v5036_v26 = vpack.c.bf16 %v1086_v22, %v1083_v20  ;;  %v5113_v29 = vadd.f32 %v5112_v23, %v5111_v17  ;;  %v5161_v30 = vadd.f32 %v5160_v24, %v5159_v18 }
 0x240   : > { %v5114_v27 = vpop.f32.mrf.mxu0  ;;  %v5162_v28 = vpop.f32.mrf.mxu1 }
 0x241   : > { %5068 = vst [vmem:[#allocation3 + $0x8] sm:$0xff] %v4996_v25   ;;  %5076 = vst [vmem:[#allocation3 + $0x48] sm:$0xff] %v5036_v26   ;;  %v1027_v37 = vadd.f32 %v5113_v29, %v6967_v58  ;;  %v1091_v38 = vadd.f32 %v5161_v30, %v6967_v58 }
 0x242   : > { %v5115_v31 = vpop.f32.mrf.mxu0  ;;  %v5163_v32 = vpop.f32.mrf.mxu1 }
 0x243   : > { %v5116_v33 = vadd.f32 %v5115_v31, %v5114_v27  ;;  %v5164_v34 = vadd.f32 %v5163_v32, %v5162_v28 }
 0x244   : > { %v5117_v35 = vpop.f32.mrf.mxu0  ;;  %v5165_v36 = vpop.f32.mrf.mxu1 }
 0x245   : > { %v1030_v39 = vadd.f32 %v5116_v33, %v6967_v58  ;;  %v1094_v40 = vadd.f32 %v5164_v34, %v6967_v58 }
 0x246   : > { %v5118_v41 = vpop.f32.mrf.mxu0  ;;  %v5166_v42 = vpop.f32.mrf.mxu1 }
 0x247   : > { %v5001_v43 = vpack.c.bf16 %v1030_v39, %v1027_v37  ;;  %v5041_v44 = vpack.c.bf16 %v1094_v40, %v1091_v38  ;;  %v5119_v51 = vadd.f32 %v5118_v41, %v5117_v35  ;;  %v5167_v46 = vadd.f32 %v5166_v42, %v5165_v36 }
 0x248   : > { %v5120_v45 = vpop.f32.mrf.mxu0  ;;  %v5168_v50 = vpop.f32.mrf.mxu1 }
 0x249   : > { %5069 = vst [vmem:[#allocation3 + $0x10] sm:$0xff] %v5001_v43   ;;  %5077 = vst [vmem:[#allocation3 + $0x50] sm:$0xff] %v5041_v44   ;;  %v1035_v55 = vadd.f32 %v5119_v51, %v6967_v58  ;;  %v1099_v56 = vadd.f32 %v5167_v46, %v6967_v58 }
 0x24a   : > { %v5121_v47 = vpop.f32.mrf.mxu0  ;;  %v5169_v48 = vpop.f32.mrf.mxu1 }
 0x24b   : > { %v5122_v49 = vadd.f32 %v5121_v47, %v5120_v45  ;;  %v5170_v52 = vadd.f32 %v5169_v48, %v5168_v50 }
 0x24c   : > { %v5123_v53 = vpop.f32.mrf.mxu0  ;;  %v5171_v54 = vpop.f32.mrf.mxu1 }
 0x24d   : > { %v1038_v57 = vadd.f32 %v5122_v49, %v6967_v58  ;;  %v1102_v59 = vadd.f32 %v5170_v52, %v6967_v58 }
 0x24e   : > { %v5124_v60 = vpop.f32.mrf.mxu0  ;;  %v5172_v61 = vpop.f32.mrf.mxu1 }
 0x24f   : > { %v5006_v62 = vpack.c.bf16 %v1038_v57, %v1035_v55  ;;  %v5046_v63 = vpack.c.bf16 %v1102_v59, %v1099_v56  ;;  %v5125_v2 = vadd.f32 %v5124_v60, %v5123_v53  ;;  %v5173_v3 = vadd.f32 %v5172_v61, %v5171_v54 }
 0x250   : > { %v5126_v0 = vpop.f32.mrf.mxu0  ;;  %v5174_v1 = vpop.f32.mrf.mxu1 }
 0x251   : > { %5070 = vst [vmem:[#allocation3 + $0x18] sm:$0xff] %v5006_v62   ;;  %5078 = vst [vmem:[#allocation3 + $0x58] sm:$0xff] %v5046_v63   ;;  %v1043_v10 = vadd.f32 %v5125_v2, %v6967_v58  ;;  %v1107_v11 = vadd.f32 %v5173_v3, %v6967_v58 }
 0x252   : > { %v5127_v4 = vpop.f32.mrf.mxu0  ;;  %v5175_v5 = vpop.f32.mrf.mxu1 }
 0x253   : > { %v5128_v6 = vadd.f32 %v5127_v4, %v5126_v0  ;;  %v5176_v7 = vadd.f32 %v5175_v5, %v5174_v1 }
 0x254   : > { %v5129_v8 = vpop.f32.mrf.mxu0  ;;  %v5177_v9 = vpop.f32.mrf.mxu1 }
 0x255   : > { %v1046_v12 = vadd.f32 %v5128_v6, %v6967_v58  ;;  %v1110_v13 = vadd.f32 %v5176_v7, %v6967_v58 }
 0x256   : > { %v5130_v14 = vpop.f32.mrf.mxu0  ;;  %v5178_v15 = vpop.f32.mrf.mxu1 }
 0x257   : > { %v5011_v16 = vpack.c.bf16 %v1046_v12, %v1043_v10  ;;  %v5051_v17 = vpack.c.bf16 %v1110_v13, %v1107_v11  ;;  %v5131_v20 = vadd.f32 %v5130_v14, %v5129_v8  ;;  %v5179_v21 = vadd.f32 %v5178_v15, %v5177_v9 }
 0x258   : > { %v5132_v18 = vpop.f32.mrf.mxu0  ;;  %v5180_v19 = vpop.f32.mrf.mxu1 }
 0x259   : > { %5071 = vst [vmem:[#allocation3 + $0x20] sm:$0xff] %v5011_v16   ;;  %5079 = vst [vmem:[#allocation3 + $0x60] sm:$0xff] %v5051_v17   ;;  %v1051_v28 = vadd.f32 %v5131_v20, %v6967_v58  ;;  %v1115_v29 = vadd.f32 %v5179_v21, %v6967_v58 }
 0x25a   : > { %v5133_v22 = vpop.f32.mrf.mxu0  ;;  %v5181_v23 = vpop.f32.mrf.mxu1 }
 0x25b   : > { %v5134_v24 = vadd.f32 %v5133_v22, %v5132_v18  ;;  %v5182_v25 = vadd.f32 %v5181_v23, %v5180_v19 }
 0x25c   : > { %v5135_v26 = vpop.f32.mrf.mxu0  ;;  %v5183_v27 = vpop.f32.mrf.mxu1 }
 0x25d   : > { %v1054_v30 = vadd.f32 %v5134_v24, %v6967_v58  ;;  %v1118_v31 = vadd.f32 %v5182_v25, %v6967_v58 }
 0x25e   : > { %v5136_v32 = vpop.f32.mrf.mxu0  ;;  %v5184_v33 = vpop.f32.mrf.mxu1 }
 0x25f   : > { %v5016_v34 = vpack.c.bf16 %v1054_v30, %v1051_v28  ;;  %v5056_v35 = vpack.c.bf16 %v1118_v31, %v1115_v29  ;;  %v5137_v38 = vadd.f32 %v5136_v32, %v5135_v26  ;;  %v5185_v39 = vadd.f32 %v5184_v33, %v5183_v27 }
 0x260   : > { %v5138_v36 = vpop.f32.mrf.mxu0  ;;  %v5186_v37 = vpop.f32.mrf.mxu1 }
 0x261   : > { %5072 = vst [vmem:[#allocation3 + $0x28] sm:$0xff] %v5016_v34   ;;  %5080 = vst [vmem:[#allocation3 + $0x68] sm:$0xff] %v5056_v35   ;;  %v1059_v50 = vadd.f32 %v5137_v38, %v6967_v58  ;;  %v1123_v51 = vadd.f32 %v5185_v39, %v6967_v58 }
 0x262   : > { %v5139_v40 = vpop.f32.mrf.mxu0  ;;  %v5187_v41 = vpop.f32.mrf.mxu1 }
 0x263   : > { %v5140_v42 = vadd.f32 %v5139_v40, %v5138_v36  ;;  %v5188_v43 = vadd.f32 %v5187_v41, %v5186_v37 }
 0x264   : > { %v5141_v44 = vpop.f32.mrf.mxu0  ;;  %v5189_v45 = vpop.f32.mrf.mxu1 }
 0x265   : > { %v1062_v46 = vadd.f32 %v5140_v42, %v6967_v58  ;;  %v1126_v47 = vadd.f32 %v5188_v43, %v6967_v58 }
 0x266   : > { %v5142_v48 = vpop.f32.mrf.mxu0  ;;  %v5190_v49 = vpop.f32.mrf.mxu1 }
 0x267   : > { %v5021_v52 = vpack.c.bf16 %v1062_v46, %v1059_v50  ;;  %v5061_v53 = vpack.c.bf16 %v1126_v47, %v1123_v51  ;;  %v5143_v56 = vadd.f32 %v5142_v48, %v5141_v44  ;;  %v5191_v57 = vadd.f32 %v5190_v49, %v5189_v45 }
 0x268   : > { %v5144_v54 = vpop.f32.mrf.mxu0  ;;  %v5192_v55 = vpop.f32.mrf.mxu1 }
 0x269   : > { %5073 = vst [vmem:[#allocation3 + $0x30] sm:$0xff] %v5021_v52   ;;  %5081 = vst [vmem:[#allocation3 + $0x70] sm:$0xff] %v5061_v53   ;;  %v1067_v63 = vadd.f32 %v5143_v56, %v6967_v58  ;;  %v1131_v0 = vadd.f32 %v5191_v57, %v6967_v58 }
 0x26a   : > { %v5145_v59 = vpop.f32.mrf.mxu0  ;;  %v5193_v60 = vpop.f32.mrf.mxu1 }
 0x26b   : > { %v5146_v61 = vadd.f32 %v5145_v59, %v5144_v54  ;;  %v5194_v62 = vadd.f32 %v5193_v60, %v5192_v55 }
 0x26d   : > { %v1070_v1 = vadd.f32 %v5146_v61, %v6967_v58  ;;  %v1134_v2 = vadd.f32 %v5194_v62, %v6967_v58 }
 0x26f   : > { %v5026_v3 = vpack.c.bf16 %v1070_v1, %v1067_v63  ;;  %v5066_v4 = vpack.c.bf16 %v1134_v2, %v1131_v0 }
 0x271   : > { %5074 = vst [vmem:[#allocation3 + $0x38] sm:$0xff] %v5026_v3   ;;  %5082 = vst [vmem:[#allocation3 + $0x78] sm:$0xff] %v5066_v4  }
 0x272 PF: > { %v1424_v5 = vld [vmem:[%s6590_s19 + $0xf0] sm:$0xff]  ;;  %v1425_v6 = vld [vmem:[%s6590_s19 + $0xf8] sm:$0xff]  ;;  %v1422_v9 = vld [vmem:[%s6590_s19 + $0xe0] sm:$0xff]  ;;  %v6289_v11 = vmov 0   ;;  %s8600_s26 = sld [smem:[#allocation69_spill]]  ;;  %vm2954_vm1 = vcmask 7168  }
 0x273   : > { %v1408_v7 = vld [vmem:[%s6590_s19 + $0x70] sm:$0xff]  ;;  %v1457_v8 = vpack.c.bf16 %v1425_v6, %v1424_v5  ;;  %v1409_v58 = vld [vmem:[%s6590_s19 + $0x78] sm:$0xff]  ;;  %v1423_v10 = vld [vmem:[%s6590_s19 + $0xe8] sm:$0xff]  ;;  %5676 = vset.pattern.permute.xlu0 %v6289_v11  ;;  %5677 = vset.pattern.permute.xlu1 %v6289_v11  ;;  %s8602_s4 = sld [smem:[#allocation28_spill]] }
 0x274   : > { %v1449_v12 = vpack.c.bf16 %v1409_v58, %v1408_v7  ;;  %v1456_v13 = vpack.c.bf16 %v1423_v10, %v1422_v9  ;;  %v1406_v14 = vld [vmem:[%s6590_s19 + $0x60] sm:$0xff]  ;;  %v1407_v15 = vld [vmem:[%s6590_s19 + $0x68] sm:$0xff]  ;;  %v1420_v16 = vld [vmem:[%s6590_s19 + $0xd0] sm:$0xff]  ;;  %s8620_s15 = sld [smem:[#allocation71_spill]] }
 0x275   : > { %5195 = vmatprep.subr.bf16.mxu0 %v1457_v8  ;;  %v1421_v17 = vld [vmem:[%s6590_s19 + $0xd8] sm:$0xff]  ;;  %v1448_v18 = vpack.c.bf16 %v1407_v15, %v1406_v14  ;;  %v1404_v20 = vld [vmem:[%s6590_s19 + $0x50] sm:$0xff]  ;;  %v1418_v22 = vld [vmem:[%s6590_s19 + $0xc0] sm:$0xff] }
 0x276   : > { %5196 = vmatpush3.bf16.msra.mxu0 %v1449_v12  ;;  %v1455_v19 = vpack.c.bf16 %v1421_v17, %v1420_v16  ;;  %v1405_v21 = vld [vmem:[%s6590_s19 + $0x58] sm:$0xff]  ;;  %v1419_v23 = vld [vmem:[%s6590_s19 + $0xc8] sm:$0xff]  ;;  %v1402_v26 = vld [vmem:[%s6590_s19 + $0x40] sm:$0xff] }
 0x277   : > { %5197 = vmatprep.subr.bf16.mxu0 %v1456_v13  ;;  %v1447_v24 = vpack.c.bf16 %v1405_v21, %v1404_v20  ;;  %v1454_v25 = vpack.c.bf16 %v1419_v23, %v1418_v22  ;;  %v1403_v27 = vld [vmem:[%s6590_s19 + $0x48] sm:$0xff]  ;;  %v1416_v28 = vld [vmem:[%s6590_s19 + $0xb0] sm:$0xff]  ;;  %v1417_v29 = vld [vmem:[%s6590_s19 + $0xb8] sm:$0xff] }
 0x278   : > { %v5680_v30 = vld [vmem:[#allocation12 + $0x4] ss:$8 sps:$4 sm:$0xff]   ;;  %v1446_v31 = vpack.c.bf16 %v1403_v27, %v1402_v26  ;;  %v1400_v32 = vld [vmem:[%s6590_s19 + $0x30] sm:$0xff]  ;;  %v1453_v33 = vpack.c.bf16 %v1417_v29, %v1416_v28  ;;  %v1401_v34 = vld [vmem:[%s6590_s19 + $0x38] sm:$0xff]  ;;  %s8601_s20 = smov %s8600_s26 }
 0x279   : > { %1666 = vmatprep.mubr.bf16.mxu0 %v5680_v30  ;;  %v1414_v35 = vld [vmem:[%s6590_s19 + $0xa0] sm:$0xff]  ;;  %v1415_v36 = vld [vmem:[%s6590_s19 + $0xa8] sm:$0xff]  ;;  %v1445_v37 = vpack.c.bf16 %v1401_v34, %v1400_v32  ;;  %v1412_v41 = vld [vmem:[%s6590_s19 + $0x90] sm:$0xff]  ;;  %s4887_s17 = sshll.u32 %s8602_s4, 7  ;;  %p4923_p1 = scmp.ne.s32.totalorder %s8602_s4, 1 }
 0x27a   : > { %5198 = vmatpush3.bf16.msra.mxu0 %v1448_v18  ;;  %v1398_v38 = vld [vmem:[%s6590_s19 + $0x20] sm:$0xff]  ;;  %v1452_v39 = vpack.c.bf16 %v1415_v36, %v1414_v35  ;;  %v1399_v40 = vld [vmem:[%s6590_s19 + $0x28] sm:$0xff]  ;;  %v1413_v42 = vld [vmem:[%s6590_s19 + $0x98] sm:$0xff]  ;;  %s1732_s2 = sshra.s32 %s4887_s17, 3  ;;  %s8682_s12 = sld [smem:[#allocation73_spill]] (!%p4923_p1) }
 0x27b   : > { %5199 = vmatprep.subr.bf16.mxu0 %v1455_v19  ;;  %v1472_v43 = vld [vmem:[%s8600_s26 + $0x70] sm:$0xff]  ;;  %v1444_v44 = vpack.c.bf16 %v1399_v40, %v1398_v38  ;;  %v1473_v50 = vld [vmem:[%s8601_s20 + $0x78] sm:$0xff]  ;;  %v1470_v51 = vld [vmem:[%s8601_s20 + $0x60] sm:$0xff]  ;;  %v1451_v46 = vpack.c.bf16 %v1413_v42, %v1412_v41  ;;  %s4984_s21 = sshll.u32 %s1732_s2, 4 }
 0x27c   : > { %1546 = vperm.xlu0 %5676, %v1472_v43   ;;  %v1396_v45 = vld [vmem:[%s6590_s19 + $0x10] sm:$0xff]  ;;  %v1397_v47 = vld [vmem:[%s6590_s19 + $0x18] sm:$0xff]  ;;  %v1410_v48 = vld [vmem:[%s6590_s19 + $0x80] sm:$0xff]  ;;  %1536 = vperm.xlu1 %5677, %v1470_v51   ;;  %s7130_s9 = scalar_lea.vmem [#allocation2], %s4984_s21 }
 0x27d   : > { %v1411_v49 = vld [vmem:[%s6590_s19 + $0x88] sm:$0xff]  ;;  %v1443_v53 = vpack.c.bf16 %v1397_v47, %v1396_v45  ;;  %v1468_v54 = vld [vmem:[%s8601_s20 + $0x50] sm:$0xff]  ;;  %v1394_v56 = vld [vmem:[%s6590_s19] sm:$0xff] }
 0x27e   : > { %5200 = vmatpush3.bf16.msra.mxu0 %v1447_v24  ;;  %v1471_v52 = vld [vmem:[%s8601_s20 + $0x68] sm:$0xff]  ;;  %v1450_v55 = vpack.c.bf16 %v1411_v49, %v1410_v48  ;;  %v1469_v59 = vld [vmem:[%s8601_s20 + $0x58] sm:$0xff]  ;;  %v1466_v60 = vld [vmem:[%s8601_s20 + $0x40] sm:$0xff] }
 0x27f   : > { %5201 = vmatprep.subr.bf16.mxu0 %v1454_v25  ;;  %v1395_v57 = vld [vmem:[%s6590_s19 + $0x8] sm:$0xff]  ;;  %v5681_v0 = vld [vmem:[#allocation12 + $0x14] ss:$8 sps:$4 sm:$0xff]   ;;  %v1462_v3 = vld [vmem:[%s8601_s20 + $0x20] sm:$0xff] }
 0x280   : > { %1551 = vperm.xlu0 %5676, %v1473_v50   ;;  %1541 = vperm.xlu1 %5677, %v1471_v52   ;;  %v1442_v61 = vpack.c.bf16 %v1395_v57, %v1394_v56  ;;  %v1467_v62 = vld [vmem:[%s8601_s20 + $0x48] sm:$0xff]  ;;  %v1464_v1 = vld [vmem:[%s8601_s20 + $0x30] sm:$0xff]  ;;  %v1465_v2 = vld [vmem:[%s8601_s20 + $0x38] sm:$0xff] }
 0x281   : > { %v5678_v63 = vld [vmem:[#allocation12] ss:$8 sps:$4 sm:$0xff]   ;;  %v5683_v5 = vld [vmem:[#allocation12 + $0x10] ss:$8 sps:$4 sm:$0xff]   ;;  %v5684_v6 = vld [vmem:[#allocation12 + $0x24] ss:$8 sps:$4 sm:$0xff]  }
 0x282   : > { %5202 = vmatpush3.bf16.msra.mxu0 %v1446_v31  ;;  %v1463_v4 = vld [vmem:[%s8601_s20 + $0x28] sm:$0xff]  ;;  %v1460_v7 = vld [vmem:[%s8601_s20 + $0x10] sm:$0xff]  ;;  %v1461_v8 = vld [vmem:[%s8601_s20 + $0x18] sm:$0xff] }
 0x283   : > { %5203 = vmatprep.subr.bf16.mxu0 %v1453_v33  ;;  %v1458_v58 = vld [vmem:[%s8601_s20] sm:$0xff]  ;;  %v1459_v9 = vld [vmem:[%s8601_s20 + $0x8] sm:$0xff]  ;;  %v5687_v11 = vld [vmem:[#allocation12 + $0x34] ss:$8 sps:$4 sm:$0xff]  }
 0x284   : > { %1526 = vperm.xlu0 %5676, %v1468_v54   ;;  %1531 = vperm.xlu1 %5677, %v1469_v59   ;;  %v5686_v10 = vld [vmem:[#allocation12 + $0x20] ss:$8 sps:$4 sm:$0xff]   ;;  %v5689_v12 = vld [vmem:[#allocation12 + $0x30] ss:$8 sps:$4 sm:$0xff]   ;;  %v5690_v13 = vld [vmem:[#allocation12 + $0x44] ss:$8 sps:$4 sm:$0xff]  }
 0x285   : > { %v5692_v14 = vld [vmem:[#allocation12 + $0x40] ss:$8 sps:$4 sm:$0xff]   ;;  %v5693_v15 = vld [vmem:[#allocation12 + $0x54] ss:$8 sps:$4 sm:$0xff]   ;;  %v5695_v16 = vld [vmem:[#allocation12 + $0x50] ss:$8 sps:$4 sm:$0xff]  }
 0x286   : > { %5204 = vmatpush3.bf16.msra.mxu0 %v1445_v37  ;;  %v5696_v17 = vld [vmem:[#allocation12 + $0x64] ss:$8 sps:$4 sm:$0xff]   ;;  %v5698_v18 = vld [vmem:[#allocation12 + $0x60] ss:$8 sps:$4 sm:$0xff]   ;;  %v5699_v19 = vld [vmem:[#allocation12 + $0x74] ss:$8 sps:$4 sm:$0xff]  }
 0x287   : > { %5205 = vmatprep.subr.bf16.mxu0 %v1452_v39  ;;  %v5701_v20 = vld [vmem:[#allocation12 + $0x70] ss:$8 sps:$4 sm:$0xff]   ;;  %v5702_v25 = vld [vmem:[#allocation3] sm:$0xff]  }
 0x288   : > { %1516 = vperm.xlu0 %5676, %v1466_v60   ;;  %1521 = vperm.xlu1 %5677, %v1467_v62  }
 0x28a   : > { %5206 = vmatpush3.bf16.msra.mxu0 %v1444_v44 }
 0x28b   : > { %5207 = vmatprep.subr.bf16.mxu0 %v1451_v46 }
 0x28c   : > { %1506 = vperm.xlu0 %5676, %v1464_v1   ;;  %1511 = vperm.xlu1 %5677, %v1465_v2   ;;  %v5719_v1 = vld [vmem:[#allocation13 + $0x38] sm:$0xff]   ;;  %v5720_v2 = vld [vmem:[#allocation13 + $0x70] sm:$0xff]  }
 0x28e   : > { %5208 = vmatpush3.bf16.msra.mxu0 %v1443_v53 }
 0x28f   : > { %5209 = vmatprep.subr.bf16.mxu0 %v1450_v55 }
 0x290   : > { %1496 = vperm.xlu0 %5676, %v1462_v3   ;;  %1501 = vperm.xlu1 %5677, %v1463_v4  }
 0x292   : > { %5210 = vmatpush3.bf16.msra.mxu0 %v1442_v61 }
 0x294   : > { %1486 = vperm.xlu0 %5676, %v1460_v7   ;;  %1491 = vperm.xlu1 %5677, %v1461_v8   ;;  %v1738_v8 = vld [vmem:[%s7130_s9 + $0x8] sm:$0xff] }
 0x295   : > { %1667 = vmatmul.mubr.bf16.vlgmr.msra.gmra.mxu0 %v5678_v63 }
 0x296   : > { %1674 = vmatprep.mubr.bf16.mxu0 %v5681_v0  ;;  %v5718_v0 = vld [vmem:[#allocation13 + $0x78] sm:$0xff]  }
 0x297   : > { %5259 = vmatprep.subr.bf16.mxu1 %v5718_v0 }
 0x298   : > { %1476 = vperm.xlu0 %5676, %v1458_v58   ;;  %1481 = vperm.xlu1 %5677, %v1459_v9   ;;  %v1740_v58 = vld [vmem:[%s7130_s9 + $0x18] sm:$0xff] }
 0x299   : > { %5260 = vmatpush3.bf16.msra.mxu1 %v5719_v1  ;;  %v1770_v9 = vpack.c.bf16 %v1740_v58, %v1738_v8 }
 0x29a   : > { %5261 = vmatprep.subr.bf16.mxu1 %v5720_v2 }
 0x29b   : > { %1952 = vmatprep.mubr.bf16.mxu1 %v1770_v9 }
 0x29d   : > { %1675 = vmatmul.mubr.bf16.gmra.mxu0 %v5683_v5  ;;  %v5721_v5 = vld [vmem:[#allocation13 + $0x30] sm:$0xff]  }
 0x29e   : > { %1682 = vmatprep.mubr.bf16.mxu0 %v5684_v6  ;;  %v5722_v6 = vld [vmem:[#allocation13 + $0x68] sm:$0xff]   ;;  %5262 = vmatpush3.bf16.msra.mxu1 %v5721_v5  ;;  %v1741_v5 = vld [vmem:[%s7130_s9 + $0x20] sm:$0xff] }
 0x29f   : > { %5263 = vmatprep.subr.bf16.mxu1 %v5722_v6  ;;  %v1743_v6 = vld [vmem:[%s7130_s9 + $0x30] sm:$0xff] }
 0x2a5   : > { %1683 = vmatmul.mubr.bf16.gmra.mxu0 %v5686_v10 }
 0x2a6   : > { %1690 = vmatprep.mubr.bf16.mxu0 %v5687_v11  ;;  %v5723_v11 = vld [vmem:[#allocation13 + $0x28] sm:$0xff]  }
 0x2a7   : > { %5264 = vmatpush3.bf16.msra.mxu1 %v5723_v11 }
 0x2ad   : > { %1691 = vmatmul.mubr.bf16.gmra.mxu0 %v5689_v12  ;;  %v5724_v12 = vld [vmem:[#allocation13 + $0x60] sm:$0xff]  }
 0x2ae   : > { %1698 = vmatprep.mubr.bf16.mxu0 %v5690_v13  ;;  %5265 = vmatprep.subr.bf16.mxu1 %v5724_v12  ;;  %v1746_v12 = vld [vmem:[%s7130_s9 + $0x48] sm:$0xff] }
 0x2b5   : > { %1699 = vmatmul.mubr.bf16.gmra.mxu0 %v5692_v14 }
 0x2b6   : > { %1706 = vmatprep.mubr.bf16.mxu0 %v5693_v15  ;;  %v5725_v15 = vld [vmem:[#allocation13 + $0x20] sm:$0xff]  }
 0x2b7   : > { %5266 = vmatpush3.bf16.msra.mxu1 %v5725_v15  ;;  %v1748_v15 = vld [vmem:[%s7130_s9 + $0x58] sm:$0xff] }
 0x2bd   : > { %1707 = vmatmul.mubr.bf16.gmra.mxu0 %v5695_v16  ;;  %v5726_v16 = vld [vmem:[#allocation13 + $0x58] sm:$0xff]  }
 0x2be   : > { %1714 = vmatprep.mubr.bf16.mxu0 %v5696_v17  ;;  %5267 = vmatprep.subr.bf16.mxu1 %v5726_v16 }
 0x2c5   : > { %1715 = vmatmul.mubr.bf16.gmra.mxu0 %v5698_v18 }
 0x2c6   : > { %1722 = vmatprep.mubr.bf16.mxu0 %v5699_v19  ;;  %v5727_v19 = vld [vmem:[#allocation13 + $0x18] sm:$0xff]  }
 0x2c7   : > { %5268 = vmatpush3.bf16.msra.mxu1 %v5727_v19 }
 0x2cd   : > { %1723 = vmatmul.mubr.bf16.gmra.mxu0 %v5701_v20  ;;  %v5728_v20 = vld [vmem:[#allocation13 + $0x50] sm:$0xff]  }
 0x2ce   : > { %5387 = vmatprep.mubr.bf16.mxu0 %v5702_v25  ;;  %5269 = vmatprep.subr.bf16.mxu1 %v5728_v20 }
 0x2f7   : > { %v7081_v21 = vpop.permute.xlu0 %1546  ;;  %v7083_v22 = vpop.permute.xlu1 %1536 }
 0x2fb   : > { %v7085_v23 = vpop.permute.xlu0 %1551  ;;  %v7087_v24 = vpop.permute.xlu1 %1541 }
 0x2ff   : > { %v7089_v26 = vpop.permute.xlu0 %1526  ;;  %v7091_v27 = vpop.permute.xlu1 %1531 }
 0x303   : > { %v7093_v28 = vpop.permute.xlu0 %1516  ;;  %v7095_v29 = vpop.permute.xlu1 %1521 }
 0x307   : > { %v7097_v30 = vpop.permute.xlu0 %1506  ;;  %v7099_v31 = vpop.permute.xlu1 %1511 }
 0x30b   : > { %v7101_v32 = vpop.permute.xlu0 %1496  ;;  %v7103_v33 = vpop.permute.xlu1 %1501 }
 0x30f   : > { %v1487_v34 = vpop.permute.xlu0 %1486  ;;  %v1492_v36 = vpop.permute.xlu1 %1491 }
 0x313   : > { %v1477_v40 = vpop.permute.xlu0 %1476  ;;  %v1482_v42 = vpop.permute.xlu1 %1481 }
 0x355   : > { %v5211_v35 = vpop.f32.mrf.mxu0 }
 0x357   : > { %v5212_v37 = vpop.f32.mrf.mxu0 }
 0x358   : > { %v5213_v38 = vadd.f32 %v5212_v37, %v5211_v35  ;;  %v5729_v35 = vld [vmem:[#allocation13 + $0x10] sm:$0xff]  }
 0x359   : > { %v5214_v39 = vpop.f32.mrf.mxu0  ;;  %5270 = vmatpush3.bf16.msra.mxu1 %v5729_v35  ;;  %v1774_v35 = vpack.c.bf16 %v1748_v15, %v1746_v12  ;;  %v5709_v15 = vld [vmem:[#allocation3 + $0x38] sm:$0xff]  }
 0x35a   : > { %v1669_v45 = vadd.f32 %v5213_v38, %v1477_v40  ;;  %v5732_v40 = vld [vmem:[#allocation13 + $0x40] sm:$0xff]  }
 0x35b   : > { %v5215_v41 = vpop.f32.mrf.mxu0 }
 0x35c   : > { %v5216_v43 = vadd.f32 %v5215_v41, %v5214_v39  ;;  %v5731_v39 = vld [vmem:[#allocation13 + $0x8] sm:$0xff]  }
 0x35d   : > { %v5217_v44 = vpop.f32.mrf.mxu0 }
 0x35e   : > { %v1672_v50 = vadd.f32 %v5216_v43, %v1482_v42  ;;  %v5733_v43 = vld [vmem:[#allocation13] sm:$0xff]  }
 0x35f   : > { %v5218_v51 = vpop.f32.mrf.mxu0 }
 0x360   : > { %v7105_v46 = vpack.c.bf16 %v1672_v50, %v1669_v45  ;;  %v5219_v47 = vadd.f32 %v5218_v51, %v5217_v44  ;;  %v1737_v44 = vld [vmem:[%s7130_s9] sm:$0xff]  ;;  %v1739_v45 = vld [vmem:[%s7130_s9 + $0x10] sm:$0xff]  ;;  %v1742_v50 = vld [vmem:[%s7130_s9 + $0x28] sm:$0xff] }
 0x361   : > { %v5220_v48 = vpop.f32.mrf.mxu0  ;;  %v1744_v51 = vld [vmem:[%s7130_s9 + $0x38] sm:$0xff] }
 0x362   : > { %v1677_v54 = vadd.f32 %v5219_v47, %v1487_v34 }
 0x363   : > { %v5221_v49 = vpop.f32.mrf.mxu0 }
 0x364   : > { %v5222_v52 = vadd.f32 %v5221_v49, %v5220_v48  ;;  %v1769_v48 = vpack.c.bf16 %v1739_v45, %v1737_v44  ;;  %v1757_v45 = vld [vmem:[%s7130_s9 + $0xa0] sm:$0xff] }
 0x365   : > { %v7107_v53 = vpop.f32.mrf.mxu0 }
 0x366   : > { %v1680_v55 = vadd.f32 %v5222_v52, %v1492_v36  ;;  %v5730_v36 = vld [vmem:[#allocation13 + $0x48] sm:$0xff]   ;;  %v1772_v52 = vpack.c.bf16 %v1744_v51, %v1742_v50  ;;  %v1759_v50 = vld [vmem:[%s7130_s9 + $0xb0] sm:$0xff] }
 0x367   : > { %v7109_v56 = vpop.f32.mrf.mxu0  ;;  %5271 = vmatprep.subr.bf16.mxu1 %v5730_v36  ;;  %v5703_v51 = vld [vmem:[#allocation3 + $0x8] sm:$0xff]  }
 0x368   : > { %v7111_v57 = vpack.c.bf16 %v1680_v55, %v1677_v54  ;;  %5272 = vmatpush3.bf16.msra.mxu1 %v5731_v39 }
 0x369   : > { %v7113_v59 = vpop.f32.mrf.mxu0  ;;  %5273 = vmatprep.subr.bf16.mxu1 %v5732_v40 }
 0x36b   : > { %v7115_v60 = vpop.f32.mrf.mxu0 }
 0x36c   : > { %5274 = vmatpush3.bf16.msra.mxu1 %v5733_v43  ;;  %v1760_v43 = vld [vmem:[%s7130_s9 + $0xb8] sm:$0xff] }
 0x36d   : > { %v7117_v61 = vpop.f32.mrf.mxu0 }
 0x36f   : > { %v7119_v62 = vpop.f32.mrf.mxu0  ;;  %1953 = vmatmul.mubr.bf16.vlgmr.msra.gmra.mxu1 %v1769_v48  ;;  %v1764_v48 = vld [vmem:[%s7130_s9 + $0xd8] sm:$0xff] }
 0x370   : > { %1960 = vmatprep.mubr.bf16.mxu1 %v1772_v52  ;;  %v1779_v52 = vpack.c.bf16 %v1759_v50, %v1757_v45 }
 0x371   : > { %v7121_v63 = vpop.f32.mrf.mxu0 }
 0x373   : > { %v7124_v3 = vpop.f32.mrf.mxu0 }
 0x375   : > { %v7126_v4 = vpop.f32.mrf.mxu0 }
 0x377   : > { %v7128_v7 = vpop.f32.mrf.mxu0 }
 0x379   : > { %v7134_v10 = vpop.f32.mrf.mxu0 }
 0x37b   : > { %v5239_v13 = vpop.f32.mrf.mxu0 }
 0x37c   : > { %v5240_v36 = vadd.f32 %v5239_v13, %v7134_v10 }
 0x37d   : > { %v5241_v14 = vpop.f32.mrf.mxu0 }
 0x37e   : > { %v1704_v10 = vadd.f32 %v5240_v36, %v7095_v29  ;;  %v5715_v36 = vld [vmem:[#allocation3 + $0x68] sm:$0xff]  }
 0x37f   : > { %v5242_v17 = vpop.f32.mrf.mxu0 }
 0x380   : > { %v5243_v16 = vadd.f32 %v5242_v17, %v5241_v14  ;;  %v1747_v17 = vld [vmem:[%s7130_s9 + $0x50] sm:$0xff] }
 0x381   : > { %v5244_v18 = vpop.f32.mrf.mxu0 }
 0x382   : > { %v1709_v14 = vadd.f32 %v5243_v16, %v7089_v26  ;;  %v5710_v16 = vld [vmem:[#allocation3 + $0x40] sm:$0xff]  }
 0x383   : > { %v5245_v25 = vpop.f32.mrf.mxu0 }
 0x384   : > { %v5246_v8 = vadd.f32 %v5245_v25, %v5244_v18  ;;  %v5234_v18 = vadd.f32 %v7124_v3, %v7121_v63  ;;  %v1752_v25 = vld [vmem:[%s7130_s9 + $0x78] sm:$0xff]  ;;  %v5228_v63 = vadd.f32 %v7115_v60, %v7113_v59 }
 0x385   : > { %v5247_v34 = vpop.f32.mrf.mxu0  ;;  %v1756_v60 = vld [vmem:[%s7130_s9 + $0x98] sm:$0xff] }
 0x386   : > { %v1696_v29 = vadd.f32 %v5234_v18, %v7099_v31  ;;  %v1754_v31 = vld [vmem:[%s7130_s9 + $0x88] sm:$0xff] }
 0x387   : > { %v5248_v37 = vpop.f32.mrf.mxu0 }
 0x388   : > { %v5249_v1 = vadd.f32 %v5248_v37, %v5247_v34  ;;  %v1771_v34 = vpack.c.bf16 %v1743_v6, %v1741_v5  ;;  %v5706_v5 = vld [vmem:[#allocation3 + $0x20] sm:$0xff]  }
 0x389   : > { %v5250_v38 = vpop.f32.mrf.mxu0 }
 0x38a   : > { %v1717_v19 = vadd.f32 %v5249_v1, %v7083_v22  ;;  %1961 = vmatmul.mubr.bf16.gmra.mxu1 %v1771_v34  ;;  %v1745_v22 = vld [vmem:[%s7130_s9 + $0x40] sm:$0xff]  ;;  %v1766_v1 = vld [vmem:[%s7130_s9 + $0xe8] sm:$0xff]  ;;  %v5713_v34 = vld [vmem:[#allocation3 + $0x58] sm:$0xff]  }
 0x38b   : > { %v5251_v41 = vpop.f32.mrf.mxu0  ;;  %1968 = vmatprep.mubr.bf16.mxu1 %v1774_v35  ;;  %v5714_v35 = vld [vmem:[#allocation3 + $0x60] sm:$0xff]  }
 0x38c   : > { %v5252_v54 = vadd.f32 %v5251_v41, %v5250_v38  ;;  %v5225_v38 = vadd.f32 %v7109_v56, %v7107_v53  ;;  %v1755_v41 = vld [vmem:[%s7130_s9 + $0x90] sm:$0xff] }
 0x38d   : > { %v5253_v42 = vpop.f32.mrf.mxu0 }
 0x38e   : > { %v1720_v58 = vadd.f32 %v5252_v54, %v7087_v24  ;;  %v1712_v24 = vadd.f32 %v5246_v8, %v7091_v27  ;;  %v1750_v27 = vld [vmem:[%s7130_s9 + $0x68] sm:$0xff]  ;;  %v1685_v40 = vadd.f32 %v5225_v38, %v7101_v32 }
 0x38f   : > { %v5254_v47 = vpop.f32.mrf.mxu0  ;;  %v1776_v37 = vpack.c.bf16 %v1752_v25, %v1750_v27 }
 0x390   : > { %v5255_v55 = vadd.f32 %v5254_v47, %v5253_v42  ;;  %v2054_v13 = vpack.c.bf16 %v1712_v24, %v1709_v14  ;;  %v1758_v42 = vld [vmem:[%s7130_s9 + $0xa8] sm:$0xff]  ;;  %v5716_v24 = vld [vmem:[#allocation3 + $0x70] sm:$0xff]  }
 0x391   : > { %v5256_v49 = vpop.f32.mrf.mxu0  ;;  %v1780_v44 = vpack.c.bf16 %v1760_v43, %v1758_v42  ;;  %v1762_v47 = vld [vmem:[%s7130_s9 + $0xc8] sm:$0xff] }
 0x392   : > { %v1725_v9 = vadd.f32 %v5255_v55, %v7081_v21  ;;  %v2055_v21 = vpack.c.bf16 %v1720_v58, %v1717_v19  ;;  %v1782_v54 = vpack.c.bf16 %v1764_v48, %v1762_v47  ;;  %v1763_v55 = vld [vmem:[%s7130_s9 + $0xd0] sm:$0xff]  ;;  %v5711_v19 = vld [vmem:[#allocation3 + $0x48] sm:$0xff]  }
 0x393   : > { %v5257_v0 = vpop.f32.mrf.mxu0  ;;  %v1767_v58 = vld [vmem:[%s7130_s9 + $0xf0] sm:$0xff] }
 0x394   : > { %v5258_v2 = vadd.f32 %v5257_v0, %v5256_v49  ;;  %v5704_v49 = vld [vmem:[#allocation3 + $0x10] sm:$0xff]   ;;  %v5705_v0 = vld [vmem:[#allocation3 + $0x18] sm:$0xff]  }
 0x396   : > { %v1728_v11 = vadd.f32 %v5258_v2, %v7085_v23  ;;  %v5237_v23 = vadd.f32 %v7128_v7, %v7126_v4  ;;  %v5231_v4 = vadd.f32 %v7119_v62, %v7117_v61  ;;  %v1773_v7 = vpack.c.bf16 %v1747_v17, %v1745_v22  ;;  %v1751_v61 = vld [vmem:[%s7130_s9 + $0x70] sm:$0xff]  ;;  %v1768_v2 = vld [vmem:[%s7130_s9 + $0xf8] sm:$0xff] }
 0x397   : > { %v1688_v62 = vadd.f32 %v5228_v63, %v7103_v33  ;;  %v1753_v33 = vld [vmem:[%s7130_s9 + $0x80] sm:$0xff]  ;;  %v1784_v8 = vpack.c.bf16 %v1768_v2, %v1766_v1 }
 0x398   : > { %v2056_v20 = vpack.c.bf16 %v1728_v11, %v1725_v9  ;;  %v1701_v26 = vadd.f32 %v5237_v23, %v7093_v28  ;;  %v1693_v39 = vadd.f32 %v5231_v4, %v7097_v30  ;;  %1969 = vmatmul.mubr.bf16.gmra.mxu1 %v1773_v7  ;;  %v1749_v28 = vld [vmem:[%s7130_s9 + $0x60] sm:$0xff]  ;;  %v1778_v30 = vpack.c.bf16 %v1756_v60, %v1754_v31  ;;  %v5707_v9 = vld [vmem:[#allocation3 + $0x28] sm:$0xff]   ;;  %v5708_v11 = vld [vmem:[#allocation3 + $0x30] sm:$0xff]  }
 0x399   : > { %1976 = vmatprep.mubr.bf16.mxu1 %v1776_v37  ;;  %v1775_v53 = vpack.c.bf16 %v1751_v61, %v1749_v28  ;;  %v2051_v56 = vpack.c.bf16 %v1688_v62, %v1685_v40  ;;  %v1777_v32 = vpack.c.bf16 %v1755_v41, %v1753_v33 }
 0x39a   : > { %5371 = vmatprep.subr.bf16.mxu0 %v2056_v20  ;;  %v2053_v3 = vpack.c.bf16 %v1704_v10, %v1701_v26  ;;  %v2052_v59 = vpack.c.bf16 %v1696_v29, %v1693_v39 }
 0x39b   : > { %5372 = vmatpush3.bf16.msra.mxu0 %v2056_v20  ;;  %v5712_v20 = vld [vmem:[#allocation3 + $0x50] sm:$0xff]  }
 0x39c   : > { %5373 = vmatprep.subr.bf16.mxu0 %v2055_v21 }
 0x39f   : > { %5374 = vmatpush3.bf16.msra.mxu0 %v2055_v21  ;;  %v5717_v21 = vld [vmem:[#allocation3 + $0x78] sm:$0xff]  }
 0x3a0   : > { %5375 = vmatprep.subr.bf16.mxu0 %v2054_v13  ;;  %1977 = vmatmul.mubr.bf16.gmra.mxu1 %v1775_v53 }
 0x3a1   : > { %1984 = vmatprep.mubr.bf16.mxu1 %v1778_v30 }
 0x3a3   : > { %5376 = vmatpush3.bf16.msra.mxu0 %v2054_v13 }
 0x3a4   : > { %5377 = vmatprep.subr.bf16.mxu0 %v2053_v3 }
 0x3a7   : > { %5378 = vmatpush3.bf16.msra.mxu0 %v2053_v3 }
 0x3a8   : > { %5379 = vmatprep.subr.bf16.mxu0 %v2052_v59  ;;  %1985 = vmatmul.mubr.bf16.gmra.mxu1 %v1777_v32 }
 0x3a9   : > { %1992 = vmatprep.mubr.bf16.mxu1 %v1780_v44 }
 0x3ab   : > { %5380 = vmatpush3.bf16.msra.mxu0 %v2052_v59 }
 0x3ac   : > { %5381 = vmatprep.subr.bf16.mxu0 %v2051_v56 }
 0x3af   : > { %5382 = vmatpush3.bf16.msra.mxu0 %v2051_v56 }
 0x3b0   : > { %5383 = vmatprep.subr.bf16.mxu0 %v7111_v57  ;;  %1993 = vmatmul.mubr.bf16.gmra.mxu1 %v1779_v52 }
 0x3b1   : > { %2000 = vmatprep.mubr.bf16.mxu1 %v1782_v54 }
 0x3b3   : > { %5384 = vmatpush3.bf16.msra.mxu0 %v7111_v57  ;;  %v1761_v57 = vld [vmem:[%s7130_s9 + $0xc0] sm:$0xff] }
 0x3b4   : > { %5385 = vmatprep.subr.bf16.mxu0 %v7105_v46  ;;  %v1781_v6 = vpack.c.bf16 %v1763_v55, %v1761_v57 }
 0x3b7   : > { %5386 = vmatpush3.bf16.msra.mxu0 %v7105_v46  ;;  %v1765_v46 = vld [vmem:[%s7130_s9 + $0xe0] sm:$0xff] }
 0x3b8   : > { %2001 = vmatmul.mubr.bf16.gmra.mxu1 %v1781_v6  ;;  %v1783_v12 = vpack.c.bf16 %v1767_v58, %v1765_v46 }
 0x3b9   : > { %2008 = vmatprep.mubr.bf16.mxu1 %v1784_v8 }
 0x3ba   : > { %5388 = vmatmul.mubr.bf16.vlgmr.msra.gmra.mxu0 %v5703_v51 }
 0x3bb   : > { %5391 = vmatprep.mubr.bf16.mxu0 %v5704_v49 }
 0x3c0   : > { %2009 = vmatmul.mubr.bf16.gmra.mxu1 %v1783_v12 }
 0x3c2   : > { %5392 = vmatmul.mubr.bf16.gmra.mxu0 %v5705_v0 }
 0x3c3   : > { %5395 = vmatprep.mubr.bf16.mxu0 %v5706_v5 }
 0x3ca   : > { %5396 = vmatmul.mubr.bf16.gmra.mxu0 %v5707_v9 }
 0x3cb   : > { %5399 = vmatprep.mubr.bf16.mxu0 %v5708_v11 }
 0x3d2   : > { %5400 = vmatmul.mubr.bf16.gmra.mxu0 %v5709_v15 }
 0x3d3   : > { %5403 = vmatprep.mubr.bf16.mxu0 %v5710_v16  ;;  %v7283_v16 = vld [vmem:[%s8620_s15] ss:$0 sm:$0xff] }
 0x3da   : > { %5404 = vmatmul.mubr.bf16.gmra.mxu0 %v5711_v19 }
 0x3db   : > { %5407 = vmatprep.mubr.bf16.mxu0 %v5712_v20 }
 0x3e2   : > { %5408 = vmatmul.mubr.bf16.gmra.mxu0 %v5713_v34 }
 0x3e3   : > { %5411 = vmatprep.mubr.bf16.mxu0 %v5714_v35 }
 0x3ea   : > { %5412 = vmatmul.mubr.bf16.gmra.mxu0 %v5715_v36 }
 0x3eb   : > { %5415 = vmatprep.mubr.bf16.mxu0 %v5716_v24 }
 0x3f2   : > { %5416 = vmatmul.mubr.bf16.gmra.mxu0 %v5717_v21 }
 0x42f   : > { %v5275_v23 = vpop.f32.mrf.mxu1 }
 0x431   : > { %v5276_v14 = vpop.f32.mrf.mxu1 }
 0x432   : > { %v7193_v22 = vadd.f32 %v5276_v14, %v5275_v23 }
 0x433   : > { %v5278_v17 = vpop.f32.mrf.mxu1 }
 0x435   : > { %v5279_v18 = vpop.f32.mrf.mxu1 }
 0x436   : > { %v7195_v10 = vadd.f32 %v5279_v18, %v5278_v17 }
 0x44a   : > { %v5281_v13 = vpop.f32.mrf.mxu1 }
 0x44c   : > { %v5282_v27 = vpop.f32.mrf.mxu1 }
 0x44d   : > { %v7197_v25 = vadd.f32 %v5282_v27, %v5281_v13 }
 0x44e   : > { %v5284_v4 = vpop.f32.mrf.mxu1 }
 0x450   : > { %v5285_v26 = vpop.f32.mrf.mxu1 }
 0x451   : > { %v7199_v7 = vadd.f32 %v5285_v26, %v5284_v4 }
 0x458   : > { %v5287_v37 = vpop.f32.mrf.mxu1 }
 0x45a   : > { %v5288_v63 = vpop.f32.mrf.mxu1 }
 0x45b   : > { %v7201_v29 = vadd.f32 %v5288_v63, %v5287_v37 }
 0x45c   : > { %v7203_v3 = vpop.f32.mrf.mxu1 }
 0x45e   : > { %v7205_v38 = vpop.f32.mrf.mxu1 }
 0x460   : > { %v7207_v39 = vpop.f32.mrf.mxu1 }
 0x462   : > { %v7209_v28 = vpop.f32.mrf.mxu1 }
 0x464   : > { %v7211_v61 = vpop.f32.mrf.mxu1 }
 0x466   : > { %v7218_v31 = vpop.f32.mrf.mxu1 }
 0x468   : > { %v7226_v53 = vpop.f32.mrf.mxu1 }
 0x46a   : > { %v7234_v33 = vpop.f32.mrf.mxu1 }
 0x46b   : > { %v5301_v63 = vadd.f32 %v7234_v33, %v7226_v53  ;;  %v5295_v53 = vadd.f32 %v7209_v28, %v7207_v39  ;;  %v5292_v28 = vadd.f32 %v7205_v38, %v7203_v3 }
 0x46c   : > { %v7239_v42 = vpop.f32.mrf.mxu1 }
 0x46d   : > { %v1974_v3 = vadd.f32 %v5292_v28, %v7283_v16 }
 0x46e   : > { %v5303_v32 = vpop.f32.mrf.mxu1 }
 0x470   : > { %v5305_v45 = vpop.f32.mrf.mxu1 }
 0x472   : > { %v5306_v51 = vpop.f32.mrf.mxu1 }
 0x473   : > { %v5307_v17 = vadd.f32 %v5306_v51, %v5305_v45  ;;  %v5304_v51 = vadd.f32 %v5303_v32, %v7239_v42  ;;  %v5298_v42 = vadd.f32 %v7218_v31, %v7211_v61  ;;  %v1987_v32 = vadd.f32 %v5301_v63, %v7283_v16  ;;  %v7366_v63 = vld [vmem:[#allocation4 + $0x18] sm:$0xff] }
 0x474   : > { %v5308_v48 = vpop.f32.mrf.mxu1  ;;  %v1979_v61 = vadd.f32 %v5295_v53, %v7283_v16 }
 0x475   : > { %v1982_v31 = vadd.f32 %v5298_v42, %v7283_v16  ;;  %v7382_v42 = vld [vmem:[#allocation4 + $0x38] sm:$0xff] }
 0x476   : > { %v5309_v52 = vpop.f32.mrf.mxu1 }
 0x477   : > { %v5310_v13 = vadd.f32 %v5309_v52, %v5308_v48  ;;  %v1995_v48 = vadd.f32 %v5307_v17, %v7283_v16  ;;  %v3230_v38 = vpack.c.bf16 %v1982_v31, %v1979_v61  ;;  %v7397_v31 = vld [vmem:[#allocation4 + $0x28] sm:$0xff] }
 0x478   : > { %v5311_v57 = vpop.f32.mrf.mxu1 }
 0x479   : > { %v1998_v52 = vadd.f32 %v5310_v13, %v7283_v16 }
 0x47a   : > { %v7213_v62 = vpop.f32.mrf.mxu0  ;;  %v5312_v0 = vpop.f32.mrf.mxu1 }
 0x47b   : > { %2350 = vmax.xlane.f32.xlu0 %v7213_v62  ;;  %v5313_v34 = vadd.f32 %v5312_v0, %v5311_v57 }
 0x47c   : > { %v7216_v59 = vpop.f32.mrf.mxu0  ;;  %v5314_v2 = vpop.f32.mrf.mxu1 }
 0x47d   : > { %v2003_v27 = vadd.f32 %v5313_v34, %v7283_v16  ;;  %v1971_v34 = vadd.f32 %v7201_v29, %v7283_v16  ;;  %v1955_v29 = vadd.f32 %v7193_v22, %v7283_v16 }
 0x47e   : > { %v7220_v60 = vpop.f32.mrf.mxu0  ;;  %v5315_v6 = vpop.f32.mrf.mxu1 }
 0x47f   : > { %8603 = vst [vmem:[#allocation35_spill] sm:$0xff] %v7220_v60  ;;  %2346 = vmax.xlane.f32.xlu0 %v7216_v59  ;;  %v5316_v35 = vadd.f32 %v5315_v6, %v5314_v2  ;;  %v1990_v2 = vadd.f32 %v5304_v51, %v7283_v16  ;;  %v3232_v6 = vpack.c.bf16 %v1998_v52, %v1995_v48  ;;  %v7374_v52 = vld [vmem:[#allocation4 + $0x30] sm:$0xff] }
 0x480   : > { %v7223_v40 = vpop.f32.mrf.mxu0  ;;  %v5317_v46 = vpop.f32.mrf.mxu1 }
 0x481   : > { %2348 = vmax.xlane.f32.xlu1 %v7223_v40  ;;  %v2006_v4 = vadd.f32 %v5316_v35, %v7283_v16 }
 0x482   : > { %v7228_v30 = vpop.f32.mrf.mxu0  ;;  %v5318_v9 = vpop.f32.mrf.mxu1 }
 0x483   : > { %8604 = vst [vmem:[#allocation36_spill] sm:$0xff] %v7228_v30  ;;  %2352 = vmax.xlane.f32.xlu0 %v7220_v60  ;;  %v5319_v36 = vadd.f32 %v5318_v9, %v5317_v46  ;;  %v3233_v57 = vpack.c.bf16 %v2006_v4, %v2003_v27  ;;  %v3231_v9 = vpack.c.bf16 %v1990_v2, %v1987_v32  ;;  %v7357_v4 = vld [vmem:[#allocation4] sm:$0xff] }
 0x484   : > { %v7231_v56 = vpop.f32.mrf.mxu0  ;;  %v5320_v12 = vpop.f32.mrf.mxu1  ;;  %v7591_v60 = vld [vmem:[#allocation4 + $0xe0] sm:$0xff] }
 0x485   : > { %8605 = vst [vmem:[#allocation37_spill] sm:$0xff] %v7231_v56  ;;  %2358 = vmax.xlane.f32.xlu1 %v7228_v30  ;;  %v2011_v23 = vadd.f32 %v5319_v36, %v7283_v16  ;;  %v1963_v36 = vadd.f32 %v7197_v25, %v7283_v16  ;;  %v7352_v25 = vld [vmem:[#allocation4 + $0x10] sm:$0xff] }
 0x486   : > { %v7236_v41 = vpop.f32.mrf.mxu0  ;;  %v5321_v19 = vpop.f32.mrf.mxu1 }
 0x487   : > { %8606 = vst [vmem:[#allocation38_spill] sm:$0xff] %v7236_v41  ;;  %2360 = vmax.xlane.f32.xlu0 %v7236_v41  ;;  %v5322_v24 = vadd.f32 %v5321_v19, %v5320_v12 }
 0x488   : > { %v7241_v43 = vpop.f32.mrf.mxu0 }
 0x489   : > { %8607 = vst [vmem:[#allocation39_spill] sm:$0xff] %v7241_v43  ;;  %2354 = vmax.xlane.f32.xlu1 %v7231_v56  ;;  %v2014_v14 = vadd.f32 %v5322_v24, %v7283_v16  ;;  %v1966_v24 = vadd.f32 %v7199_v7, %v7283_v16 }
 0x48a   : > { %v7244_v44 = vpop.f32.mrf.mxu0 }
 0x48b   : > { %8608 = vst [vmem:[#allocation40_spill] sm:$0xff] %v7244_v44  ;;  %2356 = vmax.xlane.f32.xlu0 %v7241_v43  ;;  %v3234_v26 = vpack.c.bf16 %v2014_v14, %v2011_v23  ;;  %v3229_v23 = vpack.c.bf16 %v1974_v3, %v1971_v34  ;;  %v1958_v14 = vadd.f32 %v7195_v10, %v7283_v16  ;;  %v7361_v10 = vld [vmem:[#allocation4 + $0x8] sm:$0xff]  ;;  %v7405_v3 = vld [vmem:[#allocation4 + $0x50] sm:$0xff] }
 0x48c   : > { %v7247_v50 = vpop.f32.mrf.mxu0  ;;  %v3228_v17 = vpack.c.bf16 %v1966_v24, %v1963_v36  ;;  %v7413_v24 = vld [vmem:[#allocation4 + $0x58] sm:$0xff]  ;;  %v7573_v43 = vld [vmem:[#allocation4 + $0xf0] sm:$0xff] }
 0x48d   : > { %8609 = vst [vmem:[#allocation41_spill] sm:$0xff] %v7247_v50  ;;  %2366 = vmax.xlane.f32.xlu1 %v7244_v44  ;;  %5419 = vmatprep.subr.bf16.mxu1 %v3234_v26  ;;  %v3227_v13 = vpack.c.bf16 %v1958_v14, %v1955_v29  ;;  %v7421_v14 = vld [vmem:[#allocation4 + $0x40] sm:$0xff] }
 0x48e   : > { %v7250_v47 = vpop.f32.mrf.mxu0  ;;  %5420 = vmatpush3.bf16.msra.mxu1 %v3234_v26 }
 0x48f   : > { %8610 = vst [vmem:[#allocation42_spill] sm:$0xff] %v7250_v47  ;;  %2368 = vmax.xlane.f32.xlu0 %v7250_v47  ;;  %5421 = vmatprep.subr.bf16.mxu1 %v3233_v57  ;;  %v7541_v47 = vld [vmem:[#allocation4 + $0xd8] sm:$0xff] }
 0x490   : > { %v7253_v49 = vpop.f32.mrf.mxu0 }
 0x491   : > { %8611 = vst [vmem:[#allocation43_spill] sm:$0xff] %v7253_v49  ;;  %2362 = vmax.xlane.f32.xlu1 %v7247_v50  ;;  %v7551_v50 = vld [vmem:[#allocation4 + $0xc0] sm:$0xff] }
 0x492   : > { %v7256_v54 = vpop.f32.mrf.mxu0  ;;  %5422 = vmatpush3.bf16.msra.mxu1 %v3233_v57 }
 0x493   : > { %8612 = vst [vmem:[#allocation44_spill] sm:$0xff] %v7256_v54  ;;  %2364 = vmax.xlane.f32.xlu0 %v7253_v49  ;;  %5423 = vmatprep.subr.bf16.mxu1 %v3232_v6 }
 0x494   : > { %v7259_v55 = vpop.f32.mrf.mxu0 }
 0x495   : > { %8613 = vst [vmem:[#allocation45_spill] sm:$0xff] %v7259_v55  ;;  %2374 = vmax.xlane.f32.xlu1 %v7256_v54 }
 0x496   : > { %v7262_v1 = vpop.f32.mrf.mxu0  ;;  %5424 = vmatpush3.bf16.msra.mxu1 %v3232_v6  ;;  %v7390_v6 = vld [vmem:[#allocation4 + $0x20] sm:$0xff] }
 0x497   : > { %8614 = vst [vmem:[#allocation46_spill] sm:$0xff] %v7262_v1  ;;  %2376 = vmax.xlane.f32.xlu0 %v7262_v1  ;;  %5425 = vmatprep.subr.bf16.mxu1 %v3231_v9  ;;  %v7525_v1 = vld [vmem:[#allocation4 + $0xa8] sm:$0xff] }
 0x498   : > { %v7265_v5 = vpop.f32.mrf.mxu0 }
 0x499   : > { %8615 = vst [vmem:[#allocation47_spill] sm:$0xff] %v7265_v5  ;;  %2370 = vmax.xlane.f32.xlu1 %v7259_v55 }
 0x49a   : > { %v7268_v8 = vpop.f32.mrf.mxu0  ;;  %5426 = vmatpush3.bf16.msra.mxu1 %v3231_v9 }
 0x49b   : > { %8616 = vst [vmem:[#allocation48_spill] sm:$0xff] %v7268_v8  ;;  %2372 = vmax.xlane.f32.xlu0 %v7265_v5  ;;  %5427 = vmatprep.subr.bf16.mxu1 %v3230_v38  ;;  %v7533_v5 = vld [vmem:[#allocation4 + $0xd0] sm:$0xff] }
 0x49c   : > { %v7271_v58 = vpop.f32.mrf.mxu0 }
 0x49d   : > { %8617 = vst [vmem:[#allocation49_spill] sm:$0xff] %v7271_v58  ;;  %2382 = vmax.xlane.f32.xlu1 %v7268_v8 }
 0x49e   : > { %v7274_v11 = vpop.f32.mrf.mxu0  ;;  %5428 = vmatpush3.bf16.msra.mxu1 %v3230_v38 }
 0x49f   : > { %8618 = vst [vmem:[#allocation50_spill] sm:$0xff] %v7274_v11  ;;  %2384 = vmax.xlane.f32.xlu0 %v7274_v11  ;;  %5429 = vmatprep.subr.bf16.mxu1 %v3229_v23  ;;  %v7509_v11 = vld [vmem:[#allocation4 + $0xb8] sm:$0xff] }
 0x4a0   : > { %v7277_v15 = vpop.f32.mrf.mxu0 }
 0x4a1   : > { %8619 = vst [vmem:[#allocation51_spill] sm:$0xff] %v7277_v15  ;;  %2378 = vmax.xlane.f32.xlu1 %v7271_v58 }
 0x4a2   : > { %v7285_v20 = vpop.f32.mrf.mxu0  ;;  %5430 = vmatpush3.bf16.msra.mxu1 %v3229_v23 }
 0x4a3   : > { %8621 = vst [vmem:[#allocation52_spill] sm:$0xff] %v7285_v20  ;;  %2380 = vmax.xlane.f32.xlu0 %v7277_v15  ;;  %5431 = vmatprep.subr.bf16.mxu1 %v3228_v17  ;;  %v7517_v15 = vld [vmem:[#allocation4 + $0xa0] sm:$0xff] }
 0x4a4   : > { %v7288_v21 = vpop.f32.mrf.mxu0 }
 0x4a5   : > { %8622 = vst [vmem:[#allocation53_spill] sm:$0xff] %v7288_v21  ;;  %2390 = vmax.xlane.f32.xlu1 %v7285_v20 }
 0x4a6   : > { %v7293_v18 = vpop.f32.mrf.mxu0  ;;  %5432 = vmatpush3.bf16.msra.mxu1 %v3228_v17 }
 0x4a7   : > { %8623 = vst [vmem:[#allocation54_spill] sm:$0xff] %v7293_v18  ;;  %2392 = vmax.xlane.f32.xlu0 %v7293_v18  ;;  %5433 = vmatprep.subr.bf16.mxu1 %v3227_v13  ;;  %v7493_v18 = vld [vmem:[#allocation4 + $0x88] sm:$0xff] }
 0x4a8   : > { %v7298_v37 = vpop.f32.mrf.mxu0 }
 0x4a9   : > { %8624 = vst [vmem:[#allocation55_spill] sm:$0xff] %v7298_v37  ;;  %2386 = vmax.xlane.f32.xlu1 %v7288_v21 }
 0x4aa   : > { %v7303_v45 = vpop.f32.mrf.mxu0  ;;  %5434 = vmatpush3.bf16.msra.mxu1 %v3227_v13 }
 0x4ab   : > { %8625 = vst [vmem:[#allocation56_spill] sm:$0xff] %v7303_v45  ;;  %2388 = vmax.xlane.f32.xlu0 %v7298_v37  ;;  %v7501_v37 = vld [vmem:[#allocation4 + $0xb0] sm:$0xff] }
 0x4ac   : > { %v7309_v0 = vpop.f32.mrf.mxu0 }
 0x4ad   : > { %8626 = vst [vmem:[#allocation57_spill] sm:$0xff] %v7309_v0  ;;  %2398 = vmax.xlane.f32.xlu1 %v7303_v45 }
 0x4ae   : > { %v7314_v33 = vpop.f32.mrf.mxu0 }
 0x4af   : > { %8627 = vst [vmem:[#allocation58_spill] sm:$0xff] %v7314_v33  ;;  %2400 = vmax.xlane.f32.xlu0 %v7314_v33  ;;  %v7477_v33 = vld [vmem:[#allocation4 + $0x98] sm:$0xff] }
 0x4b0   : > { %v7321_v46 = vpop.f32.mrf.mxu0 }
 0x4b1   : > { %8628 = vst [vmem:[#allocation59_spill] sm:$0xff] %v7321_v46  ;;  %2394 = vmax.xlane.f32.xlu1 %v7309_v0 }
 0x4b2   : > { %v7324_v39 = vpop.f32.mrf.mxu0 }
 0x4b3   : > { %8629 = vst [vmem:[#allocation60_spill] sm:$0xff] %v7324_v39  ;;  %2396 = vmax.xlane.f32.xlu0 %v7321_v46  ;;  %v7485_v46 = vld [vmem:[#allocation4 + $0x80] sm:$0xff] }
 0x4b4   : > { %v7331_v12 = vpop.f32.mrf.mxu0 }
 0x4b5   : > { %8630 = vst [vmem:[#allocation61_spill] sm:$0xff] %v7331_v12  ;;  %2406 = vmax.xlane.f32.xlu1 %v7324_v39 }
 0x4b6   : > { %v7334_v19 = vpop.f32.mrf.mxu0 }
 0x4b7   : > { %8631 = vst [vmem:[#allocation62_spill] sm:$0xff] %v7334_v19  ;;  %2408 = vmax.xlane.f32.xlu0 %v7334_v19  ;;  %v7461_v19 = vld [vmem:[#allocation4 + $0x68] sm:$0xff] }
 0x4b8   : > { %v7341_v35 = vpop.f32.mrf.mxu0 }
 0x4b9   : > { %2402 = vmax.xlane.f32.xlu1 %v7331_v12  ;;  %8632 = vst [vmem:[#allocation63_spill] sm:$0xff] %v7341_v35 }
 0x4bb   : > { %2404 = vmax.xlane.f32.xlu0 %v7341_v35  ;;  %v7469_v35 = vld [vmem:[#allocation4 + $0x90] sm:$0xff] }
 0x504   : > { %v2351_v7 = vpop.xlane.xlu0 %2350 }
 0x505   : > { %v7355_v27 = vmax.f32 %v7352_v25, %v2351_v7  ;;  %v7429_v7 = vld [vmem:[#allocation4 + $0x48] sm:$0xff] }
 0x507   : > { %3462 = vst.msk [vmem:[#allocation4 + $0x10] sm:$0xff] %vm2954_vm1, %v7355_v27 }
 0x508   : > { %v2347_v22 = vpop.xlane.xlu0 %2346 }
 0x509   : > { %v7364_v16 = vmax.f32 %v7357_v4, %v2347_v22 }
 0x50a   : > { %v2349_v26 = vpop.xlane.xlu1 %2348 }
 0x50b   : > { %3460 = vst.msk [vmem:[#allocation4] sm:$0xff] %vm2954_vm1, %v7364_v16  ;;  %v7371_v51 = vmax.f32 %v7361_v10, %v2349_v26  ;;  %2540 = vperm.xlu1 %5677, %v7364_v16  }
 0x50c   : > { %v2353_v48 = vpop.xlane.xlu0 %2352 }
 0x50d   : > { %3461 = vst.msk [vmem:[#allocation4 + $0x8] sm:$0xff] %vm2954_vm1, %v7371_v51  ;;  %v7379_v57 = vmax.f32 %v7366_v63, %v2353_v48  ;;  %2545 = vperm.xlu0 %5676, %v7371_v51   ;;  %v7437_v48 = vld [vmem:[#allocation4 + $0x70] sm:$0xff] }
 0x50e   : > { %v2359_v53 = vpop.xlane.xlu1 %2358 }
 0x50f   : > { %3463 = vst.msk [vmem:[#allocation4 + $0x18] sm:$0xff] %vm2954_vm1, %v7379_v57  ;;  %v7387_v32 = vmax.f32 %v7374_v52, %v2359_v53  ;;  %2550 = vperm.xlu1 %5677, %v7355_v27  }
 0x510   : > { %v2361_v2 = vpop.xlane.xlu0 %2360 }
 0x511   : > { %3466 = vst.msk [vmem:[#allocation4 + $0x30] sm:$0xff] %vm2954_vm1, %v7387_v32  ;;  %v7395_v28 = vmax.f32 %v7382_v42, %v2361_v2 }
 0x512   : > { %v2355_v61 = vpop.xlane.xlu1 %2354 }
 0x513   : > { %3467 = vst.msk [vmem:[#allocation4 + $0x38] sm:$0xff] %vm2954_vm1, %v7395_v28  ;;  %v7402_v9 = vmax.f32 %v7390_v6, %v2355_v61  ;;  %2555 = vperm.xlu1 %5677, %v7379_v57   ;;  %v7445_v61 = vld [vmem:[#allocation4 + $0x78] sm:$0xff] }
 0x514   : > { %v2357_v34 = vpop.xlane.xlu0 %2356 }
 0x515   : > { %3464 = vst.msk [vmem:[#allocation4 + $0x20] sm:$0xff] %vm2954_vm1, %v7402_v9  ;;  %v7410_v38 = vmax.f32 %v7397_v31, %v2357_v34  ;;  %2560 = vperm.xlu0 %5676, %v7402_v9   ;;  %v2446_v30 = vsub.f32 %v7390_v6, %v7402_v9  ;;  %v2448_v9 = vsub.f32 %v7374_v52, %v7387_v32 }
 0x516   : > { %v2367_v36 = vpop.xlane.xlu1 %2366  ;;  %v2445_v52 = vsub.f32 %v7366_v63, %v7379_v57 }
 0x517   : > { %3465 = vst.msk [vmem:[#allocation4 + $0x28] sm:$0xff] %vm2954_vm1, %v7410_v38  ;;  %v7418_v23 = vmax.f32 %v7405_v3, %v2367_v36  ;;  %2565 = vperm.xlu1 %5677, %v7410_v38  }
 0x518   : > { %v2369_v29 = vpop.xlane.xlu0 %2368 }
 0x519   : > { %3470 = vst.msk [vmem:[#allocation4 + $0x50] sm:$0xff] %vm2954_vm1, %v7418_v23  ;;  %v7426_v17 = vmax.f32 %v7413_v24, %v2369_v29  ;;  %2570 = vperm.xlu0 %5676, %v7387_v32   ;;  %v7453_v29 = vld [vmem:[#allocation4 + $0x60] sm:$0xff] }
 0x51a   : > { %v2363_v13 = vpop.xlane.xlu1 %2362 }
 0x51b   : > { %3471 = vst.msk [vmem:[#allocation4 + $0x58] sm:$0xff] %vm2954_vm1, %v7426_v17  ;;  %v7434_v22 = vmax.f32 %v7421_v14, %v2363_v13  ;;  %2575 = vperm.xlu1 %5677, %v7395_v28  }
 0x51c   : > { %v2365_v26 = vpop.xlane.xlu0 %2364 }
 0x51d   : > { %3468 = vst.msk [vmem:[#allocation4 + $0x40] sm:$0xff] %vm2954_vm1, %v7434_v22  ;;  %v7442_v53 = vmax.f32 %v7429_v7, %v2365_v26  ;;  %2580 = vperm.xlu0 %5676, %v7434_v22  }
 0x51e   : > { %v2375_v2 = vpop.xlane.xlu1 %2374 }
 0x51f   : > { %3469 = vst.msk [vmem:[#allocation4 + $0x48] sm:$0xff] %vm2954_vm1, %v7442_v53  ;;  %v7450_v34 = vmax.f32 %v7437_v48, %v2375_v2  ;;  %2585 = vperm.xlu1 %5677, %v7442_v53  }
 0x520   : > { %v2377_v36 = vpop.xlane.xlu0 %2376 }
 0x521   : > { %3474 = vst.msk [vmem:[#allocation4 + $0x70] sm:$0xff] %vm2954_vm1, %v7450_v34  ;;  %v7458_v13 = vmax.f32 %v7445_v61, %v2377_v36  ;;  %2590 = vperm.xlu0 %5676, %v7418_v23  }
 0x522   : > { %v2371_v26 = vpop.xlane.xlu1 %2370 }
 0x523   : > { %3475 = vst.msk [vmem:[#allocation4 + $0x78] sm:$0xff] %vm2954_vm1, %v7458_v13  ;;  %v7466_v2 = vmax.f32 %v7453_v29, %v2371_v26  ;;  %2595 = vperm.xlu1 %5677, %v7426_v17  }
 0x524   : > { %v2373_v39 = vpop.xlane.xlu0 %2372 }
 0x525   : > { %3472 = vst.msk [vmem:[#allocation4 + $0x60] sm:$0xff] %vm2954_vm1, %v7466_v2  ;;  %v7474_v36 = vmax.f32 %v7461_v19, %v2373_v39  ;;  %2600 = vperm.xlu0 %5676, %v7466_v2  }
 0x526   : > { %v2383_v12 = vpop.xlane.xlu1 %2382 }
 0x527   : > { %3473 = vst.msk [vmem:[#allocation4 + $0x68] sm:$0xff] %vm2954_vm1, %v7474_v36  ;;  %v7482_v26 = vmax.f32 %v7469_v35, %v2383_v12  ;;  %2605 = vperm.xlu1 %5677, %v7474_v36  }
 0x528   : > { %v2385_v45 = vpop.xlane.xlu0 %2384 }
 0x529   : > { %3478 = vst.msk [vmem:[#allocation4 + $0x90] sm:$0xff] %vm2954_vm1, %v7482_v26  ;;  %v7490_v39 = vmax.f32 %v7477_v33, %v2385_v45  ;;  %2610 = vperm.xlu0 %5676, %v7450_v34  }
 0x52a   : > { %v2379_v0 = vpop.xlane.xlu1 %2378 }
 0x52b   : > { %3479 = vst.msk [vmem:[#allocation4 + $0x98] sm:$0xff] %vm2954_vm1, %v7490_v39  ;;  %v7498_v12 = vmax.f32 %v7485_v46, %v2379_v0  ;;  %2615 = vperm.xlu1 %5677, %v7458_v13  }
 0x52c   : > { %v2381_v20 = vpop.xlane.xlu0 %2380 }
 0x52d   : > { %3476 = vst.msk [vmem:[#allocation4 + $0x80] sm:$0xff] %vm2954_vm1, %v7498_v12  ;;  %v7506_v45 = vmax.f32 %v7493_v18, %v2381_v20  ;;  %2620 = vperm.xlu0 %5676, %v7498_v12  }
 0x52e   : > { %v2391_v21 = vpop.xlane.xlu1 %2390 }
 0x52f   : > { %3477 = vst.msk [vmem:[#allocation4 + $0x88] sm:$0xff] %vm2954_vm1, %v7506_v45  ;;  %v7514_v0 = vmax.f32 %v7501_v37, %v2391_v21  ;;  %2625 = vperm.xlu1 %5677, %v7506_v45  }
 0x530   : > { %v2393_v8 = vpop.xlane.xlu0 %2392 }
 0x531   : > { %3482 = vst.msk [vmem:[#allocation4 + $0xb0] sm:$0xff] %vm2954_vm1, %v7514_v0  ;;  %v7522_v20 = vmax.f32 %v7509_v11, %v2393_v8  ;;  %2630 = vperm.xlu0 %5676, %v7482_v26  }
 0x532   : > { %v2387_v58 = vpop.xlane.xlu1 %2386 }
 0x533   : > { %3483 = vst.msk [vmem:[#allocation4 + $0xb8] sm:$0xff] %vm2954_vm1, %v7522_v20  ;;  %v7530_v21 = vmax.f32 %v7517_v15, %v2387_v58  ;;  %2635 = vperm.xlu1 %5677, %v7490_v39   ;;  %v2443_v58 = vsub.f32 %v7361_v10, %v7371_v51  ;;  %v7561_v51 = vld [vmem:[#allocation4 + $0xc8] sm:$0xff] }
 0x534   : > { %v2389_v54 = vpop.xlane.xlu0 %2388 }
 0x535   : > { %3480 = vst.msk [vmem:[#allocation4 + $0xa0] sm:$0xff] %vm2954_vm1, %v7530_v21  ;;  %v7538_v8 = vmax.f32 %v7525_v1, %v2389_v54  ;;  %2640 = vperm.xlu0 %5676, %v7530_v21   ;;  %v2442_v54 = vsub.f32 %v7357_v4, %v7364_v16 }
 0x536   : > { %v2399_v55 = vpop.xlane.xlu1 %2398 }
 0x537   : > { %3481 = vst.msk [vmem:[#allocation4 + $0xa8] sm:$0xff] %vm2954_vm1, %v7538_v8  ;;  %v7548_v44 = vmax.f32 %v7533_v5, %v2399_v55  ;;  %2645 = vperm.xlu1 %5677, %v7538_v8   ;;  %v2476_v55 = vmul.f32 1.442695, %v2443_v58  ;;  %v2474_v56 = vmul.f32 1.442695, %v2442_v54 }
 0x538   : > { %v2401_v49 = vpop.xlane.xlu0 %2400 }
 0x539   : > { %3486 = vst.msk [vmem:[#allocation4 + $0xd0] sm:$0xff] %vm2954_vm1, %v7548_v44  ;;  %v7558_v41 = vmax.f32 %v7541_v47, %v2401_v49  ;;  %2650 = vperm.xlu0 %5676, %v7514_v0   ;;  %v2444_v49 = vsub.f32 %v7352_v25, %v7355_v27  ;;  %5734 = vpow2.f32 %v2476_v55  ;;  %v2482_v25 = vmul.f32 1.442695, %v2446_v30 }
 0x53a   : > { %v2395_v10 = vpop.xlane.xlu1 %2394  ;;  %5736 = vpow2.f32 %v2474_v56  ;;  %v2486_v55 = vmul.f32 1.442695, %v2448_v9  ;;  %v2450_v56 = vsub.f32 %v7421_v14, %v7434_v22  ;;  %v2480_v9 = vmul.f32 1.442695, %v2445_v52 }
 0x53b   : > { %3487 = vst.msk [vmem:[#allocation4 + $0xd8] sm:$0xff] %vm2954_vm1, %v7558_v41  ;;  %v7568_v4 = vmax.f32 %v7551_v50, %v2395_v10  ;;  %2655 = vperm.xlu1 %5677, %v7522_v20   ;;  %v7583_v10 = vld [vmem:[#allocation4 + $0xf8] sm:$0xff]  ;;  %v2478_v54 = vmul.f32 1.442695, %v2444_v49  ;;  %5738 = vpow2.f32 %v2482_v25  ;;  %v2447_v25 = vsub.f32 %v7397_v31, %v7410_v38 }
 0x53c   : > { %v2397_v16 = vpop.xlane.xlu0 %2396  ;;  %v2452_v22 = vsub.f32 %v7405_v3, %v7418_v23  ;;  %v2449_v31 = vsub.f32 %v7382_v42, %v7395_v28  ;;  %v2454_v52 = vsub.f32 %v7453_v29, %v7466_v2  ;;  %v2456_v28 = vsub.f32 %v7437_v48, %v7450_v34 }
 0x53d   : > { %3484 = vst.msk [vmem:[#allocation4 + $0xc0] sm:$0xff] %vm2954_vm1, %v7568_v4  ;;  %v7578_v6 = vmax.f32 %v7561_v51, %v2397_v16  ;;  %2660 = vperm.xlu0 %5676, %v7568_v4   ;;  %5740 = vpow2.f32 %v2478_v54  ;;  %v2484_v38 = vmul.f32 1.442695, %v2447_v25  ;;  %v2453_v2 = vsub.f32 %v7413_v24, %v7426_v17 }
 0x53e   : > { %v2407_v58 = vpop.xlane.xlu1 %2406  ;;  %5742 = vpow2.f32 %v2486_v55  ;;  %v2494_v54 = vmul.f32 1.442695, %v2452_v22  ;;  %v2488_v23 = vmul.f32 1.442695, %v2449_v31  ;;  %v2451_v55 = vsub.f32 %v7429_v7, %v7442_v53 }
 0x53f   : > { %3485 = vst.msk [vmem:[#allocation4 + $0xc8] sm:$0xff] %vm2954_vm1, %v7578_v6  ;;  %v7588_v27 = vmax.f32 %v7573_v43, %v2407_v58  ;;  %2665 = vperm.xlu1 %5677, %v7578_v6   ;;  %v7603_v58 = vld [vmem:[#allocation4 + $0xe8] sm:$0xff]  ;;  %5744 = vpow2.f32 %v2480_v9  ;;  %v2502_v53 = vmul.f32 1.442695, %v2456_v28  ;;  %v2458_v9 = vsub.f32 %v7485_v46, %v7498_v12 }
 0x540   : > { %v2409_v16 = vpop.xlane.xlu0 %2408  ;;  %v2496_v34 = vmul.f32 1.442695, %v2453_v2  ;;  %v2455_v25 = vsub.f32 %v7461_v19, %v7474_v36  ;;  %v2460_v17 = vsub.f32 %v7469_v35, %v7482_v26  ;;  %v2457_v12 = vsub.f32 %v7445_v61, %v7458_v13 }
 0x541   : > { %v2472_v32 = vsub.f32 %v7573_v43, %v7588_v27  ;;  %3490 = vst.msk [vmem:[#allocation4 + $0xf0] sm:$0xff] %vm2954_vm1, %v7588_v27  ;;  %v7600_v30 = vmax.f32 %v7583_v10, %v2409_v16  ;;  %2670 = vperm.xlu0 %5676, %v7548_v44   ;;  %v2506_v22 = vmul.f32 1.442695, %v2458_v9  ;;  %v2462_v31 = vsub.f32 %v7517_v15, %v7530_v21 }
 0x542   : > { %v2403_v49 = vpop.xlane.xlu1 %2402  ;;  %v2510_v36 = vmul.f32 1.442695, %v2460_v17  ;;  %v2504_v26 = vmul.f32 1.442695, %v2457_v12  ;;  %v2464_v13 = vsub.f32 %v7501_v37, %v7514_v0  ;;  %v2461_v21 = vsub.f32 %v7477_v33, %v7490_v39 }
 0x543   : > { %v2473_v63 = vsub.f32 %v7583_v10, %v7600_v30  ;;  %3491 = vst.msk [vmem:[#allocation4 + $0xf8] sm:$0xff] %vm2954_vm1, %v7600_v30  ;;  %v7612_v57 = vmax.f32 %v7591_v60, %v2403_v49  ;;  %2675 = vperm.xlu1 %5677, %v7558_v41   ;;  %v2490_v49 = vmul.f32 1.442695, %v2450_v56  ;;  %v2498_v56 = vmul.f32 1.442695, %v2454_v52 }
 0x544   : > { %v2405_v16 = vpop.xlane.xlu0 %2404  ;;  %v2512_v0 = vmul.f32 1.442695, %v2461_v21  ;;  %v2466_v28 = vsub.f32 %v7551_v50, %v7568_v4 }
 0x545   : > { %3488 = vst.msk [vmem:[#allocation4 + $0xe0] sm:$0xff] %vm2954_vm1, %v7612_v57  ;;  %v7620_v14 = vmax.f32 %v7603_v58, %v2405_v16  ;;  %2680 = vperm.xlu0 %5676, %v7612_v57   ;;  %5746 = vpow2.f32 %v2490_v49  ;;  %v2492_v16 = vmul.f32 1.442695, %v2451_v55  ;;  %v2500_v49 = vmul.f32 1.442695, %v2455_v25 }
 0x546   : > { %v7634_v3 = vpop.eup %5734  ;;  %5748 = vpow2.f32 %v2484_v38  ;;  %v2459_v38 = vsub.f32 %v7493_v18, %v7506_v45  ;;  %v2518_v45 = vmul.f32 1.442695, %v2464_v13  ;;  %v2465_v55 = vsub.f32 %v7509_v11, %v7522_v20 }
 0x547   : > { %3489 = vst.msk [vmem:[#allocation4 + $0xe8] sm:$0xff] %vm2954_vm1, %v7620_v14  ;;  %2685 = vperm.xlu1 %5677, %v7620_v14   ;;  %v7639_v42 = vpop.eup %5736  ;;  %5750 = vpow2.f32 %v2494_v54  ;;  %v2514_v54 = vmul.f32 1.442695, %v2462_v31  ;;  %v2522_v20 = vmul.f32 1.442695, %v2466_v28  ;;  %v2470_v2 = vsub.f32 %v7591_v60, %v7612_v57 }
 0x548   : > { %v7644_v29 = vpop.eup %5738  ;;  %5752 = vpow2.f32 %v2488_v23  ;;  %v2508_v52 = vmul.f32 1.442695, %v2459_v38  ;;  %v2468_v23 = vsub.f32 %v7533_v5, %v7548_v44  ;;  %v2520_v5 = vmul.f32 1.442695, %v2465_v55  ;;  %v8633_v55 = vld [vmem:[#allocation35_spill] sm:$0xff] }
 0x549   : > { %2690 = vperm.xlu0 %5676, %v7588_v27   ;;  %5754 = vpow2.f32 %v2498_v56  ;;  %v2463_v56 = vsub.f32 %v7525_v1, %v7538_v8  ;;  %v2530_v8 = vmul.f32 1.442695, %v2470_v2  ;;  %v2467_v57 = vsub.f32 %v7561_v51, %v7578_v6  ;;  %v8635_v2 = vld [vmem:[#allocation39_spill] sm:$0xff] }
 0x54a   : > { %v7649_v7 = vpop.eup %5740  ;;  %5756 = vpow2.f32 %v2492_v16  ;;  %v2526_v39 = vmul.f32 1.442695, %v2468_v23  ;;  %v2469_v16 = vsub.f32 %v7541_v47, %v7558_v41 }
 0x54b   : > { %2695 = vperm.xlu1 %5677, %v7600_v30   ;;  %v7654_v48 = vpop.eup %5742  ;;  %5758 = vpow2.f32 %v2502_v53  ;;  %v2516_v4 = vmul.f32 1.442695, %v2463_v56  ;;  %v2524_v47 = vmul.f32 1.442695, %v2467_v57 }
 0x54c   : > { %v7659_v24 = vpop.eup %5744  ;;  %5760 = vpow2.f32 %v2496_v34  ;;  %v2528_v60 = vmul.f32 1.442695, %v2469_v16  ;;  %v2471_v34 = vsub.f32 %v7603_v58, %v7620_v14 }
 0x54d   : > { %3026 = vperm.xlu0 %5676, %v7634_v3   ;;  %5762 = vpow2.f32 %v2506_v22 }
 0x54e   : > { %5764 = vpow2.f32 %v2500_v49  ;;  %v2532_v6 = vmul.f32 1.442695, %v2471_v34  ;;  %v8637_v34 = vld [vmem:[#allocation38_spill] sm:$0xff] }
 0x54f   : > { %3021 = vperm.xlu1 %5677, %v7639_v42   ;;  %5766 = vpow2.f32 %v2510_v36 }
 0x550   : > { %5768 = vpow2.f32 %v2504_v26 }
 0x551   : > { %3041 = vperm.xlu0 %5676, %v7644_v29   ;;  %5770 = vpow2.f32 %v2514_v54 }
 0x552   : > { %v7664_v46 = vpop.eup %5746  ;;  %5772 = vpow2.f32 %v2508_v52 }
 0x553   : > { %3031 = vperm.xlu1 %5677, %v7649_v7   ;;  %v7669_v19 = vpop.eup %5748  ;;  %5774 = vpow2.f32 %v2518_v45 }
 0x554   : > { %v7674_v35 = vpop.eup %5750  ;;  %5776 = vpow2.f32 %v2512_v0 }
 0x555   : > { %3051 = vperm.xlu0 %5676, %v7654_v48   ;;  %v7679_v61 = vpop.eup %5752  ;;  %5778 = vpow2.f32 %v2526_v39 }
 0x556   : > { %v7684_v15 = vpop.eup %5754  ;;  %5780 = vpow2.f32 %v2520_v5  ;;  %v8634_v5 = vld [vmem:[#allocation37_spill] sm:$0xff] }
 0x557   : > { %3036 = vperm.xlu1 %5677, %v7659_v24   ;;  %v7689_v18 = vpop.eup %5756  ;;  %5782 = vpow2.f32 %v2522_v20 }
 0x558   : > { %v7694_v37 = vpop.eup %5758  ;;  %5784 = vpow2.f32 %v2516_v4 }
 0x559   : > { %3061 = vperm.xlu0 %5676, %v7664_v46   ;;  %v7699_v33 = vpop.eup %5760  ;;  %5786 = vpow2.f32 %v2530_v8  ;;  %v8636_v8 = vld [vmem:[#allocation36_spill] sm:$0xff] }
 0x55a   : > { %v7704_v44 = vpop.eup %5762  ;;  %5788 = vpow2.f32 %v2528_v60 }
 0x55b   : > { %3046 = vperm.xlu1 %5677, %v7669_v19   ;;  %v7709_v11 = vpop.eup %5764  ;;  %5790 = vpow2.f32 %v2524_v47 }
 0x55c   : > { %v7714_v50 = vpop.eup %5766  ;;  %5792 = vpow2.f32 %v2532_v6 }
 0x55d   : > { %3071 = vperm.xlu0 %5676, %v7674_v35   ;;  %v7719_v1 = vpop.eup %5768 }
 0x55e   : > { %v7722_v53 = vpop.eup %5770 }
 0x55f   : > { %3056 = vperm.xlu1 %5677, %v7679_v61   ;;  %v7727_v9 = vpop.eup %5772 }
 0x560   : > { %v7730_v41 = vpop.eup %5774 }
 0x561   : > { %3081 = vperm.xlu0 %5676, %v7684_v15   ;;  %v7735_v25 = vpop.eup %5776 }
 0x562   : > { %v7738_v51 = vpop.eup %5778 }
 0x563   : > { %3066 = vperm.xlu1 %5677, %v7689_v18   ;;  %v7741_v17 = vpop.eup %5780 }
 0x564   : > { %v7744_v22 = vpop.eup %5782 }
 0x565   : > { %3091 = vperm.xlu0 %5676, %v7694_v37   ;;  %v7747_v58 = vpop.eup %5784 }
 0x566   : > { %v7750_v14 = vpop.eup %5786 }
 0x567   : > { %3076 = vperm.xlu1 %5677, %v7699_v33   ;;  %v7753_v12 = vpop.eup %5788 }
 0x568   : > { %v7756_v49 = vpop.eup %5790 }
 0x569   : > { %3101 = vperm.xlu0 %5676, %v7704_v44   ;;  %v7761_v54 = vpop.eup %5792 }
 0x56b   : > { %3086 = vperm.xlu1 %5677, %v7709_v11  }
 0x56d   : > { %3111 = vperm.xlu0 %5676, %v7714_v50  }
 0x56f   : > { %3096 = vperm.xlu1 %5677, %v7719_v1  }
 0x571   : > { %3121 = vperm.xlu0 %5676, %v7722_v53  }
 0x573   : > { %3106 = vperm.xlu1 %5677, %v7727_v9  }
 0x575   : > { %3131 = vperm.xlu0 %5676, %v7730_v41  }
 0x577   : > { %3116 = vperm.xlu1 %5677, %v7735_v25  }
 0x579   : > { %3151 = vperm.xlu0 %5676, %v7738_v51  }
 0x57b   : > { %3136 = vperm.xlu1 %5677, %v7741_v17  }
 0x57d   : > { %3141 = vperm.xlu0 %5676, %v7744_v22  }
 0x57f   : > { %3126 = vperm.xlu1 %5677, %v7747_v58  }
 0x581   : > { %3161 = vperm.xlu0 %5676, %v7750_v14  }
 0x583   : > { %3156 = vperm.xlu1 %5677, %v7753_v12  }
 0x586   : > { %v2541_v36 = vpop.permute.xlu1 %2540 }
 0x587   : > { %v2698_v31 = vsub.f32 %v7216_v59, %v2541_v36  ;;  %3146 = vperm.xlu1 %5677, %v7756_v49  }
 0x588   : > { %v2546_v26 = vpop.permute.xlu0 %2545 }
 0x589   : > { %v2730_v38 = vmul.f32 1.442695, %v2698_v31  ;;  %v2699_v13 = vsub.f32 %v7223_v40, %v2546_v26 }
 0x58a   : > { %v2551_v21 = vpop.permute.xlu1 %2550 }
 0x58b   : > { %v2732_v52 = vmul.f32 1.442695, %v2699_v13  ;;  %v2700_v45 = vsub.f32 %v7213_v62, %v2551_v21  ;;  %3166 = vperm.xlu1 %5677, %v7761_v54   ;;  %5794 = vpow2.f32 %v2730_v38  ;;  %v8638_v38 = vld [vmem:[#allocation41_spill] sm:$0xff] }
 0x58d   : > { %5796 = vpow2.f32 %v2732_v52  ;;  %v2734_v23 = vmul.f32 1.442695, %v2700_v45 }
 0x58e   : > { %v2556_v0 = vpop.permute.xlu1 %2555 }
 0x58f   : > { %v2701_v59 = vsub.f32 %v8633_v55, %v2556_v0  ;;  %5798 = vpow2.f32 %v2734_v23  ;;  %v8639_v23 = vld [vmem:[#allocation43_spill] sm:$0xff] }
 0x590   : > { %v2561_v39 = vpop.permute.xlu0 %2560 }
 0x591   : > { %v2736_v28 = vmul.f32 1.442695, %v2701_v59  ;;  %v2702_v56 = vsub.f32 %v8634_v5, %v2561_v39 }
 0x592   : > { %v2566_v40 = vpop.permute.xlu1 %2565 }
 0x593   : > { %5800 = vpow2.f32 %v2736_v28  ;;  %v2738_v20 = vmul.f32 1.442695, %v2702_v56  ;;  %v2703_v4 = vsub.f32 %v8635_v2, %v2566_v40  ;;  %v8640_v28 = vld [vmem:[#allocation40_spill] sm:$0xff]  ;;  %v8641_v2 = vld [vmem:[#allocation42_spill] sm:$0xff] }
 0x594   : > { %v2571_v16 = vpop.permute.xlu0 %2570 }
 0x595   : > { %v2740_v62 = vmul.f32 1.442695, %v2703_v4  ;;  %v2704_v60 = vsub.f32 %v8636_v8, %v2571_v16  ;;  %5802 = vpow2.f32 %v2738_v20 }
 0x596   : > { %v2576_v57 = vpop.permute.xlu1 %2575 }
 0x597   : > { %5804 = vpow2.f32 %v2740_v62  ;;  %v2742_v47 = vmul.f32 1.442695, %v2704_v60  ;;  %v2705_v6 = vsub.f32 %v8637_v34, %v2576_v57  ;;  %v8642_v60 = vld [vmem:[#allocation45_spill] sm:$0xff] }
 0x598   : > { %v2581_v36 = vpop.permute.xlu0 %2580  ;;  %v5795_v31 = vpop.eup %5794 }
 0x599   : > { %v2744_v26 = vmul.f32 1.442695, %v2705_v6  ;;  %v2706_v13 = vsub.f32 %v8638_v38, %v2581_v36  ;;  %5806 = vpow2.f32 %v2742_v47 }
 0x59a   : > { %v7771_v21 = vpop.eup %5796  ;;  %v2586_v52 = vpop.permute.xlu1 %2585 }
 0x59b   : > { %5808 = vpow2.f32 %v2744_v26  ;;  %v2746_v45 = vmul.f32 1.442695, %v2706_v13  ;;  %v2707_v0 = vsub.f32 %v8639_v23, %v2586_v52  ;;  %v3211_v55 = vpack.c.bf16 %v7771_v21, %v5795_v31  ;;  %v8643_v26 = vld [vmem:[#allocation47_spill] sm:$0xff]  ;;  %v8644_v23 = vld [vmem:[#allocation44_spill] sm:$0xff] }
 0x59c   : > { %v2591_v59 = vpop.permute.xlu0 %2590  ;;  %v5799_v40 = vpop.eup %5798 }
 0x59d   : > { %v2748_v39 = vmul.f32 1.442695, %v2707_v0  ;;  %v2708_v5 = vsub.f32 %v8640_v28, %v2591_v59  ;;  %5435 = vmatprep.mubr.bf16.mxu1 %v3211_v55  ;;  %5810 = vpow2.f32 %v2746_v45 }
 0x59e   : > { %v2596_v56 = vpop.permute.xlu1 %2595 }
 0x59f   : > { %5812 = vpow2.f32 %v2748_v39  ;;  %v2750_v20 = vmul.f32 1.442695, %v2708_v5  ;;  %v2709_v4 = vsub.f32 %v8641_v2, %v2596_v56  ;;  %v8645_v5 = vld [vmem:[#allocation46_spill] sm:$0xff] }
 0x5a0   : > { %v5801_v16 = vpop.eup %5800  ;;  %2862 = vadd.xlane.f32.xlu0 %v5799_v40  ;;  %v2601_v62 = vpop.permute.xlu0 %2600 }
 0x5a1   : > { %v2752_v8 = vmul.f32 1.442695, %v2709_v4  ;;  %v2710_v57 = vsub.f32 %v8642_v60, %v2601_v62  ;;  %v3212_v47 = vpack.c.bf16 %v5801_v16, %v5799_v40  ;;  %5814 = vpow2.f32 %v2750_v20  ;;  %v8646_v4 = vld [vmem:[#allocation49_spill] sm:$0xff] }
 0x5a2   : > { %v2606_v34 = vpop.permute.xlu1 %2605  ;;  %v7778_v6 = vpop.eup %5802 }
 0x5a3   : > { %5816 = vpow2.f32 %v2752_v8  ;;  %v2754_v36 = vmul.f32 1.442695, %v2710_v57  ;;  %v2711_v38 = vsub.f32 %v8643_v26, %v2606_v34  ;;  %5436 = vmatmul.mubr.bf16.vlgmr.msra.gmra.mxu1 %v3212_v47  ;;  %v8647_v47 = vld [vmem:[#allocation51_spill] sm:$0xff] }
 0x5a4   : > { %v5805_v13 = vpop.eup %5804  ;;  %2858 = vadd.xlane.f32.xlu0 %v5795_v31  ;;  %v2611_v52 = vpop.permute.xlu0 %2610 }
 0x5a5   : > { %v2756_v45 = vmul.f32 1.442695, %v2711_v38  ;;  %v2712_v0 = vsub.f32 %v8644_v23, %v2611_v52  ;;  %v3213_v55 = vpack.c.bf16 %v5805_v13, %v7778_v6  ;;  %5818 = vpow2.f32 %v2754_v36  ;;  %v8648_v52 = vld [vmem:[#allocation48_spill] sm:$0xff] }
 0x5a6   : > { %v2616_v59 = vpop.permute.xlu1 %2615  ;;  %v5807_v39 = vpop.eup %5806 }
 0x5a7   : > { %5820 = vpow2.f32 %v2756_v45  ;;  %v2758_v28 = vmul.f32 1.442695, %v2712_v0  ;;  %v2713_v56 = vsub.f32 %v8645_v5, %v2616_v59  ;;  %5439 = vmatprep.mubr.bf16.mxu1 %v3213_v55  ;;  %v8649_v59 = vld [vmem:[#allocation50_spill] sm:$0xff] }
 0x5a8   : > { %v5809_v40 = vpop.eup %5808  ;;  %2864 = vadd.xlane.f32.xlu0 %v5801_v16  ;;  %v2621_v20 = vpop.permute.xlu0 %2620 }
 0x5a9   : > { %v2760_v2 = vmul.f32 1.442695, %v2713_v56  ;;  %v2714_v31 = vsub.f32 %v8646_v4, %v2621_v20  ;;  %v3214_v62 = vpack.c.bf16 %v5809_v40, %v5807_v39  ;;  %5822 = vpow2.f32 %v2758_v28  ;;  %v8650_v20 = vld [vmem:[#allocation53_spill] sm:$0xff] }
 0x5aa   : > { %v2626_v8 = vpop.permute.xlu1 %2625  ;;  %v7785_v60 = vpop.eup %5810 }
 0x5ab   : > { %5824 = vpow2.f32 %v2760_v2  ;;  %v2762_v57 = vmul.f32 1.442695, %v2714_v31  ;;  %v2715_v34 = vsub.f32 %v8647_v47, %v2626_v8  ;;  %5440 = vmatmul.mubr.bf16.gmra.mxu1 %v3214_v62 }
 0x5ac   : > { %v5813_v36 = vpop.eup %5812  ;;  %2872 = vadd.xlane.f32.xlu0 %v5809_v40  ;;  %v2631_v26 = vpop.permute.xlu0 %2630 }
 0x5ad   : > { %v2764_v38 = vmul.f32 1.442695, %v2715_v34  ;;  %v2716_v16 = vsub.f32 %v8648_v52, %v2631_v26  ;;  %v3215_v45 = vpack.c.bf16 %v5813_v36, %v7785_v60  ;;  %5826 = vpow2.f32 %v2762_v57  ;;  %v8651_v57 = vld [vmem:[#allocation55_spill] sm:$0xff] }
 0x5ae   : > { %v2636_v23 = vpop.permute.xlu1 %2635  ;;  %v5815_v0 = vpop.eup %5814 }
 0x5af   : > { %5828 = vpow2.f32 %v2764_v38  ;;  %v2766_v55 = vmul.f32 1.442695, %v2716_v16  ;;  %v2717_v28 = vsub.f32 %v8649_v59, %v2636_v23  ;;  %2860 = vadd.xlane.f32.xlu1 %v7771_v21  ;;  %5443 = vmatprep.mubr.bf16.mxu1 %v3215_v45 }
 0x5b0   : > { %v5817_v5 = vpop.eup %5816  ;;  %2868 = vadd.xlane.f32.xlu0 %v5805_v13  ;;  %v2641_v56 = vpop.permute.xlu0 %2640  ;;  %v8652_v13 = vld [vmem:[#allocation52_spill] sm:$0xff] }
 0x5b1   : > { %v2768_v40 = vmul.f32 1.442695, %v2717_v28  ;;  %v2718_v2 = vsub.f32 %v8650_v20, %v2641_v56  ;;  %v3216_v4 = vpack.c.bf16 %v5817_v5, %v5815_v0  ;;  %5830 = vpow2.f32 %v2766_v55  ;;  %v8653_v55 = vld [vmem:[#allocation54_spill] sm:$0xff]  ;;  %v8654_v56 = vld [vmem:[#allocation57_spill] sm:$0xff] }
 0x5b2   : > { %v2646_v31 = vpop.permute.xlu1 %2645  ;;  %v7793_v62 = vpop.eup %5818 }
 0x5b3   : > { %5832 = vpow2.f32 %v2768_v40  ;;  %v2770_v8 = vmul.f32 1.442695, %v2718_v2  ;;  %v2719_v47 = vsub.f32 %v8651_v57, %v2646_v31  ;;  %2870 = vadd.xlane.f32.xlu1 %v5807_v39  ;;  %5444 = vmatmul.mubr.bf16.gmra.mxu1 %v3216_v4 }
 0x5b4   : > { %v5821_v34 = vpop.eup %5820  ;;  %2880 = vadd.xlane.f32.xlu0 %v5817_v5  ;;  %v2651_v21 = vpop.permute.xlu0 %2650 }
 0x5b5   : > { %v2772_v26 = vmul.f32 1.442695, %v2719_v47  ;;  %v2720_v38 = vsub.f32 %v8652_v13, %v2651_v21  ;;  %v3217_v52 = vpack.c.bf16 %v5821_v34, %v7793_v62  ;;  %5834 = vpow2.f32 %v2770_v8  ;;  %v8655_v8 = vld [vmem:[#allocation59_spill] sm:$0xff] }
 0x5b6   : > { %v2656_v16 = vpop.permute.xlu1 %2655  ;;  %v5823_v45 = vpop.eup %5822 }
 0x5b7   : > { %5836 = vpow2.f32 %v2772_v26  ;;  %v2774_v23 = vmul.f32 1.442695, %v2720_v38  ;;  %v2721_v59 = vsub.f32 %v8653_v55, %v2656_v16  ;;  %2866 = vadd.xlane.f32.xlu1 %v7778_v6  ;;  %5447 = vmatprep.mubr.bf16.mxu1 %v3217_v52  ;;  %v8656_v26 = vld [vmem:[#allocation56_spill] sm:$0xff] }
 0x5b8   : > { %v5825_v39 = vpop.eup %5824  ;;  %2876 = vadd.xlane.f32.xlu0 %v5813_v36  ;;  %v2661_v28 = vpop.permute.xlu0 %2660 }
 0x5b9   : > { %v2776_v5 = vmul.f32 1.442695, %v2721_v59  ;;  %v2722_v40 = vsub.f32 %v8654_v56, %v2661_v28  ;;  %v3218_v20 = vpack.c.bf16 %v5825_v39, %v5823_v45  ;;  %5838 = vpow2.f32 %v2774_v23  ;;  %v8657_v23 = vld [vmem:[#allocation58_spill] sm:$0xff] }
 0x5ba   : > { %v2666_v2 = vpop.permute.xlu1 %2665  ;;  %v5827_v4 = vpop.eup %5826 }
 0x5bb   : > { %5840 = vpow2.f32 %v2776_v5  ;;  %v2778_v31 = vmul.f32 1.442695, %v2722_v40  ;;  %v2723_v57 = vsub.f32 %v8655_v8, %v2666_v2  ;;  %2878 = vadd.xlane.f32.xlu1 %v5815_v0  ;;  %5448 = vmatmul.mubr.bf16.gmra.mxu1 %v3218_v20 }
 0x5bc   : > { %v5829_v47 = vpop.eup %5828  ;;  %2888 = vadd.xlane.f32.xlu0 %v5825_v39  ;;  %v2671_v6 = vpop.permute.xlu0 %2670  ;;  %v8658_v39 = vld [vmem:[#allocation61_spill] sm:$0xff] }
 0x5bd   : > { %v2780_v21 = vmul.f32 1.442695, %v2723_v57  ;;  %v2724_v36 = vsub.f32 %v8656_v26, %v2671_v6  ;;  %v3219_v13 = vpack.c.bf16 %v5829_v47, %v5827_v4  ;;  %5842 = vpow2.f32 %v2778_v31  ;;  %v8659_v31 = vld [vmem:[#allocation63_spill] sm:$0xff] }
 0x5be   : > { %v2676_v38 = vpop.permute.xlu1 %2675  ;;  %v5831_v52 = vpop.eup %5830 }
 0x5bf   : > { %5844 = vpow2.f32 %v2780_v21  ;;  %v2782_v16 = vmul.f32 1.442695, %v2724_v36  ;;  %v2725_v55 = vsub.f32 %v8657_v23, %v2676_v38  ;;  %2874 = vadd.xlane.f32.xlu1 %v7785_v60  ;;  %5451 = vmatprep.mubr.bf16.mxu1 %v3219_v13  ;;  %v8660_v21 = vld [vmem:[#allocation60_spill] sm:$0xff] }
 0x5c0   : > { %v5833_v59 = vpop.eup %5832  ;;  %2884 = vadd.xlane.f32.xlu0 %v5821_v34  ;;  %v2681_v0 = vpop.permute.xlu0 %2680 }
 0x5c1   : > { %v2784_v28 = vmul.f32 1.442695, %v2725_v55  ;;  %v2726_v5 = vsub.f32 %v8658_v39, %v2681_v0  ;;  %v3220_v56 = vpack.c.bf16 %v5833_v59, %v5831_v52  ;;  %5846 = vpow2.f32 %v2782_v16  ;;  %v8661_v16 = vld [vmem:[#allocation62_spill] sm:$0xff] }
 0x5c2   : > { %v2686_v40 = vpop.permute.xlu1 %2685  ;;  %v5835_v20 = vpop.eup %5834 }
 0x5c3   : > { %5848 = vpow2.f32 %v2784_v28  ;;  %v2786_v2 = vmul.f32 1.442695, %v2726_v5  ;;  %v2727_v8 = vsub.f32 %v8659_v31, %v2686_v40  ;;  %2886 = vadd.xlane.f32.xlu1 %v5823_v45  ;;  %5452 = vmatmul.mubr.bf16.gmra.mxu1 %v3220_v56 }
 0x5c4   : > { %v5837_v57 = vpop.eup %5836  ;;  %2896 = vadd.xlane.f32.xlu0 %v5833_v59  ;;  %v2691_v60 = vpop.permute.xlu0 %2690 }
 0x5c5   : > { %v2788_v6 = vmul.f32 1.442695, %v2727_v8  ;;  %v2728_v34 = vsub.f32 %v8660_v21, %v2691_v60  ;;  %v3221_v26 = vpack.c.bf16 %v5837_v57, %v5835_v20  ;;  %5850 = vpow2.f32 %v2786_v2 }
 0x5c6   : > { %v2696_v36 = vpop.permute.xlu1 %2695  ;;  %v5839_v13 = vpop.eup %5838 }
 0x5c7   : > { %5852 = vpow2.f32 %v2788_v6  ;;  %v2790_v38 = vmul.f32 1.442695, %v2728_v34  ;;  %v2729_v23 = vsub.f32 %v8661_v16, %v2696_v36  ;;  %2882 = vadd.xlane.f32.xlu1 %v7793_v62  ;;  %5455 = vmatprep.mubr.bf16.mxu1 %v3221_v26  ;;  %v2536_v34 = vmul.f32 1.442695, %v2473_v63 }
 0x5c8   : > { %v5841_v55 = vpop.eup %5840  ;;  %2892 = vadd.xlane.f32.xlu0 %v5829_v47  ;;  %v7810_v8 = vpop.permute.xlu0 %3026 }
 0x5c9   : > { %v2792_v45 = vmul.f32 1.442695, %v2729_v23  ;;  %v3222_v0 = vpack.c.bf16 %v5841_v55, %v5839_v13  ;;  %5854 = vpow2.f32 %v2790_v38 }
 0x5ca   : > { %v5843_v59 = vpop.eup %5842  ;;  %v7812_v6 = vpop.permute.xlu1 %3021 }
 0x5cb   : > { %5856 = vpow2.f32 %v2792_v45  ;;  %2894 = vadd.xlane.f32.xlu1 %v5831_v52  ;;  %5456 = vmatmul.mubr.bf16.gmra.mxu1 %v3222_v0 }
 0x5cc   : > { %v5845_v28 = vpop.eup %5844  ;;  %2904 = vadd.xlane.f32.xlu0 %v5841_v55 }
 0x5cd   : > { %v3223_v39 = vpack.c.bf16 %v5845_v28, %v5843_v59 }
 0x5ce   : > { %v5847_v5 = vpop.eup %5846 }
 0x5cf   : > { %2890 = vadd.xlane.f32.xlu1 %v5827_v4  ;;  %5459 = vmatprep.mubr.bf16.mxu1 %v3223_v39  ;;  %v7814_v4 = vpop.permute.xlu0 %3041 }
 0x5d0   : > { %v5849_v56 = vpop.eup %5848  ;;  %2900 = vadd.xlane.f32.xlu0 %v5837_v57  ;;  %v7816_v57 = vpop.permute.xlu1 %3031 }
 0x5d1   : > { %v3224_v40 = vpack.c.bf16 %v5849_v56, %v5847_v5 }
 0x5d2   : > { %v5851_v62 = vpop.eup %5850 }
 0x5d3   : > { %2902 = vadd.xlane.f32.xlu1 %v5839_v13  ;;  %5460 = vmatmul.mubr.bf16.gmra.mxu1 %v3224_v40  ;;  %v7818_v21 = vpop.permute.xlu0 %3051 }
 0x5d4   : > { %v5853_v47 = vpop.eup %5852  ;;  %2912 = vadd.xlane.f32.xlu0 %v5849_v56  ;;  %v7826_v26 = vpop.permute.xlu1 %3036 }
 0x5d5   : > { %v3225_v2 = vpack.c.bf16 %v5853_v47, %v5851_v62 }
 0x5d6   : > { %v5855_v31 = vpop.eup %5854 }
 0x5d7   : > { %2898 = vadd.xlane.f32.xlu1 %v5835_v20  ;;  %5463 = vmatprep.mubr.bf16.mxu1 %v3225_v2  ;;  %v2534_v20 = vmul.f32 1.442695, %v2472_v32  ;;  %v7828_v36 = vpop.permute.xlu0 %3061 }
 0x5d8   : > { %v5857_v52 = vpop.eup %5856  ;;  %2908 = vadd.xlane.f32.xlu0 %v5845_v28  ;;  %v7830_v13 = vpop.permute.xlu1 %3046 }
 0x5d9   : > { %v3226_v60 = vpack.c.bf16 %v5857_v52, %v5855_v31  ;;  %5858 = vpow2.f32 %v2534_v20 }
 0x5da   : > { %5860 = vpow2.f32 %v2536_v34  ;;  %v2794_v34 = vld [vmem:[#allocation5] sm:$0xff] }
 0x5db   : > { %2910 = vadd.xlane.f32.xlu1 %v5847_v5  ;;  %5464 = vmatmul.mubr.bf16.gmra.mxu1 %v3226_v60  ;;  %v7832_v38 = vpop.permute.xlu0 %3071 }
 0x5dc   : > { %2920 = vadd.xlane.f32.xlu0 %v5857_v52  ;;  %v7834_v16 = vpop.permute.xlu1 %3056 }
 0x5df   : > { %2906 = vadd.xlane.f32.xlu1 %v5843_v59  ;;  %v7838_v43 = vpop.permute.xlu0 %3081 }
 0x5e0   : > { %2916 = vadd.xlane.f32.xlu0 %v5853_v47  ;;  %v7843_v27 = vpop.permute.xlu1 %3066 }
 0x5e3   : > { %2918 = vadd.xlane.f32.xlu1 %v5855_v31  ;;  %v7846_v32 = vpop.permute.xlu0 %3091  ;;  %v2796_v31 = vld [vmem:[#allocation5 + $0x10] sm:$0xff] }
 0x5e4   : > { %v7848_v30 = vpop.permute.xlu1 %3076  ;;  %v2828_v60 = vmul.f32 %v7649_v7, %v2796_v31  ;;  %v2795_v31 = vld [vmem:[#allocation5 + $0x8] sm:$0xff] }
 0x5e6   : > { %v7836_v23 = vpop.eup %5858 }
 0x5e7   : > { %2914 = vadd.xlane.f32.xlu1 %v5851_v62  ;;  %v7841_v10 = vpop.eup %5860  ;;  %v7850_v63 = vpop.permute.xlu0 %3101 }
 0x5e8   : > { %v7852_v55 = vpop.permute.xlu1 %3086 }
 0x5eb   : > { %v7854_v45 = vpop.permute.xlu0 %3111 }
 0x5ec   : > { %v7856_v0 = vpop.permute.xlu1 %3096 }
 0x5ef   : > { %v7858_v59 = vpop.permute.xlu0 %3121 }
 0x5f0   : > { %8662 = vst [vmem:[#allocation35_spill] sm:$0xff] %v7858_v59  ;;  %v7860_v28 = vpop.permute.xlu1 %3106 }
 0x5f1   : > { %8663 = vst [vmem:[#allocation37_spill] sm:$0xff] %v7860_v28 }
 0x5f3   : > { %v7862_v39 = vpop.permute.xlu0 %3131 }
 0x5f4   : > { %8664 = vst [vmem:[#allocation39_spill] sm:$0xff] %v7862_v39  ;;  %v7864_v5 = vpop.permute.xlu1 %3116 }
 0x5f5   : > { %8665 = vst [vmem:[#allocation36_spill] sm:$0xff] %v7864_v5 }
 0x5f6   : > { %3171 = vperm.xlu0 %5676, %v7836_v23  }
 0x5f7   : > { %v7866_v56 = vpop.permute.xlu0 %3151 }
 0x5f8   : > { %3176 = vperm.xlu1 %5677, %v7841_v10   ;;  %8666 = vst [vmem:[#allocation38_spill] sm:$0xff] %v7866_v56  ;;  %v7868_v40 = vpop.permute.xlu1 %3136  ;;  %v2826_v56 = vmul.f32 %v7639_v42, %v2794_v34  ;;  %v2827_v34 = vmul.f32 %v7634_v3, %v2795_v31  ;;  %v2798_v3 = vld [vmem:[#allocation5 + $0x20] sm:$0xff] }
 0x5f9   : > { %8667 = vst [vmem:[#allocation41_spill] sm:$0xff] %v7868_v40  ;;  %v2797_v40 = vld [vmem:[#allocation5 + $0x18] sm:$0xff] }
 0x5fb   : > { %v7870_v62 = vpop.permute.xlu0 %3141 }
 0x5fc   : > { %8668 = vst [vmem:[#allocation43_spill] sm:$0xff] %v7870_v62  ;;  %v7872_v47 = vpop.permute.xlu1 %3126 }
 0x5fd   : > { %8669 = vst [vmem:[#allocation40_spill] sm:$0xff] %v7872_v47 }
 0x5ff   : > { %v7874_v2 = vpop.permute.xlu0 %3161 }
 0x600   : > { %8670 = vst [vmem:[#allocation42_spill] sm:$0xff] %v7874_v2  ;;  %v7876_v52 = vpop.permute.xlu1 %3156  ;;  %v2829_v2 = vmul.f32 %v7659_v24, %v2797_v40 }
 0x601   : > { %8671 = vst [vmem:[#allocation45_spill] sm:$0xff] %v7876_v52  ;;  %v2801_v52 = vld [vmem:[#allocation5 + $0x38] sm:$0xff] }
 0x604   : > { %v7881_v28 = vpop.permute.xlu1 %3146 }
 0x608   : > { %v7885_v7 = vpop.permute.xlu1 %3166 }
 0x629   : > { %v2863_v20 = vpop.xlane.xlu0 %2862 }
 0x62a   : > { %v2924_v59 = vadd.f32 %v2863_v20, %v2828_v60  ;;  %v2799_v60 = vld [vmem:[#allocation5 + $0x28] sm:$0xff] }
 0x62b   : > { %v2831_v24 = vmul.f32 %v7669_v19, %v2799_v60  ;;  %v2830_v19 = vmul.f32 %v7644_v29, %v2798_v3  ;;  %v2802_v29 = vld [vmem:[#allocation5 + $0x40] sm:$0xff] }
 0x62c   : > { %2957 = vst.msk [vmem:[#allocation5 + $0x10] sm:$0xff] %vm2954_vm1, %v2924_v59  ;;  %v2833_v59 = vmul.f32 %v7679_v61, %v2801_v52 }
 0x62d   : > { %v2859_v39 = vpop.xlane.xlu0 %2858 }
 0x62e   : > { %v2922_v62 = vadd.f32 %v2859_v39, %v2826_v56  ;;  %v2800_v56 = vld [vmem:[#allocation5 + $0x30] sm:$0xff] }
 0x62f   : > { %v2832_v61 = vmul.f32 %v7654_v48, %v2800_v56  ;;  %v2804_v48 = vld [vmem:[#allocation5 + $0x50] sm:$0xff]  ;;  %v2809_v56 = vld [vmem:[#allocation5 + $0x78] sm:$0xff] }
 0x630   : > { %2955 = vst.msk [vmem:[#allocation5] sm:$0xff] %vm2954_vm1, %v2922_v62 }
 0x631   : > { %v2865_v47 = vpop.xlane.xlu0 %2864 }
 0x632   : > { %v2925_v5 = vadd.f32 %v2865_v47, %v2829_v2  ;;  %v2805_v47 = vld [vmem:[#allocation5 + $0x58] sm:$0xff] }
 0x633   : > { %v2837_v52 = vmul.f32 %v7699_v33, %v2805_v47  ;;  %v2836_v33 = vmul.f32 %v7674_v35, %v2804_v48  ;;  %v2841_v47 = vmul.f32 %v7719_v1, %v2809_v56  ;;  %v2808_v35 = vld [vmem:[#allocation5 + $0x70] sm:$0xff] }
 0x634   : > { %2958 = vst.msk [vmem:[#allocation5 + $0x18] sm:$0xff] %vm2954_vm1, %v2925_v5  ;;  %v2840_v1 = vmul.f32 %v7694_v37, %v2808_v35  ;;  %v2812_v37 = vld [vmem:[#allocation5 + $0x90] sm:$0xff] }
 0x635   : > { %v2873_v42 = vpop.xlane.xlu0 %2872 }
 0x636   : > { %v2929_v20 = vadd.f32 %v2873_v42, %v2833_v59  ;;  %v2803_v42 = vld [vmem:[#allocation5 + $0x48] sm:$0xff] }
 0x638   : > { %2962 = vst.msk [vmem:[#allocation5 + $0x38] sm:$0xff] %vm2954_vm1, %v2929_v20  ;;  %v2861_v39 = vpop.xlane.xlu1 %2860 }
 0x639   : > { %v2923_v40 = vadd.f32 %v2861_v39, %v2827_v34  ;;  %v2869_v62 = vpop.xlane.xlu0 %2868  ;;  %v2835_v34 = vmul.f32 %v7689_v18, %v2803_v42  ;;  %v2834_v18 = vmul.f32 %v7664_v46, %v2802_v29  ;;  %v2806_v46 = vld [vmem:[#allocation5 + $0x60] sm:$0xff]  ;;  %v2817_v29 = vld [vmem:[#allocation5 + $0xb8] sm:$0xff] }
 0x63a   : > { %v2927_v2 = vadd.f32 %v2869_v62, %v2831_v24 }
 0x63b   : > { %2956 = vst.msk [vmem:[#allocation5 + $0x8] sm:$0xff] %vm2954_vm1, %v2923_v40 }
 0x63c   : > { %2960 = vst.msk [vmem:[#allocation5 + $0x28] sm:$0xff] %vm2954_vm1, %v2927_v2  ;;  %v2871_v5 = vpop.xlane.xlu1 %2870 }
 0x63d   : > { %v2928_v59 = vadd.f32 %v2871_v5, %v2832_v61  ;;  %v2881_v31 = vpop.xlane.xlu0 %2880  ;;  %v2807_v5 = vld [vmem:[#allocation5 + $0x68] sm:$0xff] }
 0x63e   : > { %v2933_v20 = vadd.f32 %v2881_v31, %v2837_v52 }
 0x63f   : > { %2961 = vst.msk [vmem:[#allocation5 + $0x30] sm:$0xff] %vm2954_vm1, %v2928_v59  ;;  %v2839_v59 = vmul.f32 %v7709_v11, %v2807_v5  ;;  %v2838_v11 = vmul.f32 %v7684_v15, %v2806_v46  ;;  %v2849_v5 = vmul.f32 %v7741_v17, %v2817_v29  ;;  %v2810_v15 = vld [vmem:[#allocation5 + $0x80] sm:$0xff] }
 0x640   : > { %2966 = vst.msk [vmem:[#allocation5 + $0x58] sm:$0xff] %vm2954_vm1, %v2933_v20  ;;  %v2867_v60 = vpop.xlane.xlu1 %2866  ;;  %v2813_v20 = vld [vmem:[#allocation5 + $0x98] sm:$0xff] }
 0x641   : > { %v2926_v39 = vadd.f32 %v2867_v60, %v2830_v19  ;;  %v2877_v24 = vpop.xlane.xlu0 %2876 }
 0x642   : > { %v2931_v40 = vadd.f32 %v2877_v24, %v2835_v34  ;;  %v2845_v34 = vmul.f32 %v7735_v25, %v2813_v20  ;;  %v2811_v24 = vld [vmem:[#allocation5 + $0x88] sm:$0xff]  ;;  %v2844_v25 = vmul.f32 %v7714_v50, %v2812_v37  ;;  %v2816_v50 = vld [vmem:[#allocation5 + $0xb0] sm:$0xff] }
 0x643   : > { %2959 = vst.msk [vmem:[#allocation5 + $0x20] sm:$0xff] %vm2954_vm1, %v2926_v39  ;;  %v2848_v17 = vmul.f32 %v7730_v41, %v2816_v50 }
 0x644   : > { %2964 = vst.msk [vmem:[#allocation5 + $0x48] sm:$0xff] %vm2954_vm1, %v2931_v40  ;;  %v2879_v62 = vpop.xlane.xlu1 %2878 }
 0x645   : > { %v2932_v2 = vadd.f32 %v2879_v62, %v2836_v33  ;;  %v2889_v61 = vpop.xlane.xlu0 %2888  ;;  %v2843_v33 = vmul.f32 %v7727_v9, %v2811_v24  ;;  %v2842_v9 = vmul.f32 %v7704_v44, %v2810_v15  ;;  %v2814_v44 = vld [vmem:[#allocation5 + $0xa0] sm:$0xff] }
 0x646   : > { %v2937_v52 = vadd.f32 %v2889_v61, %v2841_v47 }
 0x647   : > { %2965 = vst.msk [vmem:[#allocation5 + $0x50] sm:$0xff] %vm2954_vm1, %v2932_v2 }
 0x648   : > { %2970 = vst.msk [vmem:[#allocation5 + $0x78] sm:$0xff] %vm2954_vm1, %v2937_v52  ;;  %v2875_v3 = vpop.xlane.xlu1 %2874 }
 0x649   : > { %v2930_v31 = vadd.f32 %v2875_v3, %v2834_v18  ;;  %v2885_v42 = vpop.xlane.xlu0 %2884  ;;  %v2815_v3 = vld [vmem:[#allocation5 + $0xa8] sm:$0xff] }
 0x64a   : > { %v2935_v19 = vadd.f32 %v2885_v42, %v2839_v59 }
 0x64b   : > { %2963 = vst.msk [vmem:[#allocation5 + $0x40] sm:$0xff] %vm2954_vm1, %v2930_v31  ;;  %v2847_v31 = vmul.f32 %v7747_v58, %v2815_v3  ;;  %v2989_v58 = vld [vmem:[#allocation6 + $0xd8] sm:$0xff] }
 0x64c   : > { %2968 = vst.msk [vmem:[#allocation5 + $0x68] sm:$0xff] %vm2954_vm1, %v2935_v19  ;;  %v2887_v60 = vpop.xlane.xlu1 %2886  ;;  %v2821_v19 = vld [vmem:[#allocation5 + $0xd8] sm:$0xff] }
 0x64d   : > { %v2936_v48 = vadd.f32 %v2887_v60, %v2840_v1  ;;  %v2897_v39 = vpop.xlane.xlu0 %2896 }
 0x64e   : > { %v2941_v56 = vadd.f32 %v2897_v39, %v2845_v34  ;;  %v2853_v34 = vmul.f32 %v7753_v12, %v2821_v19  ;;  %v2819_v39 = vld [vmem:[#allocation5 + $0xc8] sm:$0xff]  ;;  %v2825_v12 = vld [vmem:[#allocation5 + $0xf8] sm:$0xff] }
 0x64f   : > { %2969 = vst.msk [vmem:[#allocation5 + $0x70] sm:$0xff] %vm2954_vm1, %v2936_v48  ;;  %v2851_v41 = vmul.f32 %v7756_v49, %v2819_v39  ;;  %v2857_v15 = vmul.f32 %v7841_v10, %v2825_v12 }
 0x650   : > { %2974 = vst.msk [vmem:[#allocation5 + $0x98] sm:$0xff] %vm2954_vm1, %v2941_v56  ;;  %v2883_v40 = vpop.xlane.xlu1 %2882  ;;  %v2846_v56 = vmul.f32 %v7722_v53, %v2814_v44 }
 0x651   : > { %v2934_v62 = vadd.f32 %v2883_v40, %v2838_v11  ;;  %v2893_v47 = vpop.xlane.xlu0 %2892  ;;  %v2820_v40 = vld [vmem:[#allocation5 + $0xd0] sm:$0xff] }
 0x652   : > { %v2939_v2 = vadd.f32 %v2893_v47, %v2843_v33  ;;  %v2987_v33 = vld [vmem:[#allocation6 + $0xb0] sm:$0xff]  ;;  %v3181_v47 = vmul.f32 %v7816_v57, %v2989_v58 }
 0x653   : > { %2967 = vst.msk [vmem:[#allocation5 + $0x60] sm:$0xff] %vm2954_vm1, %v2934_v62  ;;  %v3179_v53 = vmul.f32 %v7812_v6, %v2987_v33 }
 0x654   : > { %2972 = vst.msk [vmem:[#allocation5 + $0x88] sm:$0xff] %vm2954_vm1, %v2939_v2  ;;  %v2895_v61 = vpop.xlane.xlu1 %2894  ;;  %v2990_v2 = vld [vmem:[#allocation6 + $0x18] sm:$0xff] }
 0x655   : > { %v2940_v52 = vadd.f32 %v2895_v61, %v2844_v25  ;;  %v2905_v18 = vpop.xlane.xlu0 %2904  ;;  %v2852_v61 = vmul.f32 %v7738_v51, %v2820_v40  ;;  %v2993_v51 = vld [vmem:[#allocation6 + $0x30] sm:$0xff] }
 0x656   : > { %v2945_v59 = vadd.f32 %v2905_v18, %v2849_v5  ;;  %v2988_v18 = vld [vmem:[#allocation6] sm:$0xff] }
 0x657   : > { %2973 = vst.msk [vmem:[#allocation5 + $0x90] sm:$0xff] %vm2954_vm1, %v2940_v52  ;;  %v2818_v52 = vld [vmem:[#allocation5 + $0xc0] sm:$0xff] }
 0x658   : > { %2978 = vst.msk [vmem:[#allocation5 + $0xb8] sm:$0xff] %vm2954_vm1, %v2945_v59  ;;  %v2891_v35 = vpop.xlane.xlu1 %2890 }
 0x659   : > { %v2938_v42 = vadd.f32 %v2891_v35, %v2842_v9  ;;  %v2901_v20 = vpop.xlane.xlu0 %2900  ;;  %v2823_v9 = vld [vmem:[#allocation5 + $0xe8] sm:$0xff]  ;;  %v3182_v35 = vmul.f32 %v7826_v26, %v2990_v2  ;;  %v2991_v26 = vld [vmem:[#allocation6 + $0x50] sm:$0xff]  ;;  %v2995_v2 = vld [vmem:[#allocation6 + $0x80] sm:$0xff] }
 0x65a   : > { %v2943_v1 = vadd.f32 %v2901_v20, %v2847_v31  ;;  %v3180_v20 = vmul.f32 %v7810_v8, %v2988_v18  ;;  %v3183_v58 = vmul.f32 %v7814_v4, %v2991_v26 }
 0x65b   : > { %2971 = vst.msk [vmem:[#allocation5 + $0x80] sm:$0xff] %vm2954_vm1, %v2938_v42  ;;  %v2850_v42 = vmul.f32 %v7744_v22, %v2818_v52  ;;  %v2994_v22 = vld [vmem:[#allocation6 + $0x48] sm:$0xff] }
 0x65c   : > { %2976 = vst.msk [vmem:[#allocation5 + $0xa8] sm:$0xff] %vm2954_vm1, %v2943_v1  ;;  %v2903_v60 = vpop.xlane.xlu1 %2902  ;;  %v2855_v1 = vmul.f32 %v7761_v54, %v2823_v9  ;;  %v3186_v33 = vmul.f32 %v7834_v16, %v2994_v22  ;;  %v2996_v52 = vld [vmem:[#allocation6 + $0x88] sm:$0xff]  ;;  %v3004_v22 = vld [vmem:[#allocation6 + $0x58] sm:$0xff] }
 0x65d   : > { %v2944_v46 = vadd.f32 %v2903_v60, %v2848_v17  ;;  %v2913_v48 = vpop.xlane.xlu0 %2912  ;;  %v2824_v17 = vld [vmem:[#allocation5 + $0xf0] sm:$0xff] }
 0x65e   : > { %v2949_v24 = vadd.f32 %v2913_v48, %v2853_v34 }
 0x65f   : > { %2977 = vst.msk [vmem:[#allocation5 + $0xb0] sm:$0xff] %vm2954_vm1, %v2944_v46  ;;  %v3185_v46 = vmul.f32 %v7818_v21, %v2993_v51  ;;  %v3002_v51 = vld [vmem:[#allocation6 + $0x78] sm:$0xff] }
 0x660   : > { %2982 = vst.msk [vmem:[#allocation5 + $0xd8] sm:$0xff] %vm2954_vm1, %v2949_v24  ;;  %v2899_v11 = vpop.xlane.xlu1 %2898  ;;  %v2856_v24 = vmul.f32 %v7836_v23, %v2824_v17 }
 0x661   : > { %v2942_v37 = vadd.f32 %v2899_v11, %v2846_v56  ;;  %v2909_v62 = vpop.xlane.xlu0 %2908  ;;  %v2822_v11 = vld [vmem:[#allocation5 + $0xe0] sm:$0xff] }
 0x662   : > { %v2947_v29 = vadd.f32 %v2909_v62, %v2851_v41  ;;  %v2992_v41 = vld [vmem:[#allocation6 + $0x68] sm:$0xff]  ;;  %v2854_v23 = vmul.f32 %v7750_v14, %v2822_v11  ;;  %v8673_v11 = vld [vmem:[#allocation37_spill] sm:$0xff] }
 0x663   : > { %2975 = vst.msk [vmem:[#allocation5 + $0xa0] sm:$0xff] %vm2954_vm1, %v2942_v37  ;;  %v5437_v25 = vpop.f32.mrf.mxu1  ;;  %v2997_v62 = vld [vmem:[#allocation6 + $0xe8] sm:$0xff]  ;;  %v3184_v4 = vmul.f32 %v7830_v13, %v2992_v41  ;;  %v3196_v41 = vmul.f32 %v8673_v11, %v3004_v22 }
 0x664   : > { %2980 = vst.msk [vmem:[#allocation5 + $0xc8] sm:$0xff] %vm2954_vm1, %v2947_v29  ;;  %v3398_v5 = vadd.f32 %v5437_v25, %v3181_v47  ;;  %v2911_v49 = vpop.xlane.xlu1 %2910 }
 0x665   : > { %v2948_v3 = vadd.f32 %v2911_v49, %v2852_v61  ;;  %v3269_v59 = vpop.f32.mrf.mxu1  ;;  %v2921_v57 = vpop.xlane.xlu0 %2920 }
 0x666   : > { %3430 = vst [vmem:[#allocation6 + $0xd8] sm:$0xff] %v3398_v5  ;;  %v3396_v31 = vadd.f32 %v3269_v59, %v3179_v53  ;;  %v2953_v50 = vadd.f32 %v2921_v57, %v2857_v15  ;;  %v3189_v53 = vmul.f32 %v7832_v38, %v2997_v62  ;;  %v2998_v5 = vld [vmem:[#allocation6 + $0xb8] sm:$0xff]  ;;  %v3187_v15 = vmul.f32 %v7828_v36, %v2995_v2  ;;  %v3001_v59 = vld [vmem:[#allocation6 + $0x8] sm:$0xff]  ;;  %v3010_v62 = vld [vmem:[#allocation6 + $0xc0] sm:$0xff] }
 0x667   : > { %2981 = vst.msk [vmem:[#allocation5 + $0xd0] sm:$0xff] %vm2954_vm1, %v2948_v3  ;;  %v5438_v6 = vpop.f32.mrf.mxu1  ;;  %v3190_v18 = vmul.f32 %v7848_v30, %v2998_v5  ;;  %v3188_v38 = vmul.f32 %v7843_v27, %v2996_v52  ;;  %v3011_v52 = vld [vmem:[#allocation6 + $0xa8] sm:$0xff] }
 0x668   : > { %3428 = vst [vmem:[#allocation6 + $0xb0] sm:$0xff] %v3396_v31  ;;  %2986 = vst.msk [vmem:[#allocation5 + $0xf8] sm:$0xff] %vm2954_vm1, %v2953_v50  ;;  %v3399_v10 = vadd.f32 %v5438_v6, %v3182_v35  ;;  %v2907_v19 = vpop.xlane.xlu1 %2906  ;;  %v2999_v35 = vld [vmem:[#allocation6 + $0x60] sm:$0xff]  ;;  %v3193_v50 = vmul.f32 %v7846_v32, %v3001_v59 }
 0x669   : > { %v2946_v60 = vadd.f32 %v2907_v19, %v2850_v42  ;;  %v3272_v34 = vpop.f32.mrf.mxu1  ;;  %v2917_v44 = vpop.xlane.xlu0 %2916  ;;  %v3191_v42 = vmul.f32 %v7838_v43, %v2999_v35  ;;  %v3194_v19 = vmul.f32 %v7856_v0, %v3002_v51  ;;  %v8680_v51 = vld [vmem:[#allocation45_spill] sm:$0xff] }
 0x66a   : > { %3431 = vst [vmem:[#allocation6 + $0x18] sm:$0xff] %v3399_v10  ;;  %v3397_v48 = vadd.f32 %v3272_v34, %v3180_v20  ;;  %v2951_v39 = vadd.f32 %v2917_v44, %v2855_v1  ;;  %v3000_v20 = vld [vmem:[#allocation6 + $0xf0] sm:$0xff]  ;;  %v3005_v1 = vld [vmem:[#allocation6 + $0x40] sm:$0xff] }
 0x66b   : > { %2979 = vst.msk [vmem:[#allocation5 + $0xc0] sm:$0xff] %vm2954_vm1, %v2946_v60  ;;  %v5441_v8 = vpop.f32.mrf.mxu1  ;;  %v3192_v26 = vmul.f32 %v7852_v55, %v3000_v20  ;;  %v3003_v60 = vld [vmem:[#allocation6 + $0x38] sm:$0xff]  ;;  %v3197_v44 = vmul.f32 %v7854_v45, %v3005_v1  ;;  %v3015_v1 = vld [vmem:[#allocation6 + $0xa0] sm:$0xff] }
 0x66c   : > { %3429 = vst [vmem:[#allocation6] sm:$0xff] %v3397_v48  ;;  %2984 = vst.msk [vmem:[#allocation5 + $0xe8] sm:$0xff] %vm2954_vm1, %v2951_v39  ;;  %v3402_v54 = vadd.f32 %v5441_v8, %v3185_v46  ;;  %v2919_v56 = vpop.xlane.xlu1 %2918  ;;  %v3006_v46 = vld [vmem:[#allocation6 + $0xc8] sm:$0xff]  ;;  %v3195_v39 = vmul.f32 %v7850_v63, %v3003_v60  ;;  %v3018_v60 = vld [vmem:[#allocation6 + $0x98] sm:$0xff] }
 0x66d   : > { %v2952_v40 = vadd.f32 %v2919_v56, %v2856_v24  ;;  %v3285_v21 = vpop.f32.mrf.mxu1  ;;  %v8672_v24 = vld [vmem:[#allocation36_spill] sm:$0xff] }
 0x66e   : > { %3434 = vst [vmem:[#allocation6 + $0x30] sm:$0xff] %v3402_v54  ;;  %v3400_v37 = vadd.f32 %v3285_v21, %v3183_v58  ;;  %v3198_v58 = vmul.f32 %v8672_v24, %v3006_v46  ;;  %v3009_v54 = vld [vmem:[#allocation6 + $0x70] sm:$0xff] }
 0x66f   : > { %2985 = vst.msk [vmem:[#allocation5 + $0xf0] sm:$0xff] %vm2954_vm1, %v2952_v40  ;;  %v5442_v12 = vpop.f32.mrf.mxu1  ;;  %v3007_v40 = vld [vmem:[#allocation6 + $0xe0] sm:$0xff] }
 0x670   : > { %3432 = vst [vmem:[#allocation6 + $0x50] sm:$0xff] %v3400_v37  ;;  %v3403_v47 = vadd.f32 %v5442_v12, %v3186_v33  ;;  %v2915_v29 = vpop.xlane.xlu1 %2914  ;;  %v8674_v33 = vld [vmem:[#allocation39_spill] sm:$0xff] }
 0x671   : > { %v2950_v25 = vadd.f32 %v2915_v29, %v2854_v23  ;;  %v3288_v61 = vpop.f32.mrf.mxu1  ;;  %v3201_v37 = vmul.f32 %v8674_v33, %v3009_v54  ;;  %v8675_v23 = vld [vmem:[#allocation35_spill] sm:$0xff]  ;;  %v3008_v29 = vld [vmem:[#allocation6 + $0x90] sm:$0xff]  ;;  %v3172_v20 = vpop.permute.xlu0 %3171 }
 0x672   : > { %3435 = vst [vmem:[#allocation6 + $0x48] sm:$0xff] %v3403_v47  ;;  %v3401_v16 = vadd.f32 %v3288_v61, %v3184_v4  ;;  %v3199_v4 = vmul.f32 %v8675_v23, %v3007_v40 }
 0x673   : > { %2983 = vst.msk [vmem:[#allocation5 + $0xe0] sm:$0xff] %vm2954_vm1, %v2950_v25  ;;  %v5445_v49 = vpop.f32.mrf.mxu1  ;;  %v8676_v25 = vld [vmem:[#allocation41_spill] sm:$0xff] }
 0x674   : > { %3433 = vst [vmem:[#allocation6 + $0x68] sm:$0xff] %v3401_v16  ;;  %v3406_v14 = vadd.f32 %v5445_v49, %v3189_v53  ;;  %v3202_v61 = vmul.f32 %v8676_v25, %v3010_v62  ;;  %v3013_v16 = vld [vmem:[#allocation6 + $0x10] sm:$0xff] }
 0x675   : > { %v3301_v13 = vpop.f32.mrf.mxu1  ;;  %v8677_v49 = vld [vmem:[#allocation40_spill] sm:$0xff] }
 0x676   : > { %3438 = vst [vmem:[#allocation6 + $0xe8] sm:$0xff] %v3406_v14  ;;  %v3404_v3 = vadd.f32 %v3301_v13, %v3187_v15  ;;  %v3200_v15 = vmul.f32 %v8677_v49, %v3008_v29 }
 0x677   : > { %v5446_v57 = vpop.f32.mrf.mxu1 }
 0x678   : > { %3436 = vst [vmem:[#allocation6 + $0x80] sm:$0xff] %v3404_v3  ;;  %v3407_v9 = vadd.f32 %v5446_v57, %v3190_v18  ;;  %v8678_v18 = vld [vmem:[#allocation38_spill] sm:$0xff]  ;;  %v3014_v57 = vld [vmem:[#allocation6 + $0x28] sm:$0xff] }
 0x679   : > { %v3304_v31 = vpop.f32.mrf.mxu1  ;;  %v3205_v3 = vmul.f32 %v8678_v18, %v3013_v16 }
 0x67a   : > { %3439 = vst [vmem:[#allocation6 + $0xb8] sm:$0xff] %v3407_v9  ;;  %v3405_v36 = vadd.f32 %v3304_v31, %v3188_v38  ;;  %v8679_v9 = vld [vmem:[#allocation43_spill] sm:$0xff] }
 0x67b   : > { %v5449_v6 = vpop.f32.mrf.mxu1  ;;  %v3203_v35 = vmul.f32 %v8679_v9, %v3011_v52 }
 0x67c   : > { %3437 = vst [vmem:[#allocation6 + $0x88] sm:$0xff] %v3405_v36  ;;  %v3410_v30 = vadd.f32 %v5449_v6, %v3193_v50  ;;  %v3012_v50 = vld [vmem:[#allocation6 + $0xd0] sm:$0xff]  ;;  %v3206_v6 = vmul.f32 %v8680_v51, %v3014_v57 }
 0x67d   : > { %v3317_v10 = vpop.f32.mrf.mxu1 }
 0x67e   : > { %3442 = vst [vmem:[#allocation6 + $0x8] sm:$0xff] %v3410_v30  ;;  %v3408_v27 = vadd.f32 %v3317_v10, %v3191_v42  ;;  %v3017_v30 = vld [vmem:[#allocation6 + $0x20] sm:$0xff] }
 0x67f   : > { %v5450_v17 = vpop.f32.mrf.mxu1 }
 0x680   : > { %3440 = vst [vmem:[#allocation6 + $0x60] sm:$0xff] %v3408_v27  ;;  %v3411_v32 = vadd.f32 %v5450_v17, %v3194_v19  ;;  %v3204_v19 = vmul.f32 %v7881_v28, %v3012_v50 }
 0x681   : > { %v3320_v34 = vpop.f32.mrf.mxu1 }
 0x682   : > { %3443 = vst [vmem:[#allocation6 + $0x78] sm:$0xff] %v3411_v32  ;;  %v3409_v43 = vadd.f32 %v3320_v34, %v3192_v26  ;;  %v3209_v26 = vmul.f32 %v3172_v20, %v3017_v30  ;;  %v3177_v34 = vpop.permute.xlu1 %3176 }
 0x683   : > { %v5453_v48 = vpop.f32.mrf.mxu1  ;;  %v3210_v22 = vmul.f32 %v3177_v34, %v3018_v60 }
 0x684   : > { %3441 = vst [vmem:[#allocation6 + $0xf0] sm:$0xff] %v3409_v43  ;;  %v3414_v0 = vadd.f32 %v5453_v48, %v3197_v44  ;;  %v8681_v43 = vld [vmem:[#allocation42_spill] sm:$0xff] }
 0x685   : > { %v3333_v8 = vpop.f32.mrf.mxu1  ;;  %v3207_v46 = vmul.f32 %v8681_v43, %v3015_v1 }
 0x686   : > { %3446 = vst [vmem:[#allocation6 + $0x40] sm:$0xff] %v3414_v0  ;;  %v3412_v55 = vadd.f32 %v3333_v8, %v3195_v39  ;;  %v3016_v39 = vld [vmem:[#allocation6 + $0xf8] sm:$0xff] }
 0x687   : > { %v5454_v56 = vpop.f32.mrf.mxu1  ;;  %v3208_v24 = vmul.f32 %v7885_v7, %v3016_v39 }
 0x688   : > { %3444 = vst [vmem:[#allocation6 + $0x38] sm:$0xff] %v3412_v55  ;;  %v3415_v45 = vadd.f32 %v5454_v56, %v3198_v58 }
 0x689   : > { %v3336_v21 = vpop.f32.mrf.mxu1 }
 0x68a   : > { %3447 = vst [vmem:[#allocation6 + $0xc8] sm:$0xff] %v3415_v45  ;;  %v3413_v63 = vadd.f32 %v3336_v21, %v3196_v41 }
 0x68b   : > { %v5457_v12 = vpop.f32.mrf.mxu1 }
 0x68c   : > { %3445 = vst [vmem:[#allocation6 + $0x58] sm:$0xff] %v3413_v63  ;;  %v3418_v47 = vadd.f32 %v5457_v12, %v3201_v37 }
 0x68d   : > { %v3349_v2 = vpop.f32.mrf.mxu1 }
 0x68e   : > { %3450 = vst [vmem:[#allocation6 + $0x70] sm:$0xff] %v3418_v47  ;;  %v3416_v53 = vadd.f32 %v3349_v2, %v3199_v4 }
 0x68f   : > { %v5458_v5 = vpop.f32.mrf.mxu1 }
 0x690   : > { %3448 = vst [vmem:[#allocation6 + $0xe0] sm:$0xff] %v3416_v53  ;;  %v3419_v14 = vadd.f32 %v5458_v5, %v3202_v61 }
 0x691   : > { %v3352_v13 = vpop.f32.mrf.mxu1 }
 0x692   : > { %3451 = vst [vmem:[#allocation6 + $0xc0] sm:$0xff] %v3419_v14  ;;  %v3417_v59 = vadd.f32 %v3352_v13, %v3200_v15 }
 0x693   : > { %v5461_v38 = vpop.f32.mrf.mxu1 }
 0x694   : > { %3449 = vst [vmem:[#allocation6 + $0x90] sm:$0xff] %v3417_v59  ;;  %v3422_v31 = vadd.f32 %v5461_v38, %v3205_v3 }
 0x695   : > { %v3365_v36 = vpop.f32.mrf.mxu1 }
 0x696   : > { %3454 = vst [vmem:[#allocation6 + $0x10] sm:$0xff] %v3422_v31  ;;  %v3420_v42 = vadd.f32 %v3365_v36, %v3203_v35 }
 0x697   : > { %v5462_v10 = vpop.f32.mrf.mxu1 }
 0x698   : > { %3452 = vst [vmem:[#allocation6 + $0xa8] sm:$0xff] %v3420_v42  ;;  %v3423_v27 = vadd.f32 %v5462_v10, %v3206_v6 }
 0x699   : > { %v3368_v17 = vpop.f32.mrf.mxu1 }
 0x69a   : > { %3455 = vst [vmem:[#allocation6 + $0x28] sm:$0xff] %v3423_v27  ;;  %v3421_v32 = vadd.f32 %v3368_v17, %v3204_v19 }
 0x69b   : > { %v5465_v44 = vpop.f32.mrf.mxu1 }
 0x69c   : > { %3453 = vst [vmem:[#allocation6 + $0xd0] sm:$0xff] %v3421_v32  ;;  %v3426_v48 = vadd.f32 %v5465_v44, %v3209_v26 }
 0x69d   : > { %v3381_v0 = vpop.f32.mrf.mxu1 }
 0x69e   : > { %3458 = vst [vmem:[#allocation6 + $0x20] sm:$0xff] %v3426_v48  ;;  %v3424_v8 = vadd.f32 %v3381_v0, %v3207_v46 }
 0x69f   : > { %v5466_v28 = vpop.f32.mrf.mxu1 }
 0x6a0   : > { %3456 = vst [vmem:[#allocation6 + $0xa0] sm:$0xff] %v3424_v8  ;;  %v3427_v58 = vadd.f32 %v5466_v28, %v3210_v22  ;;  %3495 = sbr.rel (%p4923_p1) target bundleno = 2164 (0x874), region = 88 }
 0x6a1   : > { %v3384_v55 = vpop.f32.mrf.mxu1 }
 0x6a2   : > { %3459 = vst [vmem:[#allocation6 + $0x98] sm:$0xff] %v3427_v58  ;;  %v3425_v54 = vadd.f32 %v3384_v55, %v3208_v24 }
 0x6a4   : > { %3457 = vst [vmem:[#allocation6 + $0xf8] sm:$0xff] %v3425_v54 }
 0x6a5   : > { %v3530_v56 = vld [vmem:[#allocation5 + $0x10] sm:$0xff]  ;;  %v3528_v11 = vld [vmem:[#allocation5] sm:$0xff]  ;;  %v3531_v41 = vld [vmem:[#allocation5 + $0x18] sm:$0xff]  ;;  %v6290_v45 = vmov 0  }
 0x6a6   : > { %5863 = vset.pattern.permute.xlu1 %v6290_v45  ;;  %5862 = vset.pattern.permute.xlu0 %v6290_v45  ;;  %5888 = vrcp.f32 %v3530_v56  ;;  %v3529_v40 = vld [vmem:[#allocation5 + $0x8] sm:$0xff]  ;;  %v3532_v21 = vld [vmem:[#allocation5 + $0x20] sm:$0xff]  ;;  %v3535_v33 = vld [vmem:[#allocation5 + $0x38] sm:$0xff] }
 0x6a7   : > { %5890 = vrcp.f32 %v3528_v11  ;;  %3940 = vmatprep.mubr.bf16.mxu0 %v6290_v45  ;;  %4020 = vmatprep.mubr.bf16.mxu1 %v6290_v45  ;;  %v3533_v7 = vld [vmem:[#allocation5 + $0x28] sm:$0xff]  ;;  %v3534_v37 = vld [vmem:[#allocation5 + $0x30] sm:$0xff]  ;;  %v3536_v4 = vld [vmem:[#allocation5 + $0x40] sm:$0xff] }
 0x6a8   : > { %5892 = vrcp.f32 %v3531_v41  ;;  %v3537_v63 = vld [vmem:[#allocation5 + $0x48] sm:$0xff]  ;;  %v5864_v62 = vld [vmem:[#allocation15 + $0x74] ss:$8 sps:$4 sm:$0xff]   ;;  %v5866_v12 = vld [vmem:[#allocation15 + $0x70] ss:$8 sps:$4 sm:$0xff]  }
 0x6a9   : > { %5894 = vrcp.f32 %v3529_v40  ;;  %v5867_v23 = vld [vmem:[#allocation15 + $0x64] ss:$8 sps:$4 sm:$0xff]   ;;  %3908 = vmatprep.subr.bf16.mxu0 %v5864_v62  ;;  %5483 = vmatprep.subr.bf16.mxu1 %v5864_v62  ;;  %v5869_v29 = vld [vmem:[#allocation15 + $0x60] ss:$8 sps:$4 sm:$0xff]   ;;  %v5870_v25 = vld [vmem:[#allocation15 + $0x54] ss:$8 sps:$4 sm:$0xff]  }
 0x6aa   : > { %5896 = vrcp.f32 %v3533_v7  ;;  %3909 = vmatpush1.bf16.msra.mxu0 %v5866_v12  ;;  %5491 = vmatpush1.bf16.msra.mxu1 %v5866_v12  ;;  %v3545_v53 = vld [vmem:[#allocation5 + $0x88] sm:$0xff]  ;;  %v3544_v5 = vld [vmem:[#allocation5 + $0x80] sm:$0xff]  ;;  %v5872_v49 = vld [vmem:[#allocation15 + $0x50] ss:$8 sps:$4 sm:$0xff]  }
 0x6ab   : > { %5898 = vrcp.f32 %v3532_v21  ;;  %3910 = vmatprep.subr.bf16.mxu0 %v5867_v23  ;;  %5484 = vmatprep.subr.bf16.mxu1 %v5867_v23  ;;  %v5873_v15 = vld [vmem:[#allocation15 + $0x44] ss:$8 sps:$4 sm:$0xff]   ;;  %v3539_v52 = vld [vmem:[#allocation5 + $0x58] sm:$0xff]  ;;  %v3538_v18 = vld [vmem:[#allocation5 + $0x50] sm:$0xff] }
 0x6ac   : > { %5900 = vrcp.f32 %v3535_v33  ;;  %v5875_v3 = vld [vmem:[#allocation15 + $0x40] ss:$8 sps:$4 sm:$0xff]   ;;  %v5876_v59 = vld [vmem:[#allocation15 + $0x34] ss:$8 sps:$4 sm:$0xff]   ;;  %v5878_v31 = vld [vmem:[#allocation15 + $0x30] ss:$8 sps:$4 sm:$0xff]  }
 0x6ad   : > { %5902 = vrcp.f32 %v3534_v37  ;;  %v3547_v38 = vld [vmem:[#allocation5 + $0x98] sm:$0xff]  ;;  %v3546_v35 = vld [vmem:[#allocation5 + $0x90] sm:$0xff]  ;;  %v5879_v50 = vld [vmem:[#allocation15 + $0x24] ss:$8 sps:$4 sm:$0xff]  }
 0x6ae   : > { %5904 = vrcp.f32 %v3537_v63  ;;  %3911 = vmatpush1.bf16.msra.mxu0 %v5869_v29  ;;  %5492 = vmatpush1.bf16.msra.mxu1 %v5869_v29  ;;  %v3541_v51 = vld [vmem:[#allocation5 + $0x68] sm:$0xff]  ;;  %v3540_v42 = vld [vmem:[#allocation5 + $0x60] sm:$0xff]  ;;  %v5882_v20 = vld [vmem:[#allocation15 + $0x14] ss:$8 sps:$4 sm:$0xff]  }
 0x6af   : > { %5906 = vrcp.f32 %v3536_v4  ;;  %3912 = vmatprep.subr.bf16.mxu0 %v5870_v25  ;;  %5485 = vmatprep.subr.bf16.mxu1 %v5870_v25  ;;  %v5881_v30 = vld [vmem:[#allocation15 + $0x20] ss:$8 sps:$4 sm:$0xff]   ;;  %v5884_v17 = vld [vmem:[#allocation15 + $0x10] ss:$8 sps:$4 sm:$0xff]   ;;  %v5885_v26 = vld [vmem:[#allocation15 + $0x4] ss:$8 sps:$4 sm:$0xff]  }
 0x6b0   : > { %5908 = vrcp.f32 %v3545_v53  ;;  %v3549_v19 = vld [vmem:[#allocation5 + $0xa8] sm:$0xff]  ;;  %v3548_v1 = vld [vmem:[#allocation5 + $0xa0] sm:$0xff]  ;;  %v3543_v60 = vld [vmem:[#allocation5 + $0x78] sm:$0xff] }
 0x6b1   : > { %5910 = vrcp.f32 %v3544_v5  ;;  %v3542_v44 = vld [vmem:[#allocation5 + $0x70] sm:$0xff]  ;;  %v5887_v43 = vld [vmem:[#allocation15] ss:$8 sps:$4 sm:$0xff]   ;;  %v3551_v48 = vld [vmem:[#allocation5 + $0xb8] sm:$0xff] }
 0x6b2   : > { %3913 = vmatpush1.bf16.msra.mxu0 %v5872_v49  ;;  %5493 = vmatpush1.bf16.msra.mxu1 %v5872_v49  ;;  %5912 = vrcp.f32 %v3539_v52  ;;  %v3550_v0 = vld [vmem:[#allocation5 + $0xb0] sm:$0xff]  ;;  %v3553_v8 = vld [vmem:[#allocation5 + $0xc8] sm:$0xff]  ;;  %v3552_v24 = vld [vmem:[#allocation5 + $0xc0] sm:$0xff] }
 0x6b3   : > { %v5889_v47 = vpop.eup %5888  ;;  %3914 = vmatprep.subr.bf16.mxu0 %v5873_v15  ;;  %5914 = vrcp.f32 %v3538_v18  ;;  %5486 = vmatprep.subr.bf16.mxu1 %v5873_v15  ;;  %v3555_v55 = vld [vmem:[#allocation5 + $0xd8] sm:$0xff]  ;;  %v3554_v56 = vld [vmem:[#allocation5 + $0xd0] sm:$0xff]  ;;  %v3557_v41 = vld [vmem:[#allocation5 + $0xe8] sm:$0xff] }
 0x6b4   : > { %v5891_v2 = vpop.eup %5890  ;;  %3604 = vperm.xlu1 %5863, %v5889_v47   ;;  %5916 = vrcp.f32 %v3547_v38  ;;  %v3556_v7 = vld [vmem:[#allocation5 + $0xe0] sm:$0xff]  ;;  %v3559_v33 = vld [vmem:[#allocation5 + $0xf8] sm:$0xff]  ;;  %v3558_v63 = vld [vmem:[#allocation5 + $0xf0] sm:$0xff] }
 0x6b5   : > { %v5893_v61 = vpop.eup %5892  ;;  %3594 = vperm.xlu0 %5862, %v5891_v2   ;;  %5918 = vrcp.f32 %v3546_v35  ;;  %v3497_v5 = vld [vmem:[#allocation6] sm:$0xff] }
 0x6b6   : > { %v5895_v16 = vpop.eup %5894  ;;  %3915 = vmatpush1.bf16.msra.mxu0 %v5875_v3  ;;  %5494 = vmatpush1.bf16.msra.mxu1 %v5875_v3  ;;  %5920 = vrcp.f32 %v3541_v51  ;;  %v3498_v3 = vld [vmem:[#allocation6 + $0xd8] sm:$0xff]  ;;  %v3501_v51 = vld [vmem:[#allocation6 + $0x68] sm:$0xff] }
 0x6b7   : > { %v5897_v14 = vpop.eup %5896  ;;  %3916 = vmatprep.subr.bf16.mxu0 %v5876_v59  ;;  %5487 = vmatprep.subr.bf16.mxu1 %v5876_v59  ;;  %5922 = vrcp.f32 %v3540_v42  ;;  %v3499_v59 = vld [vmem:[#allocation6 + $0x18] sm:$0xff] }
 0x6b8   : > { %3609 = vperm.xlu1 %5863, %v5893_v61   ;;  %v5899_v13 = vpop.eup %5898  ;;  %5924 = vrcp.f32 %v3549_v19 }
 0x6b9   : > { %3599 = vperm.xlu0 %5862, %v5895_v16   ;;  %v5901_v57 = vpop.eup %5900  ;;  %5926 = vrcp.f32 %v3548_v1  ;;  %v3496_v16 = vld [vmem:[#allocation6 + $0xb0] sm:$0xff] }
 0x6ba   : > { %v5903_v9 = vpop.eup %5902  ;;  %3917 = vmatpush1.bf16.msra.mxu0 %v5878_v31  ;;  %5495 = vmatpush1.bf16.msra.mxu1 %v5878_v31  ;;  %5928 = vrcp.f32 %v3543_v60 }
 0x6bb   : > { %v5905_v36 = vpop.eup %5904  ;;  %3918 = vmatprep.subr.bf16.mxu0 %v5879_v50  ;;  %5488 = vmatprep.subr.bf16.mxu1 %v5879_v50  ;;  %5930 = vrcp.f32 %v3542_v44  ;;  %v3503_v44 = vld [vmem:[#allocation6 + $0x48] sm:$0xff] }
 0x6bc   : > { %3619 = vperm.xlu1 %5863, %v5897_v14   ;;  %v5907_v6 = vpop.eup %5906  ;;  %5932 = vrcp.f32 %v3551_v48  ;;  %v3515_v48 = vld [vmem:[#allocation6 + $0xc8] sm:$0xff] }
 0x6bd   : > { %3614 = vperm.xlu0 %5862, %v5899_v13   ;;  %v5909_v10 = vpop.eup %5908  ;;  %5934 = vrcp.f32 %v3550_v0 }
 0x6be   : > { %v5911_v27 = vpop.eup %5910  ;;  %3919 = vmatpush1.bf16.msra.mxu0 %v5881_v30  ;;  %5496 = vmatpush1.bf16.msra.mxu1 %v5881_v30  ;;  %5936 = vrcp.f32 %v3553_v8  ;;  %v3513_v30 = vld [vmem:[#allocation6 + $0x58] sm:$0xff] }
 0x6bf   : > { %3920 = vmatprep.subr.bf16.mxu0 %v5882_v20  ;;  %v5913_v32 = vpop.eup %5912  ;;  %5489 = vmatprep.subr.bf16.mxu1 %v5882_v20  ;;  %5938 = vrcp.f32 %v3552_v24  ;;  %v3512_v20 = vld [vmem:[#allocation6 + $0x38] sm:$0xff] }
 0x6c0   : > { %3629 = vperm.xlu1 %5863, %v5901_v57   ;;  %v5915_v34 = vpop.eup %5914  ;;  %5940 = vrcp.f32 %v3555_v55 }
 0x6c1   : > { %3624 = vperm.xlu0 %5862, %v5903_v9   ;;  %v5917_v46 = vpop.eup %5916  ;;  %5942 = vrcp.f32 %v3554_v56 }
 0x6c2   : > { %3921 = vmatpush1.bf16.msra.mxu0 %v5884_v17  ;;  %5497 = vmatpush1.bf16.msra.mxu1 %v5884_v17  ;;  %v5919_v39 = vpop.eup %5918  ;;  %5944 = vrcp.f32 %v3557_v41  ;;  %v3504_v41 = vld [vmem:[#allocation6 + $0x80] sm:$0xff] }
 0x6c3   : > { %3922 = vmatprep.subr.bf16.mxu0 %v5885_v26  ;;  %5490 = vmatprep.subr.bf16.mxu1 %v5885_v26  ;;  %v5921_v22 = vpop.eup %5920  ;;  %5946 = vrcp.f32 %v3556_v7  ;;  %v3517_v7 = vld [vmem:[#allocation6 + $0x90] sm:$0xff] }
 0x6c4   : > { %3639 = vperm.xlu1 %5863, %v5905_v36   ;;  %v5923_v28 = vpop.eup %5922  ;;  %5948 = vrcp.f32 %v3559_v33 }
 0x6c5   : > { %3634 = vperm.xlu0 %5862, %v5907_v6   ;;  %v5925_v58 = vpop.eup %5924  ;;  %5950 = vrcp.f32 %v3558_v63  ;;  %v3500_v6 = vld [vmem:[#allocation6 + $0x50] sm:$0xff] }
 0x6c6   : > { %3923 = vmatpush1.bf16.msra.mxu0 %v5887_v43  ;;  %5498 = vmatpush1.bf16.msra.mxu1 %v5887_v43  ;;  %v5927_v54 = vpop.eup %5926  ;;  %v3502_v43 = vld [vmem:[#allocation6 + $0x30] sm:$0xff] }
 0x6c7   : > { %v5929_v11 = vpop.eup %5928 }
 0x6c8   : > { %3679 = vperm.xlu1 %5863, %v5909_v10   ;;  %v5931_v40 = vpop.eup %5930 }
 0x6c9   : > { %3674 = vperm.xlu0 %5862, %v5911_v27   ;;  %v5933_v21 = vpop.eup %5932 }
 0x6ca   : > { %v5935_v37 = vpop.eup %5934 }
 0x6cb   : > { %v5937_v62 = vpop.eup %5936 }
 0x6cc   : > { %3649 = vperm.xlu1 %5863, %v5913_v32   ;;  %v5939_v12 = vpop.eup %5938 }
 0x6cd   : > { %3644 = vperm.xlu0 %5862, %v5915_v34   ;;  %v5941_v23 = vpop.eup %5940 }
 0x6ce   : > { %v5943_v4 = vpop.eup %5942 }
 0x6cf   : > { %v5945_v47 = vpop.eup %5944 }
 0x6d0   : > { %3689 = vperm.xlu1 %5863, %v5917_v46   ;;  %v5947_v29 = vpop.eup %5946 }
 0x6d1   : > { %3684 = vperm.xlu0 %5862, %v5919_v39   ;;  %v5949_v2 = vpop.eup %5948  ;;  %v3514_v39 = vld [vmem:[#allocation6 + $0x40] sm:$0xff] }
 0x6d2   : > { %v5951_v25 = vpop.eup %5950 }
 0x6d4   : > { %3659 = vperm.xlu1 %5863, %v5921_v22  }
 0x6d5   : > { %3654 = vperm.xlu0 %5862, %v5923_v28  }
 0x6d8   : > { %3699 = vperm.xlu1 %5863, %v5925_v58  }
 0x6d9   : > { %3694 = vperm.xlu0 %5862, %v5927_v54  }
 0x6dc   : > { %3669 = vperm.xlu1 %5863, %v5929_v11   ;;  %v3505_v11 = vld [vmem:[#allocation6 + $0x88] sm:$0xff] }
 0x6dd   : > { %3664 = vperm.xlu0 %5862, %v5931_v40  }
 0x6e0   : > { %3709 = vperm.xlu1 %5863, %v5933_v21   ;;  %v3516_v21 = vld [vmem:[#allocation6 + $0xe0] sm:$0xff] }
 0x6e1   : > { %3704 = vperm.xlu0 %5862, %v5935_v37  }
 0x6e4   : > { %3719 = vperm.xlu1 %5863, %v5937_v62  }
 0x6e5   : > { %3714 = vperm.xlu0 %5862, %v5939_v12  }
 0x6e8   : > { %3729 = vperm.xlu1 %5863, %v5941_v23  }
 0x6e9   : > { %3724 = vperm.xlu0 %5862, %v5943_v4  }
 0x6ec   : > { %3739 = vperm.xlu1 %5863, %v5945_v47  }
 0x6ed   : > { %3734 = vperm.xlu0 %5862, %v5947_v29  }
 0x6f0   : > { %3749 = vperm.xlu1 %5863, %v5949_v2   ;;  %v3507_v2 = vld [vmem:[#allocation6 + $0xb8] sm:$0xff] }
 0x6f1   : > { %3744 = vperm.xlu0 %5862, %v5951_v25   ;;  %v3506_v25 = vld [vmem:[#allocation6 + $0xe8] sm:$0xff] }
 0x72f   : > { %v3605_v61 = vpop.permute.xlu1 %3604 }
 0x730   : > { %v3595_v53 = vpop.permute.xlu0 %3594  ;;  %v3754_v38 = vmul.f32 %v3605_v61, %v3498_v3  ;;  %v3509_v3 = vld [vmem:[#allocation6 + $0xf0] sm:$0xff] }
 0x731   : > { %v3752_v14 = vmul.f32 %v3595_v53, %v3496_v16  ;;  %v3519_v53 = vld [vmem:[#allocation6 + $0xc0] sm:$0xff]  ;;  %v3518_v16 = vld [vmem:[#allocation6 + $0x70] sm:$0xff] }
 0x733   : > { %v3610_v49 = vpop.permute.xlu1 %3609 }
 0x734   : > { %v3600_v15 = vpop.permute.xlu0 %3599  ;;  %v3755_v9 = vmul.f32 %v3610_v49, %v3499_v59 }
 0x735   : > { %v3753_v52 = vmul.f32 %v3600_v15, %v3497_v5 }
 0x736   : > { %v3785_v50 = vpack.c.bf16 %v3755_v9, %v3754_v38  ;;  %v3521_v9 = vld [vmem:[#allocation6 + $0xd0] sm:$0xff] }
 0x737   : > { %v3784_v13 = vpack.c.bf16 %v3753_v52, %v3752_v14  ;;  %v3620_v18 = vpop.permute.xlu1 %3619 }
 0x738   : > { %v3615_v57 = vpop.permute.xlu0 %3614  ;;  %v3757_v10 = vmul.f32 %v3620_v18, %v3501_v51 }
 0x739   : > { %3941 = vmatmul.mubr.bf16.vlgmr.msra.gmra.mxu0 %v3784_v13  ;;  %v3756_v19 = vmul.f32 %v3615_v57, %v3500_v6  ;;  %v3508_v57 = vld [vmem:[#allocation6 + $0x60] sm:$0xff] }
 0x73a   : > { %3950 = vmatprep.mubr.bf16.mxu0 %v6290_v45 }
 0x73b   : > { %v3630_v35 = vpop.permute.xlu1 %3629  ;;  %v3786_v32 = vpack.c.bf16 %v3757_v10, %v3756_v19  ;;  %v3510_v10 = vld [vmem:[#allocation6 + $0x8] sm:$0xff] }
 0x73c   : > { %v3625_v31 = vpop.permute.xlu0 %3624  ;;  %v3759_v0 = vmul.f32 %v3630_v35, %v3503_v44 }
 0x73d   : > { %v3758_v22 = vmul.f32 %v3625_v31, %v3502_v43  ;;  %v3520_v31 = vld [vmem:[#allocation6 + $0xa8] sm:$0xff] }
 0x73f   : > { %v3640_v36 = vpop.permute.xlu1 %3639  ;;  %v3787_v55 = vpack.c.bf16 %v3759_v0, %v3758_v22  ;;  %v3524_v0 = vld [vmem:[#allocation6 + $0xa0] sm:$0xff] }
 0x740   : > { %v3635_v42 = vpop.permute.xlu0 %3634  ;;  %v3761_v33 = vmul.f32 %v3640_v36, %v3505_v11 }
 0x741   : > { %3951 = vmatmul.mubr.bf16.gmra.mxu0 %v3785_v50  ;;  %v3760_v37 = vmul.f32 %v3635_v42, %v3504_v41 }
 0x742   : > { %3960 = vmatprep.mubr.bf16.mxu0 %v6290_v45 }
 0x743   : > { %v3680_v27 = vpop.permute.xlu1 %3679  ;;  %v3788_v4 = vpack.c.bf16 %v3761_v33, %v3760_v37  ;;  %v3816_v33 = vld [vmem:[%s8682_s12] sm:$0x3] }
 0x744   : > { %v3769_v1 = vmul.f32 %v3680_v27, %v3513_v30  ;;  %v3675_v17 = vpop.permute.xlu0 %3674  ;;  %v3511_v30 = vld [vmem:[#allocation6 + $0x78] sm:$0xff]  ;;  %v3523_v27 = vld [vmem:[#allocation6 + $0x28] sm:$0xff] }
 0x745   : > { %v3768_v26 = vmul.f32 %v3675_v17, %v3512_v20  ;;  %v3522_v17 = vld [vmem:[#allocation6 + $0x10] sm:$0xff] }
 0x747   : > { %v3792_v60 = vpack.c.bf16 %v3769_v1, %v3768_v26  ;;  %v3650_v34 = vpop.permute.xlu1 %3649 }
 0x748   : > { %v3645_v46 = vpop.permute.xlu0 %3644  ;;  %v3763_v5 = vmul.f32 %v3650_v34, %v3507_v2 }
 0x749   : > { %3961 = vmatmul.mubr.bf16.gmra.mxu0 %v3786_v32  ;;  %4021 = vmatmul.mubr.bf16.vlgmr.msra.gmra.mxu1 %v3792_v60  ;;  %v3762_v49 = vmul.f32 %v3645_v46, %v3506_v25 }
 0x74a   : > { %3970 = vmatprep.mubr.bf16.mxu0 %v6290_v45  ;;  %4030 = vmatprep.mubr.bf16.mxu1 %v6290_v45 }
 0x74b   : > { %v3690_v8 = vpop.permute.xlu1 %3689  ;;  %v3789_v18 = vpack.c.bf16 %v3763_v5, %v3762_v49  ;;  %v4104_v49 = vld [vmem:[#allocation2 + $0x18] sm:$0xff] }
 0x74c   : > { %v3771_v28 = vmul.f32 %v3690_v8, %v3515_v48  ;;  %v3685_v24 = vpop.permute.xlu0 %3684  ;;  %v3525_v48 = vld [vmem:[#allocation6 + $0xf8] sm:$0xff] }
 0x74d   : > { %v3770_v58 = vmul.f32 %v3685_v24, %v3514_v39 }
 0x74f   : > { %v3793_v54 = vpack.c.bf16 %v3771_v28, %v3770_v58  ;;  %v3660_v56 = vpop.permute.xlu1 %3659  ;;  %v3527_v58 = vld [vmem:[#allocation6 + $0x98] sm:$0xff] }
 0x750   : > { %v3655_v40 = vpop.permute.xlu0 %3654  ;;  %v3765_v50 = vmul.f32 %v3660_v56, %v3509_v3 }
 0x751   : > { %3971 = vmatmul.mubr.bf16.gmra.mxu0 %v3787_v55  ;;  %4031 = vmatmul.mubr.bf16.gmra.mxu1 %v3793_v54  ;;  %v3764_v36 = vmul.f32 %v3655_v40, %v3508_v57  ;;  %v3526_v54 = vld [vmem:[#allocation6 + $0x20] sm:$0xff]  ;;  %v3818_v40 = vlaneseq }
 0x752   : > { %3980 = vmatprep.mubr.bf16.mxu0 %v6290_v45  ;;  %4040 = vmatprep.mubr.bf16.mxu1 %v6290_v45 }
 0x753   : > { %v3700_v63 = vpop.permute.xlu1 %3699  ;;  %v3790_v42 = vpack.c.bf16 %v3765_v50, %v3764_v36  ;;  %vm4387_vm2 = vcmp.lt.s32.totalorder %v3818_v40, 256 }
 0x754   : > { %v3773_v62 = vmul.f32 %v3700_v63, %v3517_v7  ;;  %v3695_v12 = vpop.permute.xlu0 %3694  ;;  %v7996_v7 = vshrl.u32 %v3818_v40, 7 }
 0x755   : > { %v3772_v23 = vmul.f32 %v3695_v12, %v3516_v21  ;;  %v4101_v12 = vld [vmem:[#allocation2] sm:$0xff] }
 0x756   : > { %v3820_v21 = vsub.s32 0, %v7996_v7  ;;  %v3824_v37 = vsub.s32 1, %v7996_v7 }
 0x757   : > { %v3794_v47 = vpack.c.bf16 %v3773_v62, %v3772_v23  ;;  %v3670_v29 = vpop.permute.xlu1 %3669 }
 0x758   : > { %v3665_v61 = vpop.permute.xlu0 %3664  ;;  %v3767_v26 = vmul.f32 %v3670_v29, %v3511_v30  ;;  %v8003_v63 = vrot.slane %v3816_v33, %v3820_v21  ;;  %v4135_v21 = vld [vmem:[#allocation2 + $0x110] sm:$0xff] }
 0x759   : > { %3981 = vmatmul.mubr.bf16.gmra.mxu0 %v3788_v4  ;;  %4041 = vmatmul.mubr.bf16.gmra.mxu1 %v3794_v47  ;;  %v3766_v32 = vmul.f32 %v3665_v61, %v3510_v10  ;;  %v4102_v47 = vld [vmem:[#allocation2 + $0x8] sm:$0xff]  ;;  %v4103_v61 = vld [vmem:[#allocation2 + $0x10] sm:$0xff]  ;;  %v4109_v10 = vld [vmem:[#allocation2 + $0x40] sm:$0xff] }
 0x75a   : > { %3990 = vmatprep.mubr.bf16.mxu0 %v6290_v45  ;;  %4050 = vmatprep.mubr.bf16.mxu1 %v6290_v45 }
 0x75b   : > { %v3710_v15 = vpop.permute.xlu1 %3709  ;;  %v3791_v44 = vpack.c.bf16 %v3767_v26, %v3766_v32  ;;  %v4133_v26 = vld [vmem:[#allocation2 + $0x100] sm:$0xff] }
 0x75c   : > { %v3775_v14 = vmul.f32 %v3710_v15, %v3519_v53  ;;  %v3705_v52 = vpop.permute.xlu0 %3704 }
 0x75d   : > { %v3774_v13 = vmul.f32 %v3705_v52, %v3518_v16 }
 0x75f   : > { %v3795_v59 = vpack.c.bf16 %v3775_v14, %v3774_v13  ;;  %v3720_v38 = vpop.permute.xlu1 %3719  ;;  %v4105_v13 = vld [vmem:[#allocation2 + $0x20] sm:$0xff] }
 0x760   : > { %v3715_v35 = vpop.permute.xlu0 %3714  ;;  %v3777_v51 = vmul.f32 %v3720_v38, %v3521_v9  ;;  %v4106_v38 = vld [vmem:[#allocation2 + $0x28] sm:$0xff] }
 0x761   : > { %3991 = vmatmul.mubr.bf16.gmra.mxu0 %v3789_v18  ;;  %4051 = vmatmul.mubr.bf16.gmra.mxu1 %v3795_v59  ;;  %v3776_v6 = vmul.f32 %v3715_v35, %v3520_v31  ;;  %v4107_v31 = vld [vmem:[#allocation2 + $0x30] sm:$0xff] }
 0x762   : > { %4000 = vmatprep.mubr.bf16.mxu0 %v6290_v45  ;;  %4060 = vmatprep.mubr.bf16.mxu1 %v6290_v45 }
 0x763   : > { %v3796_v20 = vpack.c.bf16 %v3777_v51, %v3776_v6  ;;  %v3730_v19 = vpop.permute.xlu1 %3729  ;;  %v4108_v6 = vld [vmem:[#allocation2 + $0x38] sm:$0xff] }
 0x764   : > { %v3725_v1 = vpop.permute.xlu0 %3724  ;;  %v3779_v60 = vmul.f32 %v3730_v19, %v3523_v27 }
 0x765   : > { %v3778_v34 = vmul.f32 %v3725_v1, %v3522_v17 }
 0x767   : > { %v3797_v43 = vpack.c.bf16 %v3779_v60, %v3778_v34  ;;  %v3740_v46 = vpop.permute.xlu1 %3739 }
 0x768   : > { %v3735_v39 = vpop.permute.xlu0 %3734  ;;  %v3781_v22 = vmul.f32 %v3740_v46, %v3525_v48  ;;  %v4110_v48 = vld [vmem:[#allocation2 + $0x48] sm:$0xff] }
 0x769   : > { %4001 = vmatmul.mubr.bf16.gmra.mxu0 %v3790_v42  ;;  %4061 = vmatmul.mubr.bf16.gmra.mxu1 %v3796_v20  ;;  %v3780_v8 = vmul.f32 %v3735_v39, %v3524_v0  ;;  %v4134_v39 = vld [vmem:[#allocation2 + $0x108] sm:$0xff] }
 0x76a   : > { %4010 = vmatprep.mubr.bf16.mxu0 %v6290_v45  ;;  %4070 = vmatprep.mubr.bf16.mxu1 %v6290_v45 }
 0x76b   : > { %v3798_v28 = vpack.c.bf16 %v3781_v22, %v3780_v8  ;;  %v3750_v24 = vpop.permute.xlu1 %3749 }
 0x76c   : > { %v3745_v55 = vpop.permute.xlu0 %3744  ;;  %v3783_v56 = vmul.f32 %v3750_v24, %v3527_v58  ;;  %v4111_v58 = vld [vmem:[#allocation2 + $0x50] sm:$0xff] }
 0x76d   : > { %v3782_v11 = vmul.f32 %v3745_v55, %v3526_v54 }
 0x76f   : > { %v3799_v41 = vpack.c.bf16 %v3783_v56, %v3782_v11 }
 0x771   : > { %4011 = vmatmul.mubr.bf16.gmra.mxu0 %v3791_v44  ;;  %4071 = vmatmul.mubr.bf16.gmra.mxu1 %v3797_v43 }
 0x772   : > { %4080 = vmatprep.mubr.bf16.mxu1 %v6290_v45 }
 0x779   : > { %4081 = vmatmul.mubr.bf16.gmra.mxu1 %v3798_v28 }
 0x77a   : > { %4090 = vmatprep.mubr.bf16.mxu1 %v6290_v45  ;;  %v8005_v45 = vrot.slane %v3816_v33, %v3824_v37 }
 0x781   : > { %4091 = vmatmul.mubr.bf16.gmra.mxu1 %v3799_v41 }
 0x7f9   : > { %v3942_v62 = vpop.f32.mrf.mxu0 }
 0x7fa   : > { %v3943_v23 = vadd.f32 %v3942_v62, %v8003_v63 }
 0x7fb   : > { %v3944_v4 = vpop.f32.mrf.mxu0 }
 0x7fc   : > { %v4165_v29 = vadd.f32 %v4101_v12, %v3943_v23  ;;  %v3945_v2 = vadd.f32 %v3944_v4, %v8005_v45  ;;  %v4112_v4 = vld [vmem:[#allocation2 + $0x58] sm:$0xff] }
 0x7fd   : > { %v3946_v25 = vpop.f32.mrf.mxu0 }
 0x7fe   : > { %4229 = vst [vmem:[%s6605_s7] sm:$0xff] %v4165_v29  ;;  %v8010_v53 = vadd.f32 %v4102_v47, %v3945_v2  ;;  %v3947_v16 = vadd.f32 %v3946_v25, %v8003_v63  ;;  %v4390_v44 = vmul.f32 %v4165_v29, %v4165_v29 }
 0x7ff   : > { %v3948_v5 = vpop.f32.mrf.mxu0 }
 0x800   : > { %4230 = vst [vmem:[%s6605_s7 + $0x8] sm:$0xff] %v8010_v53  ;;  %v4167_v15 = vadd.f32 %v4103_v61, %v3947_v16  ;;  %v3949_v14 = vadd.f32 %v3948_v5, %v8005_v45  ;;  %v4391_v43 = vmul.f32 %v8010_v53, %v8010_v53 }
 0x801   : > { %v3952_v52 = vpop.f32.mrf.mxu0 }
 0x802   : > { %4231 = vst [vmem:[%s6605_s7 + $0x10] sm:$0xff] %v4167_v15  ;;  %v4168_v18 = vadd.f32 %v4104_v49, %v3949_v14  ;;  %v3953_v3 = vadd.f32 %v3952_v52, %v8003_v63  ;;  %v4392_v27 = vmul.f32 %v4167_v15, %v4167_v15  ;;  %v4293_v54 = vadd.f32 %v4167_v15, %v4165_v29  ;;  %v4136_v29 = vld [vmem:[#allocation2 + $0x118] sm:$0xff] }
 0x803   : > { %v3954_v59 = vpop.f32.mrf.mxu0 }
 0x804   : > { %4232 = vst [vmem:[%s6605_s7 + $0x18] sm:$0xff] %v4168_v18  ;;  %v8019_v57 = vadd.f32 %v4105_v13, %v3953_v3  ;;  %v3955_v9 = vadd.f32 %v3954_v59, %v8005_v45  ;;  %v4393_v0 = vmul.f32 %v4168_v18, %v4168_v18  ;;  %v4454_v56 = vadd.f32 %v4392_v27, %v4390_v44 }
 0x805   : > { %v3956_v35 = vpop.f32.mrf.mxu0  ;;  %v4330_v5 = vadd.f32 %v4168_v18, %v8010_v53  ;;  %v4113_v53 = vld [vmem:[#allocation2 + $0x60] sm:$0xff] }
 0x806   : > { %4233 = vst [vmem:[%s6605_s7 + $0x20] sm:$0xff] %v8019_v57  ;;  %v3957_v50 = vadd.f32 %v3956_v35, %v8003_v63  ;;  %v8025_v36 = vadd.f32 %v4106_v38, %v3955_v9  ;;  %v4394_v11 = vmul.f32 %v8019_v57, %v8019_v57  ;;  %v4491_v49 = vadd.f32 %v4393_v0, %v4391_v43  ;;  %v4137_v18 = vld [vmem:[#allocation2 + $0x120] sm:$0xff] }
 0x807   : > { %v3958_v51 = vpop.f32.mrf.mxu0  ;;  %v4294_v13 = vadd.f32 %v4293_v54, %v8019_v57 }
 0x808   : > { %v8027_v42 = vadd.f32 %v4107_v31, %v3957_v50  ;;  %v3959_v30 = vadd.f32 %v3958_v51, %v8005_v45  ;;  %4234 = vst [vmem:[%s6605_s7 + $0x28] sm:$0xff] %v8025_v36  ;;  %v4395_v33 = vmul.f32 %v8025_v36, %v8025_v36  ;;  %v4455_v3 = vadd.f32 %v4454_v56, %v4394_v11 }
 0x809   : > { %v3962_v20 = vpop.f32.mrf.mxu0  ;;  %v4022_v19 = vpop.f32.mrf.mxu1  ;;  %v4331_v51 = vadd.f32 %v4330_v5, %v8025_v36 }
 0x80a   : > { %4235 = vst [vmem:[%s6605_s7 + $0x30] sm:$0xff] %v8027_v42  ;;  %v8034_v1 = vadd.f32 %v4108_v6, %v3959_v30  ;;  %v3963_v17 = vadd.f32 %v3962_v20, %v8003_v63  ;;  %v4023_v32 = vadd.f32 %v4022_v19, %v8003_v63  ;;  %v4396_v2 = vmul.f32 %v8027_v42, %v8027_v42 }
 0x80b   : > { %v3964_v60 = vpop.f32.mrf.mxu0  ;;  %v4024_v34 = vpop.f32.mrf.mxu1  ;;  %v4492_v6 = vadd.f32 %v4491_v49, %v4395_v33  ;;  %v4295_v30 = vadd.f32 %v4294_v13, %v8027_v42  ;;  %v4139_v42 = vld [vmem:[#allocation2 + $0x130] sm:$0xff]  ;;  %v4118_v13 = vld [vmem:[#allocation2 + $0x88] sm:$0xff] }
 0x80c   : > { %4236 = vst [vmem:[%s6605_s7 + $0x38] sm:$0xff] %v8034_v1  ;;  %v8042_v46 = vadd.f32 %v4109_v10, %v3963_v17  ;;  %v8044_v22 = vadd.f32 %v4133_v26, %v4023_v32  ;;  %v3965_v8 = vadd.f32 %v3964_v60, %v8005_v45  ;;  %v4025_v28 = vadd.f32 %v4024_v34, %v8005_v45  ;;  %v4114_v10 = vld [vmem:[#allocation2 + $0x68] sm:$0xff]  ;;  %v4115_v60 = vld [vmem:[#allocation2 + $0x70] sm:$0xff] }
 0x80d   : > { %v3966_v24 = vpop.f32.mrf.mxu0  ;;  %v4026_v55 = vpop.f32.mrf.mxu1  ;;  %v4397_v9 = vmul.f32 %v8034_v1, %v8034_v1  ;;  %v4456_v20 = vadd.f32 %v4455_v3, %v4396_v2  ;;  %v4138_v32 = vld [vmem:[#allocation2 + $0x128] sm:$0xff]  ;;  %v4332_v0 = vadd.f32 %v4331_v51, %v8034_v1  ;;  %v4116_v1 = vld [vmem:[#allocation2 + $0x78] sm:$0xff] }
 0x80e   : > { %4237 = vst [vmem:[%s6605_s7 + $0x40] sm:$0xff] %v8042_v46  ;;  %v3967_v41 = vadd.f32 %v3966_v24, %v8003_v63  ;;  %4261 = vst [vmem:[%s6605_s7 + $0x100] sm:$0xff] %v8044_v22  ;;  %v8057_v37 = vadd.f32 %v4110_v48, %v3965_v8  ;;  %v8059_v62 = vadd.f32 %v4134_v39, %v4025_v28  ;;  %v4142_v3 = vld [vmem:[#allocation2 + $0x148] sm:$0xff] }
 0x80f   : > { %v4027_v12 = vadd.f32 %v4026_v55, %v8003_v63  ;;  %v3968_v23 = vpop.f32.mrf.mxu0  ;;  %v4028_v47 = vpop.f32.mrf.mxu1  ;;  %v4398_v44 = vmul.f32 %v8042_v46, %v8042_v46  ;;  %v4493_v8 = vadd.f32 %v4492_v6, %v4397_v9  ;;  %v4296_v28 = vadd.f32 %v4295_v30, %v8042_v46 }
 0x810   : > { %v8064_v25 = vadd.f32 %v4111_v58, %v3967_v41  ;;  %v3969_v61 = vadd.f32 %v3968_v23, %v8005_v45  ;;  %v4029_v16 = vadd.f32 %v4028_v47, %v8005_v45  ;;  %4238 = vst [vmem:[%s6605_s7 + $0x48] sm:$0xff] %v8057_v37  ;;  %4262 = vst [vmem:[%s6605_s7 + $0x108] sm:$0xff] %v8059_v62 }
 0x811   : > { %v8073_v15 = vadd.f32 %v4135_v21, %v4027_v12  ;;  %v3972_v14 = vpop.f32.mrf.mxu0  ;;  %v4032_v52 = vpop.f32.mrf.mxu1  ;;  %v4399_v43 = vmul.f32 %v8057_v37, %v8057_v37  ;;  %v4140_v21 = vld [vmem:[#allocation2 + $0x138] sm:$0xff]  ;;  %v4333_v47 = vadd.f32 %v4332_v0, %v8057_v37  ;;  %v4141_v37 = vld [vmem:[#allocation2 + $0x140] sm:$0xff] }
 0x812   : > { %4239 = vst [vmem:[%s6605_s7 + $0x50] sm:$0xff] %v8064_v25  ;;  %v8078_v59 = vadd.f32 %v4112_v4, %v3969_v61  ;;  %v8080_v38 = vadd.f32 %v4136_v29, %v4029_v16  ;;  %v3973_v35 = vadd.f32 %v3972_v14, %v8003_v63  ;;  %v4033_v57 = vadd.f32 %v4032_v52, %v8003_v63  ;;  %v4117_v61 = vld [vmem:[#allocation2 + $0x80] sm:$0xff]  ;;  %v4120_v0 = vld [vmem:[#allocation2 + $0x98] sm:$0xff] }
 0x813   : > { %4263 = vst [vmem:[%s6605_s7 + $0x110] sm:$0xff] %v8073_v15  ;;  %v3974_v31 = vpop.f32.mrf.mxu0  ;;  %v4034_v50 = vpop.f32.mrf.mxu1  ;;  %v4400_v46 = vmul.f32 %v8064_v25, %v8064_v25  ;;  %v4457_v4 = vadd.f32 %v4456_v20, %v4398_v44  ;;  %v4494_v29 = vadd.f32 %v4493_v8, %v4399_v43  ;;  %v4297_v2 = vadd.f32 %v4296_v28, %v8064_v25 }
 0x814   : > { %4240 = vst [vmem:[%s6605_s7 + $0x58] sm:$0xff] %v8078_v59  ;;  %4264 = vst [vmem:[%s6605_s7 + $0x118] sm:$0xff] %v8080_v38  ;;  %v4177_v19 = vadd.f32 %v4113_v53, %v3973_v35  ;;  %v8094_v27 = vadd.f32 %v4137_v18, %v4033_v57  ;;  %v3975_v17 = vadd.f32 %v3974_v31, %v8005_v45 }
 0x815   : > { %v4035_v26 = vadd.f32 %v4034_v50, %v8005_v45  ;;  %v3976_v36 = vpop.f32.mrf.mxu0  ;;  %v4036_v34 = vpop.f32.mrf.mxu1  ;;  %v4401_v16 = vmul.f32 %v8078_v59, %v8078_v59  ;;  %v4458_v57 = vadd.f32 %v4457_v4, %v4400_v46  ;;  %v4334_v31 = vadd.f32 %v4333_v47, %v8078_v59 }
 0x816   : > { %v3977_v48 = vadd.f32 %v3976_v36, %v8003_v63  ;;  %v4037_v39 = vadd.f32 %v4036_v34, %v8003_v63  ;;  %4241 = vst [vmem:[%s6605_s7 + $0x60] sm:$0xff] %v4177_v19  ;;  %4265 = vst [vmem:[%s6605_s7 + $0x120] sm:$0xff] %v8094_v27  ;;  %v4178_v24 = vadd.f32 %v4114_v10, %v3975_v17  ;;  %v4143_v36 = vld [vmem:[#allocation2 + $0x150] sm:$0xff] }
 0x817   : > { %v3978_v58 = vpop.f32.mrf.mxu0  ;;  %v4038_v55 = vpop.f32.mrf.mxu1  ;;  %v8109_v54 = vadd.f32 %v4138_v32, %v4035_v26  ;;  %v4402_v53 = vmul.f32 %v4177_v19, %v4177_v19  ;;  %v4298_v50 = vadd.f32 %v4297_v2, %v4177_v19  ;;  %v4119_v32 = vld [vmem:[#allocation2 + $0x90] sm:$0xff]  ;;  %v4495_v44 = vadd.f32 %v4494_v29, %v4401_v16 }
 0x818   : > { %v4179_v56 = vadd.f32 %v4115_v60, %v3977_v48  ;;  %v8111_v11 = vadd.f32 %v4139_v42, %v4037_v39  ;;  %v3979_v41 = vadd.f32 %v3978_v58, %v8005_v45  ;;  %4242 = vst [vmem:[%s6605_s7 + $0x68] sm:$0xff] %v4178_v24  ;;  %v4039_v33 = vadd.f32 %v4038_v55, %v8005_v45 }
 0x819   : > { %v3982_v12 = vpop.f32.mrf.mxu0  ;;  %v4042_v23 = vpop.f32.mrf.mxu1  ;;  %4266 = vst [vmem:[%s6605_s7 + $0x128] sm:$0xff] %v8109_v54  ;;  %v4403_v59 = vmul.f32 %v4178_v24, %v4178_v24  ;;  %v4459_v43 = vadd.f32 %v4458_v57, %v4402_v53  ;;  %v4335_v48 = vadd.f32 %v4334_v31, %v4178_v24  ;;  %v4145_v24 = vld [vmem:[#allocation2 + $0x160] sm:$0xff] }
 0x81a   : > { %4243 = vst [vmem:[%s6605_s7 + $0x70] sm:$0xff] %v4179_v56  ;;  %4267 = vst [vmem:[%s6605_s7 + $0x130] sm:$0xff] %v8111_v11  ;;  %v4180_v5 = vadd.f32 %v4116_v1, %v3979_v41  ;;  %v8127_v49 = vadd.f32 %v4140_v21, %v4039_v33  ;;  %v3983_v14 = vadd.f32 %v3982_v12, %v8003_v63  ;;  %v4144_v41 = vld [vmem:[#allocation2 + $0x158] sm:$0xff]  ;;  %v4121_v21 = vld [vmem:[#allocation2 + $0xa0] sm:$0xff] }
 0x81b   : > { %v3984_v52 = vpop.f32.mrf.mxu0  ;;  %v4044_v25 = vpop.f32.mrf.mxu1  ;;  %v4043_v18 = vadd.f32 %v4042_v23, %v8003_v63  ;;  %v4404_v19 = vmul.f32 %v4179_v56, %v4179_v56  ;;  %v4299_v39 = vadd.f32 %v4298_v50, %v4179_v56  ;;  %v4496_v4 = vadd.f32 %v4495_v44, %v4403_v59 }
 0x81c   : > { %v3985_v9 = vadd.f32 %v3984_v52, %v8005_v45  ;;  %v4045_v35 = vadd.f32 %v4044_v25, %v8005_v45  ;;  %4244 = vst [vmem:[%s6605_s7 + $0x78] sm:$0xff] %v4180_v5  ;;  %4268 = vst [vmem:[%s6605_s7 + $0x138] sm:$0xff] %v8127_v49  ;;  %v4181_v51 = vadd.f32 %v4117_v61, %v3983_v14  ;;  %v4122_v25 = vld [vmem:[#allocation2 + $0xa8] sm:$0xff] }
 0x81d   : > { %v3986_v6 = vpop.f32.mrf.mxu0  ;;  %v4046_v30 = vpop.f32.mrf.mxu1  ;;  %v8137_v20 = vadd.f32 %v4141_v37, %v4043_v18  ;;  %v4405_v8 = vmul.f32 %v4180_v5, %v4180_v5  ;;  %v4460_v47 = vadd.f32 %v4459_v43, %v4404_v19  ;;  %v4336_v29 = vadd.f32 %v4335_v48, %v4180_v5  ;;  %v4147_v19 = vld [vmem:[#allocation2 + $0x170] sm:$0xff] }
 0x81e   : > { %v4182_v10 = vadd.f32 %v4118_v13, %v3985_v9  ;;  %v8139_v17 = vadd.f32 %v4142_v3, %v4045_v35  ;;  %v3987_v26 = vadd.f32 %v3986_v6, %v8003_v63  ;;  %4245 = vst [vmem:[%s6605_s7 + $0x80] sm:$0xff] %v4181_v51  ;;  %v4047_v60 = vadd.f32 %v4046_v30, %v8003_v63  ;;  %v4146_v3 = vld [vmem:[#allocation2 + $0x168] sm:$0xff]  ;;  %v4123_v30 = vld [vmem:[#allocation2 + $0xb0] sm:$0xff] }
 0x81f   : > { %v3988_v34 = vpop.f32.mrf.mxu0  ;;  %v4048_v42 = vpop.f32.mrf.mxu1  ;;  %4269 = vst [vmem:[%s6605_s7 + $0x140] sm:$0xff] %v8137_v20  ;;  %v4406_v56 = vmul.f32 %v4181_v51, %v4181_v51  ;;  %v4497_v57 = vadd.f32 %v4496_v4, %v4405_v8  ;;  %v4300_v31 = vadd.f32 %v4299_v39, %v4181_v51 }
 0x820   : > { %4246 = vst [vmem:[%s6605_s7 + $0x88] sm:$0xff] %v4182_v10  ;;  %4270 = vst [vmem:[%s6605_s7 + $0x148] sm:$0xff] %v8139_v17  ;;  %v4183_v28 = vadd.f32 %v4119_v32, %v3987_v26  ;;  %v8149_v58 = vadd.f32 %v4143_v36, %v4047_v60  ;;  %v3989_v55 = vadd.f32 %v3988_v34, %v8005_v45  ;;  %v4124_v34 = vld [vmem:[#allocation2 + $0xb8] sm:$0xff] }
 0x821   : > { %v3992_v1 = vpop.f32.mrf.mxu0  ;;  %v4052_v46 = vpop.f32.mrf.mxu1  ;;  %v4049_v33 = vadd.f32 %v4048_v42, %v8005_v45  ;;  %v4407_v53 = vmul.f32 %v4182_v10, %v4182_v10  ;;  %v4461_v50 = vadd.f32 %v4460_v47, %v4406_v56  ;;  %v4337_v6 = vadd.f32 %v4336_v29, %v4182_v10  ;;  %v4148_v42 = vld [vmem:[#allocation2 + $0x178] sm:$0xff] }
 0x822   : > { %v3993_v12 = vadd.f32 %v3992_v1, %v8003_v63  ;;  %v4053_v23 = vadd.f32 %v4052_v46, %v8003_v63  ;;  %4247 = vst [vmem:[%s6605_s7 + $0x90] sm:$0xff] %v4183_v28  ;;  %4271 = vst [vmem:[%s6605_s7 + $0x150] sm:$0xff] %v8149_v58  ;;  %v4184_v2 = vadd.f32 %v4120_v0, %v3989_v55 }
 0x823   : > { %v3994_v61 = vpop.f32.mrf.mxu0  ;;  %v4054_v16 = vpop.f32.mrf.mxu1  ;;  %v8158_v14 = vadd.f32 %v4144_v41, %v4049_v33  ;;  %v4408_v5 = vmul.f32 %v4183_v28, %v4183_v28  ;;  %v4498_v39 = vadd.f32 %v4497_v57, %v4407_v53  ;;  %v4301_v0 = vadd.f32 %v4300_v31, %v4183_v28  ;;  %v4125_v33 = vld [vmem:[#allocation2 + $0xc0] sm:$0xff] }
 0x824   : > { %v4185_v37 = vadd.f32 %v4121_v21, %v3993_v12  ;;  %v8160_v52 = vadd.f32 %v4145_v24, %v4053_v23  ;;  %v3995_v13 = vadd.f32 %v3994_v61, %v8005_v45  ;;  %4248 = vst [vmem:[%s6605_s7 + $0x98] sm:$0xff] %v4184_v2  ;;  %v4055_v18 = vadd.f32 %v4054_v16, %v8005_v45  ;;  %v4149_v12 = vld [vmem:[#allocation2 + $0x180] sm:$0xff] }
 0x825   : > { %v3996_v9 = vpop.f32.mrf.mxu0  ;;  %v4056_v35 = vpop.f32.mrf.mxu1  ;;  %4272 = vst [vmem:[%s6605_s7 + $0x158] sm:$0xff] %v8158_v14  ;;  %v4409_v26 = vmul.f32 %v4184_v2, %v4184_v2  ;;  %v4462_v8 = vadd.f32 %v4461_v50, %v4408_v5  ;;  %v4338_v29 = vadd.f32 %v4337_v6, %v4184_v2  ;;  %v4127_v2 = vld [vmem:[#allocation2 + $0xd0] sm:$0xff] }
 0x826   : > { %4249 = vst [vmem:[%s6605_s7 + $0xa0] sm:$0xff] %v4185_v37  ;;  %4273 = vst [vmem:[%s6605_s7 + $0x160] sm:$0xff] %v8160_v52  ;;  %v4186_v32 = vadd.f32 %v4122_v25, %v3995_v13  ;;  %v8170_v36 = vadd.f32 %v4146_v3, %v4055_v18  ;;  %v3997_v59 = vadd.f32 %v3996_v9, %v8003_v63  ;;  %v4126_v25 = vld [vmem:[#allocation2 + $0xc8] sm:$0xff] }
 0x827   : > { %v3998_v60 = vpop.f32.mrf.mxu0  ;;  %v4058_v51 = vpop.f32.mrf.mxu1  ;;  %v4410_v10 = vmul.f32 %v4185_v37, %v4185_v37  ;;  %v4057_v44 = vadd.f32 %v4056_v35, %v8003_v63  ;;  %v4499_v61 = vadd.f32 %v4498_v39, %v4409_v26  ;;  %v4302_v16 = vadd.f32 %v4301_v0, %v4185_v37  ;;  %v4150_v9 = vld [vmem:[#allocation2 + $0x188] sm:$0xff]  ;;  %v4151_v37 = vld [vmem:[#allocation2 + $0x190] sm:$0xff] }
 0x828   : > { %v3999_v43 = vadd.f32 %v3998_v60, %v8005_v45  ;;  %v4059_v48 = vadd.f32 %v4058_v51, %v8005_v45  ;;  %4250 = vst [vmem:[%s6605_s7 + $0xa8] sm:$0xff] %v4186_v32  ;;  %4274 = vst [vmem:[%s6605_s7 + $0x168] sm:$0xff] %v8170_v36  ;;  %v4187_v55 = vadd.f32 %v4123_v30, %v3997_v59 }
 0x829   : > { %v4002_v41 = vpop.f32.mrf.mxu0  ;;  %v4062_v1 = vpop.f32.mrf.mxu1  ;;  %v8179_v21 = vadd.f32 %v4147_v19, %v4057_v44  ;;  %v4411_v28 = vmul.f32 %v4186_v32, %v4186_v32  ;;  %v4463_v13 = vadd.f32 %v4462_v8, %v4410_v10  ;;  %v4339_v26 = vadd.f32 %v4338_v29, %v4186_v32  ;;  %v4152_v32 = vld [vmem:[#allocation2 + $0x198] sm:$0xff]  ;;  %v4153_v29 = vld [vmem:[#allocation2 + $0x1a0] sm:$0xff] }
 0x82a   : > { %v4188_v46 = vadd.f32 %v4124_v34, %v3999_v43  ;;  %v8181_v24 = vadd.f32 %v4148_v42, %v4059_v48  ;;  %v4003_v56 = vadd.f32 %v4002_v41, %v8003_v63  ;;  %4251 = vst [vmem:[%s6605_s7 + $0xb0] sm:$0xff] %v4187_v55  ;;  %v4063_v23 = vadd.f32 %v4062_v1, %v8003_v63  ;;  %v4128_v48 = vld [vmem:[#allocation2 + $0xd8] sm:$0xff] }
 0x82b   : > { %v4004_v4 = vpop.f32.mrf.mxu0  ;;  %v4064_v47 = vpop.f32.mrf.mxu1  ;;  %4275 = vst [vmem:[%s6605_s7 + $0x170] sm:$0xff] %v8179_v21  ;;  %v4412_v3 = vmul.f32 %v4187_v55, %v4187_v55  ;;  %v4500_v59 = vadd.f32 %v4499_v61, %v4411_v28  ;;  %v4303_v19 = vadd.f32 %v4302_v16, %v4187_v55  ;;  %v4130_v16 = vld [vmem:[#allocation2 + $0xe8] sm:$0xff] }
 0x82c   : > { %4252 = vst [vmem:[%s6605_s7 + $0xb8] sm:$0xff] %v4188_v46  ;;  %4276 = vst [vmem:[%s6605_s7 + $0x178] sm:$0xff] %v8181_v24  ;;  %v4189_v53 = vadd.f32 %v4125_v33, %v4003_v56  ;;  %v8191_v5 = vadd.f32 %v4149_v12, %v4063_v23  ;;  %v4005_v18 = vadd.f32 %v4004_v4, %v8005_v45  ;;  %v4129_v12 = vld [vmem:[#allocation2 + $0xe0] sm:$0xff] }
 0x82d   : > { %v4006_v35 = vpop.f32.mrf.mxu0  ;;  %v4066_v57 = vpop.f32.mrf.mxu1  ;;  %v4413_v31 = vmul.f32 %v4188_v46, %v4188_v46  ;;  %v4065_v50 = vadd.f32 %v4064_v47, %v8005_v45  ;;  %v4464_v41 = vadd.f32 %v4463_v13, %v4412_v3  ;;  %v4340_v1 = vadd.f32 %v4339_v26, %v4188_v46  ;;  %v4154_v13 = vld [vmem:[#allocation2 + $0x1a8] sm:$0xff] }
 0x82e   : > { %v4007_v6 = vadd.f32 %v4006_v35, %v8003_v63  ;;  %v4067_v30 = vadd.f32 %v4066_v57, %v8003_v63  ;;  %4253 = vst [vmem:[%s6605_s7 + $0xc0] sm:$0xff] %v4189_v53  ;;  %4277 = vst [vmem:[%s6605_s7 + $0x180] sm:$0xff] %v8191_v5  ;;  %v4190_v60 = vadd.f32 %v4126_v25, %v4005_v18 }
 0x82f   : > { %v4008_v34 = vpop.f32.mrf.mxu0  ;;  %v4068_v51 = vpop.f32.mrf.mxu1  ;;  %v8200_v42 = vadd.f32 %v4150_v9, %v4065_v50  ;;  %v4414_v39 = vmul.f32 %v4189_v53, %v4189_v53  ;;  %v4501_v56 = vadd.f32 %v4500_v59, %v4413_v31  ;;  %v4304_v33 = vadd.f32 %v4303_v19, %v4189_v53  ;;  %v4131_v59 = vld [vmem:[#allocation2 + $0xf0] sm:$0xff] }
 0x830   : > { %v4191_v10 = vadd.f32 %v4127_v2, %v4007_v6  ;;  %v8202_v44 = vadd.f32 %v4151_v37, %v4067_v30  ;;  %v4009_v43 = vadd.f32 %v4008_v34, %v8005_v45  ;;  %4254 = vst [vmem:[%s6605_s7 + $0xc8] sm:$0xff] %v4190_v60  ;;  %v4069_v0 = vadd.f32 %v4068_v51, %v8005_v45  ;;  %v4155_v19 = vld [vmem:[#allocation2 + $0x1b0] sm:$0xff] }
 0x831   : > { %v4012_v8 = vpop.f32.mrf.mxu0  ;;  %v4072_v55 = vpop.f32.mrf.mxu1  ;;  %4278 = vst [vmem:[%s6605_s7 + $0x188] sm:$0xff] %v8200_v42  ;;  %v4415_v28 = vmul.f32 %v4190_v60, %v4190_v60  ;;  %v4465_v9 = vadd.f32 %v4464_v41, %v4414_v39  ;;  %v4341_v35 = vadd.f32 %v4340_v1, %v4190_v60  ;;  %v4422_v60 = vmul.f32 %v8044_v22, %v8044_v22  ;;  %v4132_v41 = vld [vmem:[#allocation2 + $0xf8] sm:$0xff] }
 0x832   : > { %4255 = vst [vmem:[%s6605_s7 + $0xd0] sm:$0xff] %v4191_v10  ;;  %4279 = vst [vmem:[%s6605_s7 + $0x190] sm:$0xff] %v8202_v44  ;;  %v4192_v23 = vadd.f32 %v4128_v48, %v4009_v43  ;;  %v8212_v4 = vadd.f32 %v4152_v32, %v4069_v0  ;;  %v4013_v47 = vadd.f32 %v4012_v8, %v8003_v63 }
 0x833   : > { %v4014_v61 = vpop.f32.mrf.mxu0  ;;  %v4074_v46 = vpop.f32.mrf.mxu1  ;;  %v4416_v25 = vmul.f32 %v4191_v10, %v4191_v10  ;;  %v4073_v3 = vadd.f32 %v4072_v55, %v8003_v63  ;;  %v4305_v34 = vadd.f32 %v4304_v33, %v4191_v10  ;;  %v4502_v39 = vadd.f32 %v4501_v56, %v4415_v28  ;;  %v4157_v56 = vld [vmem:[#allocation2 + $0x1c0] sm:$0xff] }
 0x834   : > { %v4015_v53 = vadd.f32 %v4014_v61, %v8005_v45  ;;  %v4075_v18 = vadd.f32 %v4074_v46, %v8005_v45  ;;  %4256 = vst [vmem:[%s6605_s7 + $0xd8] sm:$0xff] %v4192_v23  ;;  %v4417_v2 = vmul.f32 %v4192_v23, %v4192_v23  ;;  %4280 = vst [vmem:[%s6605_s7 + $0x198] sm:$0xff] %v8212_v4 }
 0x835   : > { %v4193_v57 = vadd.f32 %v4129_v12, %v4013_v47  ;;  %v4016_v37 = vpop.f32.mrf.mxu0  ;;  %v4076_v31 = vpop.f32.mrf.mxu1  ;;  %v8221_v50 = vadd.f32 %v4153_v29, %v4073_v3  ;;  %v4466_v0 = vadd.f32 %v4465_v9, %v4416_v25  ;;  %v4342_v8 = vadd.f32 %v4341_v35, %v4192_v23  ;;  %v4156_v47 = vld [vmem:[#allocation2 + $0x1b8] sm:$0xff] }
 0x836   : > { %v4194_v6 = vadd.f32 %v4130_v16, %v4015_v53  ;;  %v8223_v30 = vadd.f32 %v4154_v13, %v4075_v18  ;;  %v4017_v26 = vadd.f32 %v4016_v37, %v8003_v63  ;;  %v4077_v43 = vadd.f32 %v4076_v31, %v8003_v63  ;;  %v4158_v18 = vld [vmem:[#allocation2 + $0x1c8] sm:$0xff] }
 0x837   : > { %4257 = vst [vmem:[%s6605_s7 + $0xe0] sm:$0xff] %v4193_v57  ;;  %v4418_v51 = vmul.f32 %v4193_v57, %v4193_v57  ;;  %v4018_v48 = vpop.f32.mrf.mxu0  ;;  %v4078_v32 = vpop.f32.mrf.mxu1  ;;  %4281 = vst [vmem:[%s6605_s7 + $0x1a0] sm:$0xff] %v8221_v50  ;;  %v4306_v1 = vadd.f32 %v4305_v34, %v4193_v57  ;;  %v4503_v28 = vadd.f32 %v4502_v39, %v4417_v2 }
 0x838   : > { %4258 = vst [vmem:[%s6605_s7 + $0xe8] sm:$0xff] %v4194_v6  ;;  %v4419_v55 = vmul.f32 %v4194_v6, %v4194_v6  ;;  %4282 = vst [vmem:[%s6605_s7 + $0x1a8] sm:$0xff] %v8223_v30  ;;  %v4195_v10 = vadd.f32 %v4131_v59, %v4017_v26  ;;  %v8235_v33 = vadd.f32 %v4155_v19, %v4077_v43  ;;  %v4159_v19 = vld [vmem:[#allocation2 + $0x1d0] sm:$0xff] }
 0x839   : > { %v4019_v12 = vadd.f32 %v4018_v48, %v8005_v45  ;;  %v4082_v29 = vpop.f32.mrf.mxu1  ;;  %v4343_v23 = vadd.f32 %v4342_v8, %v4194_v6  ;;  %v4079_v61 = vadd.f32 %v4078_v32, %v8005_v45  ;;  %v4467_v46 = vadd.f32 %v4466_v0, %v4418_v51 }
 0x83a   : > { %v4083_v16 = vadd.f32 %v4082_v29, %v8003_v63  ;;  %4259 = vst [vmem:[%s6605_s7 + $0xf0] sm:$0xff] %v4195_v10  ;;  %v4307_v13 = vadd.f32 %v4306_v1, %v4195_v10  ;;  %v4420_v25 = vmul.f32 %v4195_v10, %v4195_v10  ;;  %4283 = vst [vmem:[%s6605_s7 + $0x1b0] sm:$0xff] %v8235_v33 }
 0x83b   : > { %v4196_v3 = vadd.f32 %v4132_v41, %v4019_v12  ;;  %v4084_v53 = vpop.f32.mrf.mxu1  ;;  %v4504_v9 = vadd.f32 %v4503_v28, %v4419_v55  ;;  %v8243_v35 = vadd.f32 %v4156_v47, %v4079_v61  ;;  %v4423_v34 = vmul.f32 %v8059_v62, %v8059_v62  ;;  %v4160_v55 = vld [vmem:[#allocation2 + $0x1d8] sm:$0xff] }
 0x83c   : > { %v8245_v2 = vadd.f32 %v4157_v56, %v4083_v16  ;;  %v4085_v57 = vadd.f32 %v4084_v53, %v8005_v45  ;;  %v4308_v37 = vadd.f32 %v4307_v13, %v8044_v22  ;;  %v4468_v31 = vadd.f32 %v4467_v46, %v4420_v25  ;;  %v4161_v56 = vld [vmem:[#allocation2 + $0x1e0] sm:$0xff] }
 0x83d   : > { %4260 = vst [vmem:[%s6605_s7 + $0xf8] sm:$0xff] %v4196_v3  ;;  %v4344_v6 = vadd.f32 %v4343_v23, %v4196_v3  ;;  %v4421_v26 = vmul.f32 %v4196_v3, %v4196_v3  ;;  %v4086_v59 = vpop.f32.mrf.mxu1  ;;  %v4424_v51 = vmul.f32 %v8073_v15, %v8073_v15  ;;  %4284 = vst [vmem:[%s6605_s7 + $0x1b8] sm:$0xff] %v8243_v35  ;;  %v4162_v3 = vld [vmem:[#allocation2 + $0x1e8] sm:$0xff] }
 0x83e   : > { %4285 = vst [vmem:[%s6605_s7 + $0x1c0] sm:$0xff] %v8245_v2  ;;  %v8258_v43 = vadd.f32 %v4158_v18, %v4085_v57  ;;  %v4087_v22 = vadd.f32 %v4086_v59, %v8003_v63  ;;  %v4309_v48 = vadd.f32 %v4308_v37, %v8073_v15  ;;  %v4469_v32 = vadd.f32 %v4468_v31, %v4422_v60 }
 0x83f   : > { %v4345_v39 = vadd.f32 %v4344_v6, %v8059_v62  ;;  %v4505_v0 = vadd.f32 %v4504_v9, %v4421_v26  ;;  %v4088_v8 = vpop.f32.mrf.mxu1  ;;  %v4425_v41 = vmul.f32 %v8080_v38, %v8080_v38  ;;  %v4426_v1 = vmul.f32 %v8094_v27, %v8094_v27  ;;  %v4163_v26 = vld [vmem:[#allocation2 + $0x1f0] sm:$0xff] }
 0x840   : > { %4286 = vst [vmem:[%s6605_s7 + $0x1c8] sm:$0xff] %v8258_v43  ;;  %v8269_v10 = vadd.f32 %v4159_v19, %v4087_v22  ;;  %v4089_v12 = vadd.f32 %v4088_v8, %v8005_v45  ;;  %v4310_v15 = vadd.f32 %v4309_v48, %v8094_v27  ;;  %v4470_v60 = vadd.f32 %v4469_v32, %v4424_v51 }
 0x841   : > { %v4346_v62 = vadd.f32 %v4345_v39, %v8080_v38  ;;  %v4506_v47 = vadd.f32 %v4505_v0, %v4423_v34  ;;  %v4092_v29 = vpop.f32.mrf.mxu1  ;;  %v4427_v28 = vmul.f32 %v8109_v54, %v8109_v54  ;;  %v4428_v23 = vmul.f32 %v8111_v11, %v8111_v11  ;;  %v4164_v39 = vld [vmem:[#allocation2 + $0x1f8] sm:$0xff] }
 0x842   : > { %4287 = vst [vmem:[%s6605_s7 + $0x1d0] sm:$0xff] %v8269_v10  ;;  %v8280_v61 = vadd.f32 %v4160_v55, %v4089_v12  ;;  %v4093_v16 = vadd.f32 %v4092_v29, %v8003_v63  ;;  %v4311_v27 = vadd.f32 %v4310_v15, %v8111_v11  ;;  %v4471_v46 = vadd.f32 %v4470_v60, %v4426_v1 }
 0x843   : > { %v4347_v38 = vadd.f32 %v4346_v62, %v8109_v54  ;;  %v4507_v13 = vadd.f32 %v4506_v47, %v4425_v41  ;;  %v4094_v25 = vpop.f32.mrf.mxu1  ;;  %v4429_v53 = vmul.f32 %v8127_v49, %v8127_v49  ;;  %v4430_v18 = vmul.f32 %v8137_v20, %v8137_v20 }
 0x844   : > { %4288 = vst [vmem:[%s6605_s7 + $0x1d8] sm:$0xff] %v8280_v61  ;;  %v8291_v9 = vadd.f32 %v4161_v56, %v4093_v16  ;;  %v4095_v57 = vadd.f32 %v4094_v25, %v8005_v45  ;;  %v4312_v11 = vadd.f32 %v4311_v27, %v8137_v20  ;;  %v4472_v37 = vadd.f32 %v4471_v46, %v4428_v23 }
 0x845   : > { %v4348_v54 = vadd.f32 %v4347_v38, %v8127_v49  ;;  %v4508_v31 = vadd.f32 %v4507_v13, %v4427_v28  ;;  %v4096_v6 = vpop.f32.mrf.mxu1  ;;  %v4431_v59 = vmul.f32 %v8139_v17, %v8139_v17  ;;  %v4432_v19 = vmul.f32 %v8149_v58, %v8149_v58 }
 0x846   : > { %4289 = vst [vmem:[%s6605_s7 + $0x1e0] sm:$0xff] %v8291_v9  ;;  %v8302_v34 = vadd.f32 %v4162_v3, %v4095_v57  ;;  %v4097_v51 = vadd.f32 %v4096_v6, %v8003_v63  ;;  %v4473_v20 = vadd.f32 %v4472_v37, %v4430_v18  ;;  %v4313_v22 = vadd.f32 %v4312_v11, %v8149_v58 }
 0x847   : > { %v4349_v49 = vadd.f32 %v4348_v54, %v8139_v17  ;;  %v4509_v48 = vadd.f32 %v4508_v31, %v4429_v53  ;;  %v4098_v32 = vpop.f32.mrf.mxu1  ;;  %v4433_v0 = vmul.f32 %v8158_v14, %v8158_v14  ;;  %v4434_v8 = vmul.f32 %v8160_v52, %v8160_v52 }
 0x848   : > { %4290 = vst [vmem:[%s6605_s7 + $0x1e8] sm:$0xff] %v8302_v34  ;;  %v4227_v55 = vadd.f32 %v4163_v26, %v4097_v51  ;;  %v4099_v63 = vadd.f32 %v4098_v32, %v8005_v45  ;;  %v4314_v58 = vadd.f32 %v4313_v22, %v8160_v52  ;;  %v4474_v41 = vadd.f32 %v4473_v20, %v4432_v19 }
 0x849   : > { %v4510_v1 = vadd.f32 %v4509_v48, %v4431_v59  ;;  %v4350_v17 = vadd.f32 %v4349_v49, %v8158_v14  ;;  %v4435_v12 = vmul.f32 %v8170_v36, %v8170_v36  ;;  %v4436_v15 = vmul.f32 %v8179_v21, %v8179_v21 }
 0x84a   : > { %4291 = vst [vmem:[%s6605_s7 + $0x1f0] sm:$0xff] %v4227_v55  ;;  %v4228_v60 = vadd.f32 %v4164_v39, %v4099_v63  ;;  %v4315_v62 = vadd.f32 %v4314_v58, %v8179_v21  ;;  %v4475_v47 = vadd.f32 %v4474_v41, %v4434_v8  ;;  %v4437_v52 = vmul.f32 %v8181_v24, %v8181_v24 }
 0x84b   : > { %v4351_v29 = vadd.f32 %v4350_v17, %v8170_v36  ;;  %v4511_v45 = vadd.f32 %v4510_v1, %v4433_v0  ;;  %v4438_v14 = vmul.f32 %v8191_v5, %v8191_v5  ;;  %v4439_v21 = vmul.f32 %v8200_v42, %v8200_v42 }
 0x84c   : > { %4292 = vst [vmem:[%s6605_s7 + $0x1f8] sm:$0xff] %v4228_v60  ;;  %v4316_v56 = vadd.f32 %v4315_v62, %v8191_v5  ;;  %v4476_v28 = vadd.f32 %v4475_v47, %v4436_v15  ;;  %v4440_v36 = vmul.f32 %v8202_v44, %v8202_v44  ;;  %v4441_v25 = vmul.f32 %v8212_v4, %v8212_v4 }
 0x84d   : > { %v4352_v23 = vadd.f32 %v4351_v29, %v8181_v24  ;;  %v4512_v16 = vadd.f32 %v4511_v45, %v4435_v12  ;;  %v4442_v5 = vmul.f32 %v8221_v50, %v8221_v50  ;;  %v4443_v57 = vmul.f32 %v8223_v30, %v8223_v30 }
 0x84e   : > { %v4317_v27 = vadd.f32 %v4316_v56, %v8202_v44  ;;  %v4477_v46 = vadd.f32 %v4476_v28, %v4438_v14  ;;  %v4444_v44 = vmul.f32 %v8235_v33, %v8235_v33  ;;  %v4445_v31 = vmul.f32 %v8243_v35, %v8243_v35 }
 0x84f   : > { %v4353_v38 = vadd.f32 %v4352_v23, %v8200_v42  ;;  %v4513_v13 = vadd.f32 %v4512_v16, %v4437_v52  ;;  %v4447_v19 = vmul.f32 %v8258_v43, %v8258_v43  ;;  %v4449_v49 = vmul.f32 %v8280_v61, %v8280_v61 }
 0x850   : > { %v4318_v24 = vadd.f32 %v4317_v27, %v8221_v50  ;;  %v4478_v3 = vadd.f32 %v4477_v46, %v4440_v36  ;;  %v4446_v50 = vmul.f32 %v8245_v2, %v8245_v2  ;;  %v4451_v0 = vmul.f32 %v8302_v34, %v8302_v34 }
 0x851   : > { %v4354_v53 = vadd.f32 %v4353_v38, %v8212_v4  ;;  %v4514_v18 = vadd.f32 %v4513_v13, %v4439_v21  ;;  %v4452_v8 = vmul.f32 %v4227_v55, %v4227_v55  ;;  %v4453_v41 = vmul.f32 %v4228_v60, %v4228_v60 }
 0x852   : > { %v4319_v42 = vadd.f32 %v4318_v24, %v8235_v33  ;;  %v4479_v11 = vadd.f32 %v4478_v3, %v4442_v5  ;;  %v4448_v33 = vmul.f32 %v8269_v10, %v8269_v10  ;;  %v6291_v45 = vmov 1966171168  }
 0x853   : > { %v4355_v37 = vadd.f32 %v4354_v53, %v8223_v30  ;;  %v4515_v54 = vadd.f32 %v4514_v18, %v4441_v25 }
 0x854   : > { %v4480_v4 = vadd.f32 %v4479_v11, %v4444_v44  ;;  %v4320_v59 = vadd.f32 %v4319_v42, %v8245_v2 }
 0x855   : > { %v4356_v6 = vadd.f32 %v4355_v37, %v8243_v35  ;;  %v4516_v26 = vadd.f32 %v4515_v54, %v4443_v57  ;;  %v4450_v35 = vmul.f32 %v8291_v9, %v8291_v9 }
 0x856   : > { %v4481_v51 = vadd.f32 %v4480_v4, %v4446_v50  ;;  %v4321_v22 = vadd.f32 %v4320_v59, %v8269_v10 }
 0x857   : > { %v4517_v30 = vadd.f32 %v4516_v26, %v4445_v31  ;;  %v4357_v20 = vadd.f32 %v4356_v6, %v8258_v43 }
 0x858   : > { %v4482_v2 = vadd.f32 %v4481_v51, %v4448_v33  ;;  %v4322_v39 = vadd.f32 %v4321_v22, %v8291_v9  ;;  %v4371_v9 = vunpack.c.l.s4 %v6291_v45 }
 0x859   : > { %v4518_v48 = vadd.f32 %v4517_v30, %v4447_v19  ;;  %v4358_v32 = vadd.f32 %v4357_v20, %v8280_v61 }
 0x85a   : > { %v4483_v43 = vadd.f32 %v4482_v2, %v4450_v35  ;;  %v4323_v58 = vadd.f32 %v4322_v39, %v4227_v55  ;;  %v4372_v55 = vunpack.c.0.s8 %v4371_v9 }
 0x85b   : > { %v4519_v63 = vadd.f32 %v4518_v48, %v4449_v49  ;;  %v4359_v10 = vadd.f32 %v4358_v32, %v8302_v34 }
 0x85c   : > { %v4324_v17 = vrot.slane %v4323_v58, 4  ;;  %v4484_v12 = vadd.f32 %v4483_v43, %v4452_v8  ;;  %v4375_v3 = vsub.s32 %v4372_v55, %v7996_v7 }
 0x85d   : > { %v4520_v1 = vadd.f32 %v4519_v63, %v4451_v0  ;;  %v4360_v15 = vadd.f32 %v4359_v10, %v4228_v60 }
 0x85e   : > { %v4325_v62 = vadd.f32 %v4324_v17, %v4323_v58  ;;  %v4485_v47 = vrot.slane %v4484_v12, 4 }
 0x85f   : > { %v4361_v29 = vrot.slane %v4360_v15, 4  ;;  %v4521_v61 = vadd.f32 %v4520_v1, %v4453_v41 }
 0x860   : > { %v4326_v52 = vrot.slane %v4325_v62, 2  ;;  %v4486_v14 = vadd.f32 %v4485_v47, %v4484_v12 }
 0x861   : > { %v4362_v56 = vadd.f32 %v4361_v29, %v4360_v15  ;;  %v4522_v28 = vrot.slane %v4521_v61, 4 }
 0x862   : > { %v4327_v23 = vadd.f32 %v4326_v52, %v4325_v62  ;;  %v4487_v16 = vrot.slane %v4486_v14, 2 }
 0x863   : > { %v4363_v21 = vrot.slane %v4362_v56, 2  ;;  %v4523_v34 = vadd.f32 %v4522_v28, %v4521_v61 }
 0x864   : > { %v4328_v36 = vrot.slane %v4327_v23, 1  ;;  %v4488_v27 = vadd.f32 %v4487_v16, %v4486_v14 }
 0x865   : > { %v4364_v46 = vadd.f32 %v4363_v21, %v4362_v56  ;;  %v4524_v38 = vrot.slane %v4523_v34, 2 }
 0x866   : > { %v4489_v60 = vrot.slane %v4488_v27, 1  ;;  %v4329_v5 = vadd.f32 %v4328_v36, %v4327_v23 }
 0x867   : > { %v4365_v13 = vrot.slane %v4364_v46, 1  ;;  %v4525_v25 = vadd.f32 %v4524_v38, %v4523_v34 }
 0x868   : > { %v4490_v18 = vadd.f32 %v4489_v60, %v4488_v27 }
 0x869   : > { %v4366_v24 = vadd.f32 %v4365_v13, %v4364_v46  ;;  %v4526_v53 = vrot.slane %v4525_v25, 1 }
 0x86b   : > { %v4369_v57 = vcombine.low %v4329_v5, %v4366_v24  ;;  %v4527_v44 = vadd.f32 %v4526_v53, %v4525_v25 }
 0x86d   : > { %v4376_v42 = vrot.slane %v4369_v57, %v4375_v3  ;;  %v4530_v11 = vcombine.low %v4490_v18, %v4527_v44 }
 0x86f   : > { %v4383_v37 = vrot.slane %v4376_v42, %v4375_v3  ;;  %v4537_v54 = vrot.slane %v4530_v11, %v4375_v3 }
 0x871   : > { %4389 = vst.msk [vmem:[%s6607_s8] sm:$0x3] %vm4387_vm2, %v4383_v37  ;;  %v4544_v31 = vrot.slane %v4537_v54, %v4375_v3 }
 0x873   : > { %4546 = vst.msk [vmem:[%s6609_s18] sm:$0x3] %vm4387_vm2, %v4544_v31 }
 0x874 PF: > { %s8683_s16 = sld [smem:[#allocation29_spill]]  ;;  %s4588_s21 = sshll.u32 %s6607_s8, 4  ;;  %s4589_s21 = int_to_ptr.vmem [resolvable:$true] %s4588_s21 }
 0x875   : > { %s8684_s24 = sld [smem:[#allocation32_spill]]  ;;  %s8382_s9 = scalar_lea.sflag [#allocation18], %s476_s10 }
 0x876   : > { %s8685_s17 = sld [smem:[#allocation75_spill]]  ;;  %s6086_s28 = scalar_lea.vmem %s4589_s21, 32 }
 0x877   : > { %p6087_p7 = scmp.ne.s32.totalorder %s4589_s21, %s6086_s28  ;;  %s6292_s27 = smov [#allocation17]  }
 0x878   : > { %s6090_s15 = sshll.u32 %s6292_s27, 4  ;;  %s6091_s15 = int_to_ptr.vmem [resolvable:$false] %s6090_s15 }
 0x879   : > { %s6092_s5 = scalar_lea.vmem %s6091_s15, 64  ;;  %p6093_p0 = scmp.lt.s32.totalorder %s4589_s21, %s6091_s15 }
 0x87a   : > { %s4986_s26 = sshll.u32 %s8683_s16, 5  ;;  %p6094_p6 = scmp.lt.s32.totalorder %s6092_s5, %s6086_s28 }
 0x87b   : > { %p8686_p9 = scmp.ne.s32.totalorder %s8684_s24, 0 }
 0x87c   : > { %s4586_s2 = scalar_lea.hbm %s8685_s17, %s4986_s26  ;;  %p6095_p10 = por %p6094_p6, %p6093_p0 }
 0x87d   : > { %p6088_p13 = pnand %p6087_p7, %p8686_p9 }
 0x87f   : > { %p6089_p12 = pneg %p6088_p13 }
 0x881   : > { %p6096_p11 = pnand %p6095_p10, %p6089_p12 }
 0x883   : > { %6099 = shalt.err (!%p6096_p11)
}
 0x884   : > { %s6100_s0 = scalar_lea.hbm %s4586_s2, 32  ;;  %s6104_s8 = scalar_lea.hbm %s8685_s17, 64 }
 0x885   : > { %p6101_p5 = scmp.ne.s32.totalorder %s4586_s2, %s6100_s0  ;;  %p6105_p4 = scmp.lt.s32.totalorder %s4586_s2, %s8685_s17 }
 0x886   : > { %p6106_p8 = scmp.lt.s32.totalorder %s6104_s8, %s6100_s0 }
 0x887   : > { %p6102_p3 = pnand %p6101_p5, %p8686_p9 }
 0x888   : > { %p6107_p1 = por %p6106_p8, %p6105_p4 }
 0x889   : > { %p6103_p2 = pneg %p6102_p3 }
 0x88b   : > { %p6108_p7 = pnand %p6107_p1, %p6103_p2 }
 0x88d   : > { %6111 = shalt.err (!%p6108_p7)
}
 0x88e   : > { %5516 = dma.vmem_to_hbm [thread:$0]  (%p8686_p9), %s4589_s21, 32, %s4586_s2, %s8382_s9  }
 0x88f   : > { %s4985_s4 = sshll.u32 %s8683_s16, 13  ;;  %s4571_s28 = sshll.u32 %s6605_s7, 4  ;;  %s8404_s28 = int_to_ptr.vmem [resolvable:$true] %s4571_s28 }
 0x890   : > { %s8687_s5 = sld [smem:[#allocation74_spill]]  ;;  %s4548_s0 = scalar_lea.sflag [#allocation9], %s6576_s11 }
 0x891   : > { %s6112_s10 = scalar_lea.vmem %s8404_s28, 8192  ;;  %s6293_s8 = smov [#allocation16]  }
 0x892   : > { %p6113_p13 = scmp.ne.s32.totalorder %s8404_s28, %s6112_s10  ;;  %s6116_s2 = sshll.u32 %s6293_s8, 4  ;;  %s6117_s2 = int_to_ptr.vmem [resolvable:$false] %s6116_s2 }
 0x893   : > { %s6118_s7 = scalar_lea.vmem %s6117_s2, 16384  ;;  %p6119_p6 = scmp.lt.s32.totalorder %s8404_s28, %s6117_s2 }
 0x894   : > { %p6114_p12 = pnand %p6113_p13, %p8686_p9  ;;  %p6120_p10 = scmp.lt.s32.totalorder %s6118_s7, %s6112_s10 }
 0x896   : > { %s8402_s14 = scalar_lea.hbm %s8687_s5, %s4985_s4  ;;  %p6115_p0 = pneg %p6114_p12 }
 0x897   : > { %p6121_p11 = por %p6120_p10, %p6119_p6 }
 0x899   : > { %p6122_p5 = pnand %p6121_p11, %p6115_p0 }
 0x89b   : > { %6125 = shalt.err (!%p6122_p5)
}
 0x89c   : > { %s6126_s21 = scalar_lea.hbm %s8402_s14, 8192  ;;  %s6130_s4 = scalar_lea.hbm %s8687_s5, 16384 }
 0x89d   : > { %p6127_p3 = scmp.ne.s32.totalorder %s8402_s14, %s6126_s21  ;;  %p6131_p8 = scmp.lt.s32.totalorder %s8402_s14, %s8687_s5 }
 0x89e   : > { %p6132_p1 = scmp.lt.s32.totalorder %s6130_s4, %s6126_s21 }
 0x89f   : > { %p6128_p2 = pnand %p6127_p3, %p8686_p9 }
 0x8a0   : > { %p6133_p7 = por %p6132_p1, %p6131_p8 }
 0x8a1   : > { %p6129_p4 = pneg %p6128_p2 }
 0x8a3   : > { %p6134_p13 = pnand %p6133_p7, %p6129_p4 }
 0x8a5   : > { %6137 = shalt.err (!%p6134_p13)
}
 0x8a6   : > { %s6294_s10 = smov 256   ;;  %s6295_s8 = smov 16  }
 0x8a7   : > { %5515 = dma.vmem_to_hbm [thread:$0]  (%p8686_p9), %s8404_s28, 8192, %s8402_s14, %s4548_s0, %s6294_s10, %s6294_s10, %s6295_s8  }
 0x8a8   : > { %s8688_s12 = sld [smem:[#allocation76_spill]]  ;;  %s4602_s19 = sshll.u32 %s6609_s18, 4  ;;  %s4603_s19 = int_to_ptr.vmem [resolvable:$true] %s4602_s19 }
 0x8a9   : > { %s6138_s4 = scalar_lea.vmem %s4603_s19, 32  ;;  %s6296_s27 = smov [#allocation19]  }
 0x8aa   : > { %p6139_p12 = scmp.ne.s32.totalorder %s4603_s19, %s6138_s4  ;;  %s6142_s15 = sshll.u32 %s6296_s27, 4  ;;  %s6143_s15 = int_to_ptr.vmem [resolvable:$false] %s6142_s15 }
 0x8ab   : > { %s6144_s1 = scalar_lea.vmem %s6143_s15, 64  ;;  %p6145_p10 = scmp.lt.s32.totalorder %s4603_s19, %s6143_s15 }
 0x8ac   : > { %p6140_p0 = pnand %p6139_p12, %p8686_p9  ;;  %p6146_p11 = scmp.lt.s32.totalorder %s6144_s1, %s6138_s4 }
 0x8ae   : > { %s4600_s21 = scalar_lea.hbm %s8688_s12, %s4986_s26  ;;  %p6141_p6 = pneg %p6140_p0 }
 0x8af   : > { %p6147_p5 = por %p6146_p11, %p6145_p10 }
 0x8b1   : > { %p6148_p3 = pnand %p6147_p5, %p6141_p6 }
 0x8b3   : > { %6151 = shalt.err (!%p6148_p3)
}
 0x8b4   : > { %s6152_s11 = scalar_lea.hbm %s4600_s21, 32  ;;  %s6156_s26 = scalar_lea.hbm %s8688_s12, 64 }
 0x8b5   : > { %p6153_p2 = scmp.ne.s32.totalorder %s4600_s21, %s6152_s11  ;;  %p6157_p1 = scmp.lt.s32.totalorder %s4600_s21, %s8688_s12 }
 0x8b6   : > { %p6158_p7 = scmp.lt.s32.totalorder %s6156_s26, %s6152_s11 }
 0x8b7   : > { %p6154_p4 = pnand %p6153_p2, %p8686_p9 }
 0x8b8   : > { %p6159_p13 = por %p6158_p7, %p6157_p1 }
 0x8b9   : > { %p6155_p8 = pneg %p6154_p4 }
 0x8bb   : > { %p6160_p12 = pnand %p6159_p13, %p6155_p8 }
 0x8bd   : > { %6163 = shalt.err (!%p6160_p12)
}
 0x8be   : > { %5517 = dma.vmem_to_hbm [thread:$0]  (%p8686_p9), %s4603_s19, 32, %s4600_s21, %s8382_s9  }
 0x8bf PF: > { %s8689_s1 = sld [smem:[#allocation26_spill]]  ;;  %p5555_p0 = scmp.ge.s32.totalorder %s6274_s13, 2 }
 0x8c0   : > { %s8690_s0 = sld [smem:[#allocation30_spill]] }
 0x8c5   : > { %s4614_s10 = sand.u32 1, %s8689_s1  }
 0x8c6   : > { %p8691_p6 = scmp.ne.s32.totalorder %s8690_s0, 0  ;;  %s4615_s8 = scalar_lea.sflag [#allocation9], %s4614_s10 }
 0x8c8   : > { %p5539_p10 = pnand %p5555_p0, %p8691_p6 }
 0x8ca   : > { %p5540_p11 = pneg %p5539_p10 }
 0x8cc   : > { %6225 = dma.done.wait (%p5540_p11), %s4615_s8, 8192  }
 0x8cd   : > { %6227 = vsyncadd (%p5540_p11), %s4615_s8, 4294959104  ;;  %s8692_s2 = sadd.s32 4294967294, %s6274_s13  }
 0x8ce   : > { %s4623_s7 = sand.u32 1, %s8692_s2  }
 0x8cf   : > { %s4624_s4 = scalar_lea.sflag [#allocation18], %s4623_s7 }
 0x8d0   : > { %6229 = dma.done.wait (%p5540_p11), %s4624_s4, 64  }
 0x8d1   : > { %6231 = vsyncadd (%p5540_p11), %s4624_s4, 4294967232  ;;  %s36_s13 = sadd.s32 1, %s6274_s13   ;;  %s8693_s9 = sld [smem:[#allocation27_spill]] }
 0x8d2   : > { %p33_p9 = scmp.ge.s32.totalorder %s36_s13, 6   ;;  %s8694_s26 = sld [smem:[#allocation34_spill]] }
 0x8d3   : > { %s8695_s19 = sld [smem:[#allocation31_spill]]  ;;  %s8697_s21 = smov %s6238_s22 }
 0x8d4   : > { %s8696_s15 = sld [smem:[#allocation33_spill]]  ;;  %s8698_s22 = smov %s6242_s23 }
 0x8d5   : > { %s8699_s23 = smov %s6531_s6  ;;  %s8700_s24 = smov %s6250_s25 }
 0x8d6   : > { %s8702_s27 = smov %s6266_s29  ;;  %s8703_s28 = smov %s6270_s30 }
 0x8d7   : > { %s8701_s25 = smov %s8693_s9  ;;  %35 = sbr.rel (!%p33_p9) target bundleno = 28 (0x1c), region = 171 }
 0x8d9   : > { %s8704_s29 = smov %s8695_s19 }
 0x8da   : > { %s8705_s30 = smov %s8696_s15 }
 0x8dc   :  { %4638 = vsyncpa [#allocation8], 1 }
 0x8dd   :  { %4640 = vsyncpa [#allocation8 + $0x1], 1 }
 0x8de   :  { %4641 = vsyncpa [#allocation11], 1 }
 0x8df   :  { %4643 = vsyncpa [#allocation11 + $0x1], 1 }
 0x8e0   :  { %4644 = vsyncpa [#allocation14], 1 }
 0x8e1   :  { %4645 = vsyncpa [#allocation9], 1 }
 0x8e2   :  { %4647 = vsyncpa [#allocation9 + $0x1], 1 }
 0x8e3   :  { %4648 = vsyncpa [#allocation18], 1 }
 0x8e4   :  { %4650 = vsyncpa [#allocation18 + $0x1], 1 }

</bundles_post_ra>
